<compile_context>
chip_gen: v5e
topology: v5e:2x2
jax: 0.10.0
libtpu: 0.0.40
codegen_flags: <defaults>
</compile_context>

<pallas_src>
import functools

import jax
import jax.numpy as jnp
from jax.experimental import pallas as pl
from jax.experimental.pallas import tpu as pltpu


# --------------------------------------------------------------------------
# Helpers
# --------------------------------------------------------------------------
def _zero_halo(scr):
    """Zero the 1-element border of a padded (Wp2, Hp2, C) VMEM scratch."""
    Wp2, Hp2, C = scr.shape
    zr = jnp.zeros((1, Hp2, C), scr.dtype)
    zc = jnp.zeros((Wp2, 1, C), scr.dtype)
    scr[0:1, :, :] = zr
    scr[Wp2 - 1:Wp2, :, :] = zr
    scr[:, 0:1, :] = zc
    scr[:, Hp2 - 1:Hp2, :] = zc


# --------------------------------------------------------------------------
# Stage 1: conv1(folded 1-ch, K=9 im2col) + ReLU + conv2(64->64) + ReLU fused.
# One image per grid step; relu_1_1 stays in a zero-halo VMEM scratch.
# --------------------------------------------------------------------------
def _stage1_kernel(p_ref, w1_ref, b1_ref, w2_ref, b2_ref, r12_ref, h1p_ref, *, W, H):
    # p_ref : (1, W, H, 9)   layer-1 im2col patches of the (folded) single channel, bf16
    # w1_ref: (9, C1) bf16   conv1 weights summed over the 3 identical input channels
    # b1_ref: (1, C1) f32
    # w2_ref: (3, 3, C1, C1) bf16
    # b2_ref: (1, C1) f32
    # r12_ref: (1, W, H, C1) bf16  -> relu_1_2
    # h1p_ref: VMEM scratch (W+2, H+2, C1) bf16 (zero-halo padded relu_1_1)
    C1 = r12_ref.shape[-1]

    # conv1 + ReLU: single MXU matmul (M=W*H, K=9, N=C1), f32 accumulation.
    h1 = jnp.dot(p_ref[0].reshape(W * H, 9), w1_ref[...],
                 preferred_element_type=jnp.float32)
    h1 = jnp.maximum(h1 + b1_ref[...], 0.0)

    # In-kernel "same" padding: zero halo strips, write interior (bf16).
    _zero_halo(h1p_ref)
    h1p_ref[1:W + 1, 1:H + 1, :] = h1.reshape(W, H, C1).astype(h1p_ref.dtype)

    # conv2 + ReLU: 9 shifted taps read straight from the padded VMEM scratch.
    acc = jnp.zeros((W * H, C1), jnp.float32)
    for dy in range(3):
        for dx in range(3):
            tap = h1p_ref[dy:dy + W, dx:dx + H, :].reshape(W * H, C1)
            acc = acc + jnp.dot(tap, w2_ref[dy, dx],
                                preferred_element_type=jnp.float32)
    h2 = jnp.maximum(acc + b2_ref[...], 0.0)
    r12_ref[0] = h2.reshape(W, H, C1).astype(r12_ref.dtype)


def stage1(patches, w1e, b1, w2, b2):
    N, W, H, _ = patches.shape
    C1 = w1e.shape[-1]
    kern = functools.partial(_stage1_kernel, W=W, H=H)
    return pl.pallas_call(
        kern,
        out_shape=jax.ShapeDtypeStruct((N, W, H, C1), jnp.bfloat16),
        grid=(N,),
        in_specs=[
            pl.BlockSpec((1, W, H, 9), lambda n: (n, 0, 0, 0)),
            pl.BlockSpec((9, C1), lambda n: (0, 0)),
            pl.BlockSpec((1, C1), lambda n: (0, 0)),
            pl.BlockSpec((3, 3, C1, C1), lambda n: (0, 0, 0, 0)),
            pl.BlockSpec((1, C1), lambda n: (0, 0)),
        ],
        out_specs=pl.BlockSpec((1, W, H, C1), lambda n: (n, 0, 0, 0)),
        scratch_shapes=[pltpu.VMEM((W + 2, H + 2, C1), jnp.bfloat16)],
        compiler_params=pltpu.CompilerParams(
            dimension_semantics=("parallel",),
            vmem_limit_bytes=48 * 1024 * 1024),
    )(patches, w1e, b1, w2, b2)


# --------------------------------------------------------------------------
# Stage 2: conv3(64->128) + ReLU + conv4(128->128) + ReLU fused (post-maxpool).
# --------------------------------------------------------------------------
def _stage2_kernel(x_ref, w3_ref, b3_ref, w4_ref, b4_ref, r22_ref,
                   xp_ref, h3p_ref, *, W, H):
    # x_ref : (1, W, H, C1) bf16   pooled relu_1_2
    # w3_ref: (3,3,C1,C2) bf16, b3_ref: (1,C2) f32
    # w4_ref: (3,3,C2,C2) bf16, b4_ref: (1,C2) f32
    # r22_ref: (1, W, H, C2) bf16  -> relu_2_2
    # xp_ref : VMEM (W+2, H+2, C1) bf16 ; h3p_ref: VMEM (W+2, H+2, C2) bf16
    C1 = x_ref.shape[-1]
    C2 = r22_ref.shape[-1]

    _zero_halo(xp_ref)
    xp_ref[1:W + 1, 1:H + 1, :] = x_ref[0]

    # conv3 + ReLU
    acc = jnp.zeros((W * H, C2), jnp.float32)
    for dy in range(3):
        for dx in range(3):
            tap = xp_ref[dy:dy + W, dx:dx + H, :].reshape(W * H, C1)
            acc = acc + jnp.dot(tap, w3_ref[dy, dx],
                                preferred_element_type=jnp.float32)
    h3 = jnp.maximum(acc + b3_ref[...], 0.0)

    _zero_halo(h3p_ref)
    h3p_ref[1:W + 1, 1:H + 1, :] = h3.reshape(W, H, C2).astype(h3p_ref.dtype)

    # conv4 + ReLU
    acc2 = jnp.zeros((W * H, C2), jnp.float32)
    for dy in range(3):
        for dx in range(3):
            tap = h3p_ref[dy:dy + W, dx:dx + H, :].reshape(W * H, C2)
            acc2 = acc2 + jnp.dot(tap, w4_ref[dy, dx],
                                  preferred_element_type=jnp.float32)
    h4 = jnp.maximum(acc2 + b4_ref[...], 0.0)
    r22_ref[0] = h4.reshape(W, H, C2).astype(r22_ref.dtype)


def stage2(pooled, w3, b3, w4, b4):
    N, W, H, C1 = pooled.shape
    C2 = w3.shape[-1]
    kern = functools.partial(_stage2_kernel, W=W, H=H)
    return pl.pallas_call(
        kern,
        out_shape=jax.ShapeDtypeStruct((N, W, H, C2), jnp.bfloat16),
        grid=(N,),
        in_specs=[
            pl.BlockSpec((1, W, H, C1), lambda n: (n, 0, 0, 0)),
            pl.BlockSpec((3, 3, C1, C2), lambda n: (0, 0, 0, 0)),
            pl.BlockSpec((1, C2), lambda n: (0, 0)),
            pl.BlockSpec((3, 3, C2, C2), lambda n: (0, 0, 0, 0)),
            pl.BlockSpec((1, C2), lambda n: (0, 0)),
        ],
        out_specs=pl.BlockSpec((1, W, H, C2), lambda n: (n, 0, 0, 0)),
        scratch_shapes=[pltpu.VMEM((W + 2, H + 2, C1), jnp.bfloat16),
                        pltpu.VMEM((W + 2, H + 2, C2), jnp.bfloat16)],
        compiler_params=pltpu.CompilerParams(
            dimension_semantics=("parallel",),
            vmem_limit_bytes=48 * 1024 * 1024),
    )(pooled, w3, b3, w4, b4)


# --------------------------------------------------------------------------
# MSE between the first S and last S images of a stacked feature array.
# Multi-image blocks; squared diffs accumulate into an (H, C) f32 VMEM vector
# accumulator; one cross-lane reduce + SMEM scalar write at the last step.
# --------------------------------------------------------------------------
def _mse_sum_kernel(a_ref, b_ref, o_ref, acc_ref):
    @pl.when(pl.program_id(0) == 0)
    def _():
        acc_ref[...] = jnp.zeros_like(acc_ref)

    d = a_ref[...].astype(jnp.float32) - b_ref[...].astype(jnp.float32)
    acc_ref[...] += jnp.sum(d * d, axis=(0, 1))   # reduce leading dims only

    @pl.when(pl.program_id(0) == pl.num_programs(0) - 1)
    def _():
        o_ref[0, 0] = jnp.sum(acc_ref[...])


def mse_halves(feat, S):
    # feat: (2S, W, H, C); mean squared error between feat[:S] and feat[S:].
    _, W, H, C = feat.shape
    per_img_bytes = W * H * C * feat.dtype.itemsize
    nb = max(1, min(S, (4 << 20) // max(per_img_bytes, 1)))
    while S % nb:
        nb -= 1
    nblk = S // nb
    blk = (nb, W, H, C)
    total = pl.pallas_call(
        _mse_sum_kernel,
        out_shape=jax.ShapeDtypeStruct((1, 1), jnp.float32),
        grid=(nblk,),
        in_specs=[
            pl.BlockSpec(blk, lambda i: (i, 0, 0, 0)),
            pl.BlockSpec(blk, lambda i, _off=nblk: (i + _off, 0, 0, 0)),
        ],
        out_specs=pl.BlockSpec((1, 1), lambda i: (0, 0),
                               memory_space=pltpu.MemorySpace.SMEM),
        scratch_shapes=[pltpu.VMEM((H, C), jnp.float32)],
        compiler_params=pltpu.CompilerParams(
            dimension_semantics=("arbitrary",)),
    )(feat, feat)
    return total[0, 0] / (S * W * H * C)


# --------------------------------------------------------------------------
# Host-side glue
# --------------------------------------------------------------------------
def maxpool2x2(x):
    # x: (N, W, H, C); torch MaxPool2d(2,2) floor-truncates odd spatial dims.
    N, W, H, C = x.shape
    W2, H2 = W // 2, H // 2
    x = x[:, :W2 * 2, :H2 * 2, :]
    return x.reshape(N, W2, 2, H2, 2, C).max(axis=(2, 4))


def init_vgg_params(key):
    # Synthetic deterministic "VGG16" weights (features[0:9] conv layers).
    shapes = [(3, 64), (64, 64), (64, 128), (128, 128)]
    keys = jax.random.split(key, len(shapes))
    raw = [jax.random.normal(k, (3, 3, cin, cout), jnp.float32)
           * (2.0 / (9 * cin)) ** 0.5
           for (cin, cout), k in zip(shapes, keys)]
    return {
        # conv1: fold the 1->3 channel repeat into the weights (exact, since the
        # replicated channels are identical). Row order matches dy*3+dx patches.
        "w1e": raw[0].sum(axis=2).reshape(9, 64).astype(jnp.bfloat16),
        "b1": jnp.zeros((1, 64), jnp.float32),
        "w2": raw[1].astype(jnp.bfloat16),
        "b2": jnp.zeros((1, 64), jnp.float32),
        "w3": raw[2].astype(jnp.bfloat16),
        "b3": jnp.zeros((1, 128), jnp.float32),
        "w4": raw[3].astype(jnp.bfloat16),
        "b4": jnp.zeros((1, 128), jnp.float32),
    }


def percept_loss_forward(inp, tgt, params, memory_constraint, perm_key):
    assert inp.shape == tgt.shape, "input and target should have identical dimension"
    assert inp.ndim == 6
    batch, channel, width, height, depth, T = inp.shape
    assert channel == 1
    num_slices = batch * T * depth
    n_sel = int(num_slices * memory_constraint)
    assert n_sel >= 1
    represent = jax.random.permutation(perm_key, num_slices)[:n_sel]

    def prep(x):
        # torch: permute(0,5,1,4,2,3) -> (B, T, C, D, W, H), reshape, slice
        x = jnp.transpose(x, (0, 5, 1, 4, 2, 3)).reshape(num_slices, width, height)
        return x[represent]                            # (S, W, H)

    # Stack input + target so one batched pass computes both feature sets.
    xs = jnp.concatenate([prep(inp), prep(tgt)], axis=0).astype(jnp.bfloat16)
    xs = jnp.pad(xs, ((0, 0), (1, 1), (1, 1)))         # pad the 1-channel raw slices only
    # Layer-1 im2col on the folded single channel: (2S, W, H, 9), bf16.
    patches = jnp.stack([xs[:, dy:dy + width, dx:dx + height]
                         for dy in range(3) for dx in range(3)], axis=-1)

    r12 = stage1(patches, params["w1e"], params["b1"], params["w2"], params["b2"])
    pooled = maxpool2x2(r12)
    r22 = stage2(pooled, params["w3"], params["b3"], params["w4"], params["b4"])

    # to_relu_3_3 (features[9:16]) never reaches the returned loss -> skipped.
    return mse_halves(r12, n_sel) + mse_halves(r22, n_sel)


if __name__ == "__main__":
    key = jax.random.PRNGKey(0)
    k_in, k_tgt, k_params, k_perm = jax.random.split(key, 4)

    # Small shapes consistent with the 6-D (B, C, W, H, D, T) input contract.
    B, C, W, H, D, T = 1, 1, 16, 16, 2, 2
    inp = jax.random.normal(k_in, (B, C, W, H, D, T), jnp.float32)
    tgt = jax.random.normal(k_tgt, (B, C, W, H, D, T), jnp.float32)

    params = init_vgg_params(k_params)
    memory_constraint = 0.5

    loss = percept_loss_forward(inp, tgt, params, memory_constraint, k_perm)
    loss = jax.block_until_ready(loss)
    assert loss.shape == () and jnp.isfinite(loss)
    print("KERNEL_OK")
</pallas_src>

<mosaic_0001>
module attributes {stable_mosaic.version = 11 : i64} {
  func.func @_stage1_kernel(%arg0: i32, %arg1: memref<1x16x16x9xbf16, #tpu.memory_space<vmem>>, %arg2: memref<9x64xbf16, #tpu.memory_space<vmem>>, %arg3: memref<1x64xf32, #tpu.memory_space<vmem>>, %arg4: memref<3x3x64x64xbf16, #tpu.memory_space<vmem>>, %arg5: memref<1x64xf32, #tpu.memory_space<vmem>>, %arg6: memref<1x16x16x64xbf16, #tpu.memory_space<vmem>>, %arg7: memref<18x18x64xbf16, #tpu.memory_space<vmem>>) attributes {dimension_semantics = [#tpu.dimension_semantics<parallel>], iteration_bounds = array<i64: 4>, scalar_prefetch = 0 : i64, scratch_operands = 1 : i64, tpu.core_type = #tpu.core_type<tc>, window_params = [{transform_indices = @transform_0, window_bounds = array<i64: 1, 16, 16, 9>}, {pipeline_mode = #tpu.pipeline_mode<synchronous>, transform_indices = @transform_1, window_bounds = array<i64: 9, 64>}, {pipeline_mode = #tpu.pipeline_mode<synchronous>, transform_indices = @transform_2, window_bounds = array<i64: 1, 64>}, {pipeline_mode = #tpu.pipeline_mode<synchronous>, transform_indices = @transform_3, window_bounds = array<i64: 3, 3, 64, 64>}, {pipeline_mode = #tpu.pipeline_mode<synchronous>, transform_indices = @transform_4, window_bounds = array<i64: 1, 64>}, {transform_indices = @transform_5, window_bounds = array<i64: 1, 16, 16, 64>}]} {
    %c0 = arith.constant 0 : index
    %c0_0 = arith.constant 0 : index
    %c0_1 = arith.constant 0 : index
    %c0_2 = arith.constant 0 : index
    %0 = vector.load %arg1[%c0, %c0_0, %c0_1, %c0_2] : memref<1x16x16x9xbf16, #tpu.memory_space<vmem>>, vector<1x16x16x9xbf16>
    %1 = vector.shape_cast %0 : vector<1x16x16x9xbf16> to vector<16x16x9xbf16>
    %2 = vector.shape_cast %1 : vector<16x16x9xbf16> to vector<256x9xbf16>
    %c0_3 = arith.constant 0 : index
    %c0_4 = arith.constant 0 : index
    %3 = vector.load %arg2[%c0_3, %c0_4] : memref<9x64xbf16, #tpu.memory_space<vmem>>, vector<9x64xbf16>
    %cst = arith.constant dense<0.000000e+00> : vector<256x64xf32>
    %4 = tpu.matmul %2, %3, %cst {dimension_numbers = #tpu.dot_dimension_numbers<[1], [0], [0], [1], [0, 0, 1, 1], [], []>} : vector<256x9xbf16>, vector<9x64xbf16>, vector<256x64xf32> -> vector<256x64xf32>
    %c0_5 = arith.constant 0 : index
    %c0_6 = arith.constant 0 : index
    %5 = vector.load %arg3[%c0_5, %c0_6] : memref<1x64xf32, #tpu.memory_space<vmem>>, vector<1x64xf32>
    %6 = vector.broadcast %5 : vector<1x64xf32> to vector<256x64xf32>
    %7 = arith.addf %4, %6 : vector<256x64xf32>
    %cst_7 = arith.constant 0.000000e+00 : f32
    %8 = vector.broadcast %cst_7 : f32 to vector<256x64xf32>
    %9 = arith.maximumf %7, %8 : vector<256x64xf32>
    %cst_8 = arith.constant 0.000000e+00 : bf16
    %10 = vector.broadcast %cst_8 : bf16 to vector<1x18x64xbf16>
    %cst_9 = arith.constant 0.000000e+00 : bf16
    %11 = vector.broadcast %cst_9 : bf16 to vector<18x1x64xbf16>
    %c0_10 = arith.constant 0 : index
    %c0_11 = arith.constant 0 : index
    %c0_12 = arith.constant 0 : index
    %12 = vector.load %arg7[%c0_10, %c0_11, %c0_12] : memref<18x18x64xbf16, #tpu.memory_space<vmem>>, vector<1x18x64xbf16>
    tpu.vector_store %arg7[%c0_10, %c0_11, %c0_12], %10 {strides = array<i32>} : memref<18x18x64xbf16, #tpu.memory_space<vmem>>, vector<1x18x64xbf16>,
    %c17 = arith.constant 17 : index
    %c0_13 = arith.constant 0 : index
    %c0_14 = arith.constant 0 : index
    %13 = vector.load %arg7[%c17, %c0_13, %c0_14] : memref<18x18x64xbf16, #tpu.memory_space<vmem>>, vector<1x18x64xbf16>
    tpu.vector_store %arg7[%c17, %c0_13, %c0_14], %10 {strides = array<i32>} : memref<18x18x64xbf16, #tpu.memory_space<vmem>>, vector<1x18x64xbf16>,
    %c0_15 = arith.constant 0 : index
    %c0_16 = arith.constant 0 : index
    %c0_17 = arith.constant 0 : index
    %14 = vector.load %arg7[%c0_15, %c0_16, %c0_17] : memref<18x18x64xbf16, #tpu.memory_space<vmem>>, vector<18x1x64xbf16>
    tpu.vector_store %arg7[%c0_15, %c0_16, %c0_17], %11 {strides = array<i32>} : memref<18x18x64xbf16, #tpu.memory_space<vmem>>, vector<18x1x64xbf16>,
    %c0_18 = arith.constant 0 : index
    %c17_19 = arith.constant 17 : index
    %c0_20 = arith.constant 0 : index
    %15 = vector.load %arg7[%c0_18, %c17_19, %c0_20] : memref<18x18x64xbf16, #tpu.memory_space<vmem>>, vector<18x1x64xbf16>
    tpu.vector_store %arg7[%c0_18, %c17_19, %c0_20], %11 {strides = array<i32>} : memref<18x18x64xbf16, #tpu.memory_space<vmem>>, vector<18x1x64xbf16>,
    %16 = vector.shape_cast %9 : vector<256x64xf32> to vector<16x16x64xf32>
    %17 = arith.truncf %16 : vector<16x16x64xf32> to vector<16x16x64xbf16>
    %c1 = arith.constant 1 : index
    %c1_21 = arith.constant 1 : index
    %c0_22 = arith.constant 0 : index
    %18 = vector.load %arg7[%c1, %c1_21, %c0_22] : memref<18x18x64xbf16, #tpu.memory_space<vmem>>, vector<16x16x64xbf16>
    tpu.vector_store %arg7[%c1, %c1_21, %c0_22], %17 {strides = array<i32>} : memref<18x18x64xbf16, #tpu.memory_space<vmem>>, vector<16x16x64xbf16>,
    %cst_23 = arith.constant 0.000000e+00 : f32
    %19 = vector.broadcast %cst_23 : f32 to vector<256x64xf32>
    %c0_24 = arith.constant 0 : index
    %c0_25 = arith.constant 0 : index
    %c0_26 = arith.constant 0 : index
    %20 = vector.load %arg7[%c0_24, %c0_25, %c0_26] : memref<18x18x64xbf16, #tpu.memory_space<vmem>>, vector<16x16x64xbf16>
    %21 = vector.shape_cast %20 : vector<16x16x64xbf16> to vector<256x64xbf16>
    %c0_27 = arith.constant 0 : index
    %c0_28 = arith.constant 0 : index
    %c0_29 = arith.constant 0 : index
    %c0_30 = arith.constant 0 : index
    %22 = vector.load %arg4[%c0_27, %c0_28, %c0_29, %c0_30] : memref<3x3x64x64xbf16, #tpu.memory_space<vmem>>, vector<1x1x64x64xbf16>
    %23 = vector.shape_cast %22 : vector<1x1x64x64xbf16> to vector<64x64xbf16>
    %cst_31 = arith.constant dense<0.000000e+00> : vector<256x64xf32>
    %24 = tpu.matmul %21, %23, %cst_31 {dimension_numbers = #tpu.dot_dimension_numbers<[1], [0], [0], [1], [0, 0, 1, 1], [], []>} : vector<256x64xbf16>, vector<64x64xbf16>, vector<256x64xf32> -> vector<256x64xf32>
    %25 = arith.addf %19, %24 : vector<256x64xf32>
    %c0_32 = arith.constant 0 : index
    %c1_33 = arith.constant 1 : index
    %c0_34 = arith.constant 0 : index
    %26 = vector.load %arg7[%c0_32, %c1_33, %c0_34] : memref<18x18x64xbf16, #tpu.memory_space<vmem>>, vector<16x16x64xbf16>
    %27 = vector.shape_cast %26 : vector<16x16x64xbf16> to vector<256x64xbf16>
    %c0_35 = arith.constant 0 : index
    %c1_36 = arith.constant 1 : index
    %c0_37 = arith.constant 0 : index
    %c0_38 = arith.constant 0 : index
    %28 = vector.load %arg4[%c0_35, %c1_36, %c0_37, %c0_38] : memref<3x3x64x64xbf16, #tpu.memory_space<vmem>>, vector<1x1x64x64xbf16>
    %29 = vector.shape_cast %28 : vector<1x1x64x64xbf16> to vector<64x64xbf16>
    %cst_39 = arith.constant dense<0.000000e+00> : vector<256x64xf32>
    %30 = tpu.matmul %27, %29, %cst_39 {dimension_numbers = #tpu.dot_dimension_numbers<[1], [0], [0], [1], [0, 0, 1, 1], [], []>} : vector<256x64xbf16>, vector<64x64xbf16>, vector<256x64xf32> -> vector<256x64xf32>
    %31 = arith.addf %25, %30 : vector<256x64xf32>
    %c0_40 = arith.constant 0 : index
    %c2 = arith.constant 2 : index
    %c0_41 = arith.constant 0 : index
    %32 = vector.load %arg7[%c0_40, %c2, %c0_41] : memref<18x18x64xbf16, #tpu.memory_space<vmem>>, vector<16x16x64xbf16>
    %33 = vector.shape_cast %32 : vector<16x16x64xbf16> to vector<256x64xbf16>
    %c0_42 = arith.constant 0 : index
    %c2_43 = arith.constant 2 : index
    %c0_44 = arith.constant 0 : index
    %c0_45 = arith.constant 0 : index
    %34 = vector.load %arg4[%c0_42, %c2_43, %c0_44, %c0_45] : memref<3x3x64x64xbf16, #tpu.memory_space<vmem>>, vector<1x1x64x64xbf16>
    %35 = vector.shape_cast %34 : vector<1x1x64x64xbf16> to vector<64x64xbf16>
    %cst_46 = arith.constant dense<0.000000e+00> : vector<256x64xf32>
    %36 = tpu.matmul %33, %35, %cst_46 {dimension_numbers = #tpu.dot_dimension_numbers<[1], [0], [0], [1], [0, 0, 1, 1], [], []>} : vector<256x64xbf16>, vector<64x64xbf16>, vector<256x64xf32> -> vector<256x64xf32>
    %37 = arith.addf %31, %36 : vector<256x64xf32>
    %c1_47 = arith.constant 1 : index
    %c0_48 = arith.constant 0 : index
    %c0_49 = arith.constant 0 : index
    %38 = vector.load %arg7[%c1_47, %c0_48, %c0_49] : memref<18x18x64xbf16, #tpu.memory_space<vmem>>, vector<16x16x64xbf16>
    %39 = vector.shape_cast %38 : vector<16x16x64xbf16> to vector<256x64xbf16>
    %c1_50 = arith.constant 1 : index
    %c0_51 = arith.constant 0 : index
    %c0_52 = arith.constant 0 : index
    %c0_53 = arith.constant 0 : index
    %40 = vector.load %arg4[%c1_50, %c0_51, %c0_52, %c0_53] : memref<3x3x64x64xbf16, #tpu.memory_space<vmem>>, vector<1x1x64x64xbf16>
    %41 = vector.shape_cast %40 : vector<1x1x64x64xbf16> to vector<64x64xbf16>
    %cst_54 = arith.constant dense<0.000000e+00> : vector<256x64xf32>
    %42 = tpu.matmul %39, %41, %cst_54 {dimension_numbers = #tpu.dot_dimension_numbers<[1], [0], [0], [1], [0, 0, 1, 1], [], []>} : vector<256x64xbf16>, vector<64x64xbf16>, vector<256x64xf32> -> vector<256x64xf32>
    %43 = arith.addf %37, %42 : vector<256x64xf32>
    %c1_55 = arith.constant 1 : index
    %c1_56 = arith.constant 1 : index
    %c0_57 = arith.constant 0 : index
    %44 = vector.load %arg7[%c1_55, %c1_56, %c0_57] : memref<18x18x64xbf16, #tpu.memory_space<vmem>>, vector<16x16x64xbf16>
    %45 = vector.shape_cast %44 : vector<16x16x64xbf16> to vector<256x64xbf16>
    %c1_58 = arith.constant 1 : index
    %c1_59 = arith.constant 1 : index
    %c0_60 = arith.constant 0 : index
    %c0_61 = arith.constant 0 : index
    %46 = vector.load %arg4[%c1_58, %c1_59, %c0_60, %c0_61] : memref<3x3x64x64xbf16, #tpu.memory_space<vmem>>, vector<1x1x64x64xbf16>
    %47 = vector.shape_cast %46 : vector<1x1x64x64xbf16> to vector<64x64xbf16>
    %cst_62 = arith.constant dense<0.000000e+00> : vector<256x64xf32>
    %48 = tpu.matmul %45, %47, %cst_62 {dimension_numbers = #tpu.dot_dimension_numbers<[1], [0], [0], [1], [0, 0, 1, 1], [], []>} : vector<256x64xbf16>, vector<64x64xbf16>, vector<256x64xf32> -> vector<256x64xf32>
    %49 = arith.addf %43, %48 : vector<256x64xf32>
    %c1_63 = arith.constant 1 : index
    %c2_64 = arith.constant 2 : index
    %c0_65 = arith.constant 0 : index
    %50 = vector.load %arg7[%c1_63, %c2_64, %c0_65] : memref<18x18x64xbf16, #tpu.memory_space<vmem>>, vector<16x16x64xbf16>
    %51 = vector.shape_cast %50 : vector<16x16x64xbf16> to vector<256x64xbf16>
    %c1_66 = arith.constant 1 : index
    %c2_67 = arith.constant 2 : index
    %c0_68 = arith.constant 0 : index
    %c0_69 = arith.constant 0 : index
    %52 = vector.load %arg4[%c1_66, %c2_67, %c0_68, %c0_69] : memref<3x3x64x64xbf16, #tpu.memory_space<vmem>>, vector<1x1x64x64xbf16>
    %53 = vector.shape_cast %52 : vector<1x1x64x64xbf16> to vector<64x64xbf16>
    %cst_70 = arith.constant dense<0.000000e+00> : vector<256x64xf32>
    %54 = tpu.matmul %51, %53, %cst_70 {dimension_numbers = #tpu.dot_dimension_numbers<[1], [0], [0], [1], [0, 0, 1, 1], [], []>} : vector<256x64xbf16>, vector<64x64xbf16>, vector<256x64xf32> -> vector<256x64xf32>
    %55 = arith.addf %49, %54 : vector<256x64xf32>
    %c2_71 = arith.constant 2 : index
    %c0_72 = arith.constant 0 : index
    %c0_73 = arith.constant 0 : index
    %56 = vector.load %arg7[%c2_71, %c0_72, %c0_73] : memref<18x18x64xbf16, #tpu.memory_space<vmem>>, vector<16x16x64xbf16>
    %57 = vector.shape_cast %56 : vector<16x16x64xbf16> to vector<256x64xbf16>
    %c2_74 = arith.constant 2 : index
    %c0_75 = arith.constant 0 : index
    %c0_76 = arith.constant 0 : index
    %c0_77 = arith.constant 0 : index
    %58 = vector.load %arg4[%c2_74, %c0_75, %c0_76, %c0_77] : memref<3x3x64x64xbf16, #tpu.memory_space<vmem>>, vector<1x1x64x64xbf16>
    %59 = vector.shape_cast %58 : vector<1x1x64x64xbf16> to vector<64x64xbf16>
    %cst_78 = arith.constant dense<0.000000e+00> : vector<256x64xf32>
    %60 = tpu.matmul %57, %59, %cst_78 {dimension_numbers = #tpu.dot_dimension_numbers<[1], [0], [0], [1], [0, 0, 1, 1], [], []>} : vector<256x64xbf16>, vector<64x64xbf16>, vector<256x64xf32> -> vector<256x64xf32>
    %61 = arith.addf %55, %60 : vector<256x64xf32>
    %c2_79 = arith.constant 2 : index
    %c1_80 = arith.constant 1 : index
    %c0_81 = arith.constant 0 : index
    %62 = vector.load %arg7[%c2_79, %c1_80, %c0_81] : memref<18x18x64xbf16, #tpu.memory_space<vmem>>, vector<16x16x64xbf16>
    %63 = vector.shape_cast %62 : vector<16x16x64xbf16> to vector<256x64xbf16>
    %c2_82 = arith.constant 2 : index
    %c1_83 = arith.constant 1 : index
    %c0_84 = arith.constant 0 : index
    %c0_85 = arith.constant 0 : index
    %64 = vector.load %arg4[%c2_82, %c1_83, %c0_84, %c0_85] : memref<3x3x64x64xbf16, #tpu.memory_space<vmem>>, vector<1x1x64x64xbf16>
    %65 = vector.shape_cast %64 : vector<1x1x64x64xbf16> to vector<64x64xbf16>
    %cst_86 = arith.constant dense<0.000000e+00> : vector<256x64xf32>
    %66 = tpu.matmul %63, %65, %cst_86 {dimension_numbers = #tpu.dot_dimension_numbers<[1], [0], [0], [1], [0, 0, 1, 1], [], []>} : vector<256x64xbf16>, vector<64x64xbf16>, vector<256x64xf32> -> vector<256x64xf32>
    %67 = arith.addf %61, %66 : vector<256x64xf32>
    %c2_87 = arith.constant 2 : index
    %c2_88 = arith.constant 2 : index
    %c0_89 = arith.constant 0 : index
    %68 = vector.load %arg7[%c2_87, %c2_88, %c0_89] : memref<18x18x64xbf16, #tpu.memory_space<vmem>>, vector<16x16x64xbf16>
    %69 = vector.shape_cast %68 : vector<16x16x64xbf16> to vector<256x64xbf16>
    %c2_90 = arith.constant 2 : index
    %c2_91 = arith.constant 2 : index
    %c0_92 = arith.constant 0 : index
    %c0_93 = arith.constant 0 : index
    %70 = vector.load %arg4[%c2_90, %c2_91, %c0_92, %c0_93] : memref<3x3x64x64xbf16, #tpu.memory_space<vmem>>, vector<1x1x64x64xbf16>
    %71 = vector.shape_cast %70 : vector<1x1x64x64xbf16> to vector<64x64xbf16>
    %cst_94 = arith.constant dense<0.000000e+00> : vector<256x64xf32>
    %72 = tpu.matmul %69, %71, %cst_94 {dimension_numbers = #tpu.dot_dimension_numbers<[1], [0], [0], [1], [0, 0, 1, 1], [], []>} : vector<256x64xbf16>, vector<64x64xbf16>, vector<256x64xf32> -> vector<256x64xf32>
    %73 = arith.addf %67, %72 : vector<256x64xf32>
    %c0_95 = arith.constant 0 : index
    %c0_96 = arith.constant 0 : index
    %74 = vector.load %arg5[%c0_95, %c0_96] : memref<1x64xf32, #tpu.memory_space<vmem>>, vector<1x64xf32>
    %75 = vector.broadcast %74 : vector<1x64xf32> to vector<256x64xf32>
    %76 = arith.addf %73, %75 : vector<256x64xf32>
    %cst_97 = arith.constant 0.000000e+00 : f32
    %77 = vector.broadcast %cst_97 : f32 to vector<256x64xf32>
    %78 = arith.maximumf %76, %77 : vector<256x64xf32>
    %79 = vector.shape_cast %78 : vector<256x64xf32> to vector<16x16x64xf32>
    %80 = arith.truncf %79 : vector<16x16x64xf32> to vector<16x16x64xbf16>
    %c0_98 = arith.constant 0 : index
    %c0_99 = arith.constant 0 : index
    %c0_100 = arith.constant 0 : index
    %c0_101 = arith.constant 0 : index
    %81 = vector.load %arg6[%c0_98, %c0_99, %c0_100, %c0_101] : memref<1x16x16x64xbf16, #tpu.memory_space<vmem>>, vector<1x16x16x64xbf16>
    %82 = vector.shape_cast %81 : vector<1x16x16x64xbf16> to vector<16x16x64xbf16>
    %83 = vector.shape_cast %80 : vector<16x16x64xbf16> to vector<1x16x16x64xbf16>
    tpu.vector_store %arg6[%c0_98, %c0_99, %c0_100, %c0_101], %83 {strides = array<i32>} : memref<1x16x16x64xbf16, #tpu.memory_space<vmem>>, vector<1x16x16x64xbf16>,
    return
  }
  func.func @transform_0(%arg0: i32) -> (i32, i32, i32, i32) {
    %c0_i32 = arith.constant 0 : i32
    %c0_i32_0 = arith.constant 0 : i32
    %c0_i32_1 = arith.constant 0 : i32
    %c0_i32_2 = arith.constant 0 : i32
    return %arg0, %c0_i32, %c0_i32_0, %c0_i32_1 : i32, i32, i32, i32
  }
  func.func @transform_1(%arg0: i32) -> (i32, i32) {
    %c0_i32 = arith.constant 0 : i32
    %c0_i32_0 = arith.constant 0 : i32
    %c0_i32_1 = arith.constant 0 : i32
    return %c0_i32, %c0_i32_0 : i32, i32
  }
  func.func @transform_2(%arg0: i32) -> (i32, i32) {
    %c0_i32 = arith.constant 0 : i32
    %c0_i32_0 = arith.constant 0 : i32
    %c0_i32_1 = arith.constant 0 : i32
    return %c0_i32, %c0_i32_0 : i32, i32
  }
  func.func @transform_3(%arg0: i32) -> (i32, i32, i32, i32) {
    %c0_i32 = arith.constant 0 : i32
    %c0_i32_0 = arith.constant 0 : i32
    %c0_i32_1 = arith.constant 0 : i32
    %c0_i32_2 = arith.constant 0 : i32
    %c0_i32_3 = arith.constant 0 : i32
    return %c0_i32, %c0_i32_0, %c0_i32_1, %c0_i32_2 : i32, i32, i32, i32
  }
  func.func @transform_4(%arg0: i32) -> (i32, i32) {
    %c0_i32 = arith.constant 0 : i32
    %c0_i32_0 = arith.constant 0 : i32
    %c0_i32_1 = arith.constant 0 : i32
    return %c0_i32, %c0_i32_0 : i32, i32
  }
  func.func @transform_5(%arg0: i32) -> (i32, i32, i32, i32) {
    %c0_i32 = arith.constant 0 : i32
    %c0_i32_0 = arith.constant 0 : i32
    %c0_i32_1 = arith.constant 0 : i32
    %c0_i32_2 = arith.constant 0 : i32
    return %arg0, %c0_i32, %c0_i32_0, %c0_i32_1 : i32, i32, i32, i32
  }
}

</mosaic_0001>

<bundles_post_ra>
// kernel: tpu_custom_call.1
= control target key start
LH: loop header
LB: loop body
LE: loop exit
PB: predicated region body
PF: predicated region fallthrough
CT: control target
= control target key end

     0   :  { %10 = vsyncpa [#allocation4], 0  ;;  %s8625_s0 = inlined_call_operand.vmem [shape: bf16[4,16,16,9], index: 0, kind: input, shape index: {}]   ;;  %s8626_s1 = inlined_call_operand.vmem [shape: bf16[9,64], index: 1, kind: input, shape index: {}]   ;;  %s8627_s2 = inlined_call_operand.vmem [shape: f32[1,64], index: 2, kind: input, shape index: {}]   ;;  %s8628_s3 = inlined_call_operand.vmem [shape: bf16[3,3,64,64], index: 3, kind: input, shape index: {}]   ;;  %s8629_s4 = inlined_call_operand.vmem [shape: f32[1,64], index: 4, kind: input, shape index: {}]   ;;  %s8630_s5 = inlined_call_operand.hbm [shape: bf16[4,16,16,64], index: 5, kind: output, shape index: {}]  }
   0x1   :  { %12 = vsyncpa [#allocation4 + $0x1], 0  ;;  %s6457_s18 = smov 0   ;;  %s6459_s19 = smov 0  }
   0x2   :  { %s6461_s20 = smov 0   ;;  %s6463_s21 = smov 0  }
   0x3 LB: > { %s6478_s22 = sadd.s32 4294967295, %s6421_s21   ;;  %s5486_s23 = sadd.s32 4294967294, %s6421_s21   ;;  %s6421_s21 = sphi %s6463_s21, %s8920_s21   ;;  %s6417_s20 = sphi %s6461_s20, %s8919_s20   ;;  %s6413_s19 = sphi %s6459_s19, %s8918_s19   ;;  %s6409_s18 = sphi %s6457_s18, %s8917_s18  }
   0x4   : > { %s6482_s24 = sadd.s32 1, %s6421_s21   ;;  %s135_s25 = sadd.s32 1, %s6417_s20 }
   0x5   : > { %s132_s26 = ssub.s32 %s6421_s21, %s6482_s24  ;;  %p145_p0 = scmp.ne.s32.totalorder %s6417_s20, %s6413_s19 }
   0x6   : > { %p133_p1 = scmp.eq.s32.totalorder %s132_s26, 0  ;;  %p146_p2 = scmp.eq.s32.totalorder %s6478_s22, 3 }
   0x7   : > { %p151_p3 = scmp.ne.s32.totalorder %s6413_s19, %s6409_s18  ;;  %p152_p4 = scmp.eq.s32.totalorder %s5486_s23, 3 }
   0x8   : > { %s6493_s27 = scalar_select %p133_p1, %s6417_s20, %s135_s25  }
   0x9   : > { %p6495_p5 = por %p146_p2, %p145_p0  ;;  %p6499_p6 = por %p152_p4, %p151_p3 }
   0xa   : > { %p5489_p7 = scmp.ge.s32.totalorder %s6421_s21, 1  ;;  %p190_p8 = scmp.lt.s32.totalorder %s6421_s21, 5 }
   0xc   : > { %p191_p9 = pnand %p5489_p7, %p190_p8 }
   0xe   : > { %194 = sbr.rel (%p191_p9) target bundleno = 1103 (0x44f), region = 40 }
  0x13   : > { %v5559_v0 = vld [vmem:[%s8626_s1] sm:$0xf]  ;;  %v6191_v1 = vld [vmem:[%s8626_s1] sm:$0x10]  ;;  %vm396_vm0 = vcmask 1043456   ;;  %vm397_vm1 = vcmask 1044480  }
  0x14   : > { %v5560_v2 = vor.u32 %v6191_v1, %v5559_v0  ;;  %p218_p10 = scmp.lt.s32.totalorder %s6478_s22, 3  ;;  %v6423_v3 = vmov 65535   ;;  %vm347_vm2 = vcmask 72704   ;;  %vm524_vm3 = vcmask 519168   ;;  %v539_v22 = vld [vmem:[#allocation2 + $0xc] sm:$0x1] }
  0x15   : > { %v398_v4 = vsel %vm396_vm0, 4294967295, %v6423_v3  ;;  %vm527_vm4 = vcmask 516096   ;;  %v6424_v19 = vmov 0   ;;  %vm534_vm5 = vsmask.f32 256  ;;  %v6219_v28 = vld [vmem:[%s8628_s3 + $0x58] sm:$0xff] }
  0x16   : > { %v399_v5 = vsel %vm397_vm1, %v398_v4, 0  ;;  %s219_s9 = scalar_select %p218_p10, %s6478_s22, 3  ;;  %525 = vst.msk [vmem:[#allocation2] sm:$0xf] %vm524_vm3, %v6424_v19  ;;  %vm6551_vm6 = vmand %vm527_vm4, %vm534_vm5  ;;  %v8637_v21 = vmov 0  ;;  %v8640_v26 = vmov 0 }
  0x17   : > { %v401_v6 = vand.u32 %v5560_v2, %v399_v5  ;;  %526 = vst.msk [vmem:[#allocation2 + $0x4] sm:$0xf] %vm524_vm3, %v6424_v19  ;;  %v8638_v21 = vsel %vm6551_vm6, 4294967295, %v8637_v21  ;;  %vm590_vm7 = vsmask.f32 7938  ;;  %v540_v23 = vsel %vm6551_vm6, 0, %v539_v22 }
  0x18   : > { %s6174_s10 = sshll.u32 %s219_s9, 7  ;;  %528 = vst.msk [vmem:[#allocation2 + $0x8] sm:$0x1] %vm527_vm4, %v6424_v19  ;;  %vm6561_vm8 = vmand %vm527_vm4, %vm590_vm7  ;;  %v595_v31 = vld [vmem:[#allocation2 + $0x14] sm:$0x1]  ;;  %v6215_v32 = vld [vmem:[%s8628_s3 + $0x38] sm:$0xff] }
  0x19   : > { %410 = vmatpush.bf16.msra.mxu0 %v401_v6  ;;  %s6516_s13 = scalar_lea.vmem %s8625_s0, %s6174_s10  ;;  %6277 = vmatpush.bf16.msra.mxu3 %v401_v6  ;;  %530 = vst.msk [vmem:[#allocation2 + $0xcc] sm:$0xf] %vm524_vm3, %v6424_v19  ;;  %v8641_v26 = vsel %vm6561_vm8, 4294967295, %v8640_v26  ;;  %v596_v33 = vsel %vm6561_vm8, 0, %v595_v31  ;;  %v6218_v34 = vld [vmem:[%s8628_s3 + $0x50] sm:$0xff]  ;;  %v6217_v39 = vld [vmem:[%s8628_s3 + $0x48] sm:$0xff]  ;;  %vm6645_vm0 = vmand %vm524_vm3, %vm590_vm7 }
  0x1a   : > { %v6175_v7 = vld [vmem:[%s6516_s13] sm:$0xff]  ;;  %v6184_v8 = vld [vmem:[%s6516_s13 + $0x48] sm:$0xff]  ;;  %v6185_v10 = vld [vmem:[%s6516_s13 + $0x50] sm:$0xff]  ;;  %531 = vst.msk [vmem:[#allocation2 + $0xd0] sm:$0xf] %vm524_vm3, %v6424_v19  ;;  %1692 = vmatpush.bf16.msra.mxu1 %v6215_v32  ;;  %6278 = vmatpush.bf16.msra.mxu2 %v6215_v32  ;;  %vm2066_vm9 = vcmask 1042432  }
  0x1b   : > { %v6176_v9 = vld [vmem:[%s6516_s13 + $0x8] sm:$0xff]  ;;  %v6177_v11 = vld [vmem:[%s6516_s13 + $0x10] sm:$0xff]  ;;  %v6186_v12 = vld [vmem:[%s6516_s13 + $0x58] sm:$0xff]  ;;  %8639 = vst [vmem:[#allocation6_spill] sm:$0xff] %v8638_v21  ;;  %vm2067_vm10 = vcmask 1046532   ;;  %v8645_v3 = vmov 0 }
  0x1c   : > { %5561 = vmatmul.msk.bf16.vlgmr.msra.gmra.mxu0 %vm347_vm2, %v6175_v7  ;;  %5570 = vmatmul.msk.bf16.vlgmr.msra.gmra.mxu3 %vm347_vm2, %v6184_v8  ;;  %v6178_v13 = vld [vmem:[%s6516_s13 + $0x18] sm:$0xff]  ;;  %v6187_v14 = vld [vmem:[%s6516_s13 + $0x60] sm:$0xff]  ;;  %v6188_v16 = vld [vmem:[%s6516_s13 + $0x68] sm:$0xff]  ;;  %532 = vst.msk [vmem:[#allocation2 + $0xd4] sm:$0x1] %vm527_vm4, %v6424_v19  ;;  %vm1639_vm15 = vcmask 523264  }
  0x1d   : > { %v6179_v15 = vld [vmem:[%s6516_s13 + $0x20] sm:$0xff]  ;;  %v6180_v17 = vld [vmem:[%s6516_s13 + $0x28] sm:$0xff]  ;;  %v6189_v18 = vld [vmem:[%s6516_s13 + $0x70] sm:$0xff]  ;;  %541 = vst [vmem:[#allocation2 + $0xc] sm:$0x1] %v540_v23  ;;  %2314 = vmatpush.bf16.msrb.mxu3 %v6219_v28  ;;  %s215_s12 = sand.u32 1, %s6413_s19  }
  0x1e   : > { %v6181_v20 = vld [vmem:[%s6516_s13 + $0x30] sm:$0xff]  ;;  %v6190_v24 = vld [vmem:[%s6516_s13 + $0x78] sm:$0xff]  ;;  %v536_v25 = vld [vmem:[#allocation2] sm:$0x1]  ;;  %8642 = vst [vmem:[#allocation7_spill] sm:$0xff] %v8641_v26  ;;  %s5490_s14 = sshll.u32 %s215_s12, 7 }
  0x1f   : > { %v537_v27 = vsel %vm6551_vm6, 0, %v536_v25  ;;  %v592_v29 = vld [vmem:[#allocation2 + $0x8] sm:$0x1]  ;;  %597 = vst [vmem:[#allocation2 + $0x14] sm:$0x1] %v596_v33  ;;  %v6182_v35 = vld [vmem:[%s6516_s13 + $0x38] sm:$0xff]  ;;  %vm6591_vm11 = vmor %vm2066_vm9, %vm2067_vm10 }
  0x20   : > { %538 = vst [vmem:[#allocation2] sm:$0x1] %v537_v27  ;;  %v593_v30 = vsel %vm6561_vm8, 0, %v592_v29  ;;  %v1116_v36 = vld [vmem:[#allocation2 + $0x4] sm:$0xf]  ;;  %v6214_v38 = vld [vmem:[%s8628_s3 + $0x30] sm:$0xff] }
  0x21   : > { %594 = vst [vmem:[#allocation2 + $0x8] sm:$0x1] %v593_v30  ;;  %2315 = vmatpush.bf16.msrb.mxu3 %v6218_v34  ;;  %v2071_v40 = vrot.slane %v1116_v36, 5  ;;  %v1184_v43 = vshll.u32 %v1116_v36, 16  ;;  %v6239_v44 = vld [vmem:[%s8628_s3 + $0x78] sm:$0xff]  ;;  %v1188_v47 = vshrl.u32 %v1116_v36, 16  ;;  %1693 = vmatpush.bf16.msra.mxu1 %v6214_v38 }
  0x22   : > { %v2018_v46 = vld [vmem:[#allocation2] sm:$0xe]  ;;  %6279 = vmatpush.bf16.msra.mxu2 %v6214_v38  ;;  %2628 = vmatpush.bf16.msrb.mxu0 %v6239_v44  ;;  %v6213_v55 = vld [vmem:[%s8628_s3 + $0x28] sm:$0xff]  ;;  %v6238_v57 = vld [vmem:[%s8628_s3 + $0x70] sm:$0xff]  ;;  %vm1171_vm12 = vsmask.f32 3328 }
  0x23   : > { %v5713_v48 = vrot.slane %v2018_v46, 9  ;;  %v2073_v49 = vrot.slane %v2071_v40, 4  ;;  %v1186_v54 = vrot.slane %v1184_v43, 5  ;;  %v6216_v56 = vld [vmem:[%s8628_s3 + $0x40] sm:$0xff]  ;;  %v1190_v59 = vrot.slane %v1188_v47, 4  ;;  %s8205_s15 = scalar_lea.vmem [#allocation3], %s5490_s14 }
  0x24   : > { %v542_v61 = vld [vmem:[#allocation2 + $0x18] sm:$0x1]  ;;  %vm1172_vm13 = vsmask.f32 7440  ;;  %v6212_v8 = vld [vmem:[%s8628_s3 + $0x20] sm:$0xff]  ;;  %s6276_s23 = sshll.u32 %s6478_s22, 7 }
  0x25   : > { %2316 = vmatpush.bf16.msrb.mxu3 %v6217_v39  ;;  %v2072_v58 = vsel %vm6591_vm11, %v5713_v48, %v2071_v40  ;;  %v543_v1 = vsel %vm6551_vm6, 0, %v542_v61  ;;  %1694 = vmatpush.bf16.msra.mxu1 %v6213_v55  ;;  %vm6611_vm14 = vmor %vm1171_vm12, %vm1172_vm13  ;;  %v1191_v5 = vor.u32 %v1190_v59, %v1186_v54  ;;  %v545_v25 = vld [vmem:[#allocation2 + $0x24] sm:$0x1]  ;;  %v601_v38 = vld [vmem:[#allocation2 + $0x2c] sm:$0x1]  ;;  %s5420_s30 = scalar_lea.hbm %s8630_s5, %s6276_s23  ;;  %s5421_s6 = sshll.u32 %s8205_s15, 4  ;;  %s5422_s6 = int_to_ptr.vmem [resolvable:$true] %s5421_s6 }
  0x26   : > { %v2190_v63 = vunpack.c.l.b16 %v2072_v58  ;;  %6280 = vmatpush.bf16.msra.mxu2 %v6213_v55  ;;  %544 = vst [vmem:[#allocation2 + $0x18] sm:$0x1] %v543_v1  ;;  %2629 = vmatpush.bf16.msrb.mxu0 %v6238_v57  ;;  %v8646_v3 = vsel %vm6611_vm14, 4294967295, %v8645_v3  ;;  %v546_v28 = vsel %vm6551_vm6, 0, %v545_v25  ;;  %vm678_vm1 = vsmask.f32 4368 }
  0x27   : > { %v1115_v37 = vld [vmem:[#allocation2] sm:$0xf]  ;;  %8647 = vst [vmem:[#allocation8_spill] sm:$0xff] %v8646_v3  ;;  %s5423_s7 = sshll.u32 %s5420_s30, 4  ;;  %s5409_s22 = scalar_lea.sflag [#allocation4], %s215_s12  ;;  %s5424_s7 = int_to_ptr.hbm [resolvable:$true] %s5423_s7 }
  0x28   : > { %v1175_v41 = vshrl.u32 %v1115_v37, 16  ;;  %v1178_v42 = vshll.u32 %v1115_v37, 16  ;;  %v1155_v45 = vld [vmem:[#allocation2 + $0x8] sm:$0x1]  ;;  %547 = vst [vmem:[#allocation2 + $0x24] sm:$0x1] %v546_v28 }
  0x29   : > { %v2074_v51 = vrot.slane %v1155_v45, 5  ;;  %v1194_v60 = vshll.u32 %v1155_v45, 16  ;;  %2317 = vmatpush.bf16.msrb.mxu3 %v6216_v56  ;;  %1695 = vmatpush.bf16.msra.mxu1 %v6212_v8  ;;  %s6373_s8 = sshra.s32 %s5424_s7, 4  ;;  %s6379_s11 = scalar_lea.hbm %s8630_s5, 512  ;;  %s6374_s8 = int_to_ptr.hbm [resolvable:$true] %s6373_s8 }
  0x2a   : > { %v1177_v52 = vrot.slane %v1175_v41, 4  ;;  %v1180_v53 = vrot.slane %v1178_v42, 5  ;;  %6281 = vmatpush.bf16.msra.mxu2 %v6212_v8  ;;  %v602_v41 = vsel %vm6561_vm8, 0, %v601_v38  ;;  %p6380_p0 = scmp.lt.s32.totalorder %s6374_s8, %s8630_s5 }
  0x2b   : > { %v2075_v62 = vsel %vm6591_vm11, %v2073_v49, %v2074_v51  ;;  %v1196_v6 = vrot.slane %v1194_v60, 5  ;;  %603 = vst [vmem:[#allocation2 + $0x2c] sm:$0x1] %v602_v41  ;;  %v1007_v49 = vld [vmem:[#allocation2 + $0x14] sm:$0x1] }
  0x2c   : > { %5562 = vmatmul.msk.bf16.gmra.mxu0 %vm347_vm2, %v6176_v9  ;;  %5571 = vmatmul.msk.bf16.gmra.mxu3 %vm347_vm2, %v6185_v10  ;;  %v1181_v0 = vor.u32 %v1180_v53, %v1177_v52  ;;  %v2191_v2 = vunpack.c.l.b16 %v2075_v62  ;;  %v6237_v9 = vld [vmem:[%s8628_s3 + $0x68] sm:$0xff] }
  0x2d   : > { %2630 = vmatpush.bf16.msrb.mxu0 %v6237_v9 }
  0x2e   : > { %v1182_v4 = vrot.slane %v1181_v0, 4  ;;  %v2222_v7 = vpack.c.b16 %v2191_v2, %v2190_v63  ;;  %v566_v63 = vld [vmem:[#allocation2 + $0x78] sm:$0x1] }
  0x30   : > { %v1187_v10 = vsel %vm6611_vm14, %v1182_v4, %v1186_v54  ;;  %v567_v4 = vsel %vm6551_vm6, 0, %v566_v63 }
  0x31   : > { %568 = vst [vmem:[#allocation2 + $0x78] sm:$0x1] %v567_v4 }
  0x3c   : > { %5563 = vmatmul.msk.bf16.gmra.mxu0 %vm347_vm2, %v6177_v11  ;;  %5572 = vmatmul.msk.bf16.gmra.mxu3 %vm347_vm2, %v6186_v12  ;;  %v1192_v11 = vrot.slane %v1191_v5, 4  ;;  %v1567_v12 = vunpack.c.l.b16 %v1187_v10 }
  0x4c   : > { %5564 = vmatmul.msk.bf16.gmra.mxu0 %vm347_vm2, %v6178_v13  ;;  %5573 = vmatmul.msk.bf16.gmra.mxu3 %vm347_vm2, %v6187_v14  ;;  %v1197_v13 = vsel %vm6611_vm14, %v1192_v11, %v1196_v6 }
  0x4d   : > { %v1568_v14 = vunpack.c.l.b16 %v1197_v13  ;;  %v1010_v13 = vld [vmem:[#allocation2 + $0x18] sm:$0xf] }
  0x4f   : > { %v1599_v19 = vpack.c.b16 %v1568_v14, %v1567_v12 }
  0x51   : > { %5601 = vmatmul.msk.bf16.vlgmr.msra.gmra.mxu1 %vm1639_vm15, %v1599_v19 }
  0x5c   : > { %5565 = vmatmul.msk.bf16.gmra.mxu0 %vm347_vm2, %v6179_v15  ;;  %5574 = vmatmul.msk.bf16.gmra.mxu3 %vm347_vm2, %v6188_v16  ;;  %v6236_v15 = vld [vmem:[%s8628_s3 + $0x60] sm:$0xff] }
  0x5d   : > { %v598_v16 = vld [vmem:[#allocation2 + $0x20] sm:$0x1]  ;;  %2631 = vmatpush.bf16.msrb.mxu0 %v6236_v15 }
  0x6c   : > { %5566 = vmatmul.msk.bf16.gmra.mxu0 %vm347_vm2, %v6180_v17  ;;  %5575 = vmatmul.msk.bf16.gmra.mxu3 %vm347_vm2, %v6189_v18  ;;  %v6632_v17 = vld [vmem:[%s8627_s2] ss:$0 sm:$0xff]  ;;  %v599_v18 = vsel %vm6561_vm8, 0, %v598_v16 }
  0x6d   : > { %600 = vst [vmem:[#allocation2 + $0x20] sm:$0x1] %v599_v18 }
  0x7c   : > { %5567 = vmatmul.msk.bf16.gmra.mxu0 %vm347_vm2, %v6181_v20  ;;  %5576 = vmatmul.msk.bf16.gmra.mxu3 %vm347_vm2, %v6190_v24  ;;  %v6183_v20 = vld [vmem:[%s6516_s13 + $0x40] sm:$0xff]  ;;  %s6375_s13 = scalar_lea.hbm %s6374_s8, 128 }
  0x7d   : > { %p6376_p11 = scmp.ne.s32.totalorder %s6374_s8, %s6375_s13  ;;  %p6381_p1 = scmp.lt.s32.totalorder %s6379_s11, %s6375_s13 }
  0x7f   : > { %p6377_p12 = pnand %p6376_p11, %p6495_p5  ;;  %p6382_p2 = por %p6381_p1, %p6380_p0 }
  0x81   : > { %p6378_p13 = pneg %p6377_p12 }
  0x83   : > { %p6383_p3 = pnand %p6382_p2, %p6378_p13 }
  0x8c   : > { %5568 = vmatmul.msk.bf16.gmra.mxu0 %vm347_vm2, %v6182_v35  ;;  %5753 = vmatmul.msk.bf16.vlgmr.msrb.gmra.mxu3 %vm1639_vm15, %v2222_v7  ;;  %v1003_v35 = vld [vmem:[#allocation2 + $0xc] sm:$0xf]  ;;  %v548_v7 = vld [vmem:[#allocation2 + $0x30] sm:$0x1] }
  0x8d   : > { %v549_v12 = vsel %vm6551_vm6, 0, %v548_v7 }
  0x8e   : > { %550 = vst [vmem:[#allocation2 + $0x30] sm:$0x1] %v549_v12 }
  0x99   : > { %v412_v22 = vpop.f32.mrf.mxu0 }
  0x9a   : > { %v413_v23 = vadd.f32 %v6632_v17, %v412_v22 }
  0x9c   : > { %v492_v24 = vmax.f32 %v413_v23, 0.0  ;;  %5569 = vmatmul.msk.bf16.gmra.mxu0 %vm347_vm2, %v6183_v20  ;;  %vm6655_vm2 = vmor %vm534_vm5, %vm678_vm1 }
  0x9e   : > { %v646_v27 = vpack.c.bf16 %v492_v24, %v492_v24 }
  0x9f   : > { %v457_v42 = vpop.f32.mrf.mxu3 }
  0xa0   : > { %v681_v29 = vshrl.u32 %v646_v27, 16  ;;  %v684_v32 = vshll.u32 %v646_v27, 16  ;;  %v458_v62 = vadd.f32 %v6632_v17, %v457_v42 }
  0xa1   : > { %v414_v30 = vpop.f32.mrf.mxu0 }
  0xa2   : > { %v683_v31 = vrot.slane %v681_v29, 7  ;;  %v415_v33 = vadd.f32 %v6632_v17, %v414_v30  ;;  %v510_v11 = vmax.f32 %v458_v62, 0.0 }
  0xa4   : > { %v686_v36 = vor.u32 %v684_v32, %v683_v31  ;;  %v493_v37 = vmax.f32 %v415_v33, 0.0  ;;  %v687_v51 = vrot.slane %v683_v31, 4  ;;  %v664_v18 = vpack.c.bf16 %v510_v11, %v510_v11 }
  0xa6   : > { %v1004_v39 = vsel %vm6645_vm0, %v686_v36, %v1003_v35  ;;  %v647_v40 = vpack.c.bf16 %v493_v37, %v493_v37  ;;  %v834_v29 = vshrl.u32 %v664_v18, 16  ;;  %v837_v30 = vshll.u32 %v664_v18, 16 }
  0xa7   : > { %1005 = vst [vmem:[#allocation2 + $0xc] sm:$0xf] %v1004_v39  ;;  %v459_v8 = vpop.f32.mrf.mxu3 }
  0xa8   : > { %v689_v43 = vshrl.u32 %v647_v40, 16  ;;  %v692_v46 = vshll.u32 %v647_v40, 16  ;;  %v6676_v37 = vrot.slane %v834_v29, 7  ;;  %v460_v38 = vadd.f32 %v6632_v17, %v459_v8  ;;  %v604_v8 = vld [vmem:[#allocation2 + $0x38] sm:$0x1] }
  0xa9   : > { %v417_v44 = vpop.f32.mrf.mxu0  ;;  %v569_v29 = vld [vmem:[#allocation2 + $0x84] sm:$0x1] }
  0xaa   : > { %v691_v45 = vrot.slane %v689_v43, 7  ;;  %v418_v47 = vadd.f32 %v6632_v17, %v417_v44 }
  0xac   : > { %v694_v52 = vor.u32 %v692_v46, %v691_v45  ;;  %v696_v53 = vrot.slane %v691_v45, 4  ;;  %v494_v54 = vmax.f32 %v418_v47, 0.0  ;;  %v839_v47 = vor.u32 %v837_v30, %v6676_v37 }
  0xae   : > { %v695_v55 = vsel %vm6655_vm2, %v687_v51, %v694_v52  ;;  %v1008_v56 = vsel %vm6551_vm6, %v696_v53, %v1007_v49  ;;  %v648_v57 = vpack.c.bf16 %v494_v54, %v494_v54  ;;  %v1117_v58 = vld [vmem:[#allocation2 + $0xc] sm:$0xf]  ;;  %v1066_v49 = vld [vmem:[#allocation2 + $0x78] sm:$0xf]  ;;  %v1014_v51 = vld [vmem:[#allocation2 + $0x20] sm:$0x1] }
  0xaf   : > { %1006 = vst.msk [vmem:[#allocation2 + $0x10] sm:$0xf] %vm524_vm3, %v695_v55  ;;  %v1199_v59 = vshrl.u32 %v1117_v58, 16  ;;  %v2019_v61 = vld [vmem:[#allocation2 + $0xc] sm:$0xe]  ;;  %v1202_v6 = vshll.u32 %v1117_v58, 16 }
  0xb0   : > { %1009 = vst [vmem:[#allocation2 + $0x14] sm:$0x1] %v1008_v56  ;;  %v698_v60 = vshrl.u32 %v648_v57, 16  ;;  %v6665_v0 = vld [vmem:[#allocation2 + $0xc] sm:$0xf]  ;;  %v701_v1 = vshll.u32 %v648_v57, 16  ;;  %v462_v56 = vpop.f32.mrf.mxu3 }
  0xb1   : > { %v419_v2 = vpop.f32.mrf.mxu0  ;;  %v1201_v5 = vrot.slane %v1199_v59, 4  ;;  %v1204_v14 = vrot.slane %v1202_v6, 5  ;;  %v5714_v20 = vrot.slane %v2019_v61, 9  ;;  %v2794_v23 = vshrl.u32 %v6665_v0, 16 }
  0xb2   : > { %v700_v9 = vrot.slane %v698_v60, 7  ;;  %v420_v10 = vadd.f32 %v6632_v17, %v419_v2  ;;  %v1067_v61 = vsel %vm6645_vm0, %v839_v47, %v1066_v49  ;;  %v622_v2 = vld [vmem:[#allocation2 + $0x80] sm:$0x1] }
  0xb3   : > { %v1205_v22 = vor.u32 %v1204_v14, %v1201_v5  ;;  %1068 = vst [vmem:[#allocation2 + $0x78] sm:$0xf] %v1067_v61 }
  0xb4   : > { %v703_v15 = vor.u32 %v701_v1, %v700_v9  ;;  %v495_v16 = vmax.f32 %v420_v10, 0.0  ;;  %v704_v19 = vrot.slane %v700_v9, 4  ;;  %v840_v10 = vrot.slane %v6676_v37, 4 }
  0xb5   : > { %v1206_v33 = vrot.slane %v1205_v22, 4 }
  0xb6   : > { %v1011_v24 = vsel %vm6645_vm0, %v703_v15, %v1010_v13  ;;  %v649_v25 = vpack.c.bf16 %v495_v16, %v495_v16  ;;  %v6220_v27 = vld [vmem:[#allocation2 + $0xc] sm:$0xff]  ;;  %v511_v13 = vmax.f32 %v460_v38, 0.0 }
  0xb7   : > { %v1118_v28 = vld [vmem:[#allocation2 + $0x10] sm:$0xf]  ;;  %1012 = vst [vmem:[#allocation2 + $0x18] sm:$0xf] %v1011_v24  ;;  %v1156_v31 = vld [vmem:[#allocation2 + $0x14] sm:$0x1]  ;;  %5857 = vmatmul.msk.bf16.vlgmr.msrb.gmra.mxu0 %vm1639_vm15, %v6220_v27 }
  0xb8   : > { %v2078_v32 = vrot.slane %v1118_v28, 5  ;;  %v706_v35 = vshrl.u32 %v649_v25, 16  ;;  %v2081_v36 = vrot.slane %v1156_v31, 5  ;;  %v1208_v42 = vshll.u32 %v1118_v28, 16  ;;  %v464_v49 = vpop.f32.mrf.mxu3 }
  0xb9   : > { %v422_v39 = vpop.f32.mrf.mxu0  ;;  %v1212_v43 = vshrl.u32 %v1118_v28, 16  ;;  %v709_v45 = vshll.u32 %v649_v25, 16  ;;  %v1218_v1 = vshll.u32 %v1156_v31, 16  ;;  %v665_v25 = vpack.c.bf16 %v511_v13, %v511_v13 }
  0xba   : > { %v2079_v40 = vsel %vm6591_vm11, %v5714_v20, %v2078_v32  ;;  %v2080_v41 = vrot.slane %v2078_v32, 4  ;;  %v708_v44 = vrot.slane %v706_v35, 7  ;;  %v423_v46 = vadd.f32 %v6632_v17, %v422_v39  ;;  %v1017_v20 = vld [vmem:[#allocation2 + $0x24] sm:$0xf]  ;;  %v551_v35 = vld [vmem:[#allocation2 + $0x3c] sm:$0x1] }
  0xbb   : > { %v2192_v53 = vunpack.c.l.b16 %v2079_v40  ;;  %v1210_v54 = vrot.slane %v1208_v42, 5  ;;  %v1214_v55 = vrot.slane %v1212_v43, 4  ;;  %v1220_v12 = vrot.slane %v1218_v1, 5 }
  0xbc   : > { %v2082_v52 = vsel %vm6591_vm11, %v2080_v41, %v2081_v36  ;;  %v711_v57 = vor.u32 %v709_v45, %v708_v44  ;;  %v713_v58 = vrot.slane %v708_v44, 4  ;;  %v496_v59 = vmax.f32 %v423_v46, 0.0 }
  0xbd   : > { %v2193_v60 = vunpack.c.l.b16 %v2082_v52  ;;  %v1211_v62 = vsel %vm6611_vm14, %v1206_v33, %v1210_v54  ;;  %v1215_v63 = vor.u32 %v1214_v55, %v1210_v54  ;;  %v605_v27 = vsel %vm6561_vm8, 0, %v604_v8 }
  0xbe   : > { %v712_v4 = vsel %vm6655_vm2, %v704_v19, %v711_v57  ;;  %v1015_v5 = vsel %vm6551_vm6, %v713_v58, %v1014_v51  ;;  %v650_v6 = vpack.c.bf16 %v496_v59, %v496_v59  ;;  %v6693_v9 = vld [vmem:[#allocation2 + $0x18] sm:$0xf]  ;;  %v1569_v18 = vunpack.c.l.b16 %v1211_v62  ;;  %606 = vst [vmem:[#allocation2 + $0x38] sm:$0x1] %v605_v27 }
  0xbf   : > { %v2223_v7 = vpack.c.b16 %v2193_v60, %v2192_v53  ;;  %1013 = vst.msk [vmem:[#allocation2 + $0x1c] sm:$0xf] %vm524_vm3, %v712_v4  ;;  %v1216_v11 = vrot.slane %v1215_v63, 4  ;;  %v2020_v14 = vld [vmem:[#allocation2 + $0x18] sm:$0xe]  ;;  %v623_v19 = vsel %vm6561_vm8, 0, %v622_v2  ;;  %v463_v28 = vadd.f32 %v6632_v17, %v462_v56 }
  0xc0   : > { %1016 = vst [vmem:[#allocation2 + $0x20] sm:$0x1] %v1015_v5  ;;  %v715_v15 = vshrl.u32 %v650_v6, 16  ;;  %v718_v16 = vshll.u32 %v650_v6, 16  ;;  %v570_v33 = vsel %vm6551_vm6, 0, %v569_v29  ;;  %v842_v36 = vshrl.u32 %v665_v25, 16 }
  0xc1   : > { %5754 = vmatmul.msk.bf16.gmra.mxu3 %vm1639_vm15, %v2223_v7  ;;  %v424_v22 = vpop.f32.mrf.mxu0  ;;  %v1221_v24 = vsel %vm6611_vm14, %v1216_v11, %v1220_v12  ;;  %624 = vst [vmem:[#allocation2 + $0x80] sm:$0x1] %v623_v19  ;;  %v845_v37 = vshll.u32 %v665_v25, 16  ;;  %v512_v38 = vmax.f32 %v463_v28, 0.0  ;;  %v1223_v39 = vshrl.u32 %v6693_v9, 16 }
  0xc2   : > { %v6705_v30 = vrot.slane %v715_v15, 7  ;;  %v425_v31 = vadd.f32 %v6632_v17, %v424_v22  ;;  %v1570_v32 = vunpack.c.l.b16 %v1221_v24  ;;  %571 = vst [vmem:[#allocation2 + $0x84] sm:$0x1] %v570_v33  ;;  %v5715_v43 = vrot.slane %v2020_v14, 9  ;;  %v1021_v11 = vld [vmem:[#allocation2 + $0x2c] sm:$0x1] }
  0xc3   : > { %v844_v45 = vrot.slane %v842_v36, 7  ;;  %v666_v46 = vpack.c.bf16 %v512_v38, %v512_v38  ;;  %v1225_v47 = vrot.slane %v1223_v39, 4  ;;  %v1226_v55 = vshll.u32 %v6693_v9, 16  ;;  %v607_v38 = vld [vmem:[#allocation2 + $0x44] sm:$0x1] }
  0xc4   : > { %v720_v40 = vor.u32 %v718_v16, %v6705_v30  ;;  %v497_v41 = vmax.f32 %v425_v31, 0.0  ;;  %v1600_v42 = vpack.c.b16 %v1570_v32, %v1569_v18  ;;  %v721_v44 = vrot.slane %v6705_v30, 4  ;;  %v467_v31 = vpop.f32.mrf.mxu3 }
  0xc5   : > { %v552_v56 = vsel %vm6551_vm6, 0, %v551_v35  ;;  %v847_v57 = vor.u32 %v845_v37, %v844_v45  ;;  %v849_v58 = vrot.slane %v844_v45, 4  ;;  %v851_v2 = vshrl.u32 %v666_v46, 16  ;;  %v625_v37 = vld [vmem:[#allocation2 + $0x8c] sm:$0x1] }
  0xc6   : > { %v1018_v51 = vsel %vm6645_vm0, %v720_v40, %v1017_v20  ;;  %v651_v52 = vpack.c.bf16 %v497_v41, %v497_v41  ;;  %5602 = vmatmul.msk.bf16.gmra.mxu1 %vm1639_vm15, %v1600_v42  ;;  %v6221_v53 = vld [vmem:[#allocation2 + $0x18] sm:$0xff]  ;;  %553 = vst [vmem:[#allocation2 + $0x3c] sm:$0x1] %v552_v56  ;;  %v854_v15 = vshll.u32 %v666_v46, 16  ;;  %v1228_v16 = vrot.slane %v1226_v55, 5 }
  0xc7   : > { %v6716_v54 = vld [vmem:[#allocation2 + $0x1c] sm:$0xf]  ;;  %1019 = vst [vmem:[#allocation2 + $0x24] sm:$0xf] %v1018_v51  ;;  %v1157_v59 = vld [vmem:[#allocation2 + $0x20] sm:$0x1]  ;;  %5858 = vmatmul.msk.bf16.gmra.mxu0 %vm1639_vm15, %v6221_v53  ;;  %v848_v5 = vsel %vm6655_vm2, %v840_v10, %v847_v57  ;;  %v465_v30 = vadd.f32 %v6632_v17, %v464_v49  ;;  %v468_v46 = vadd.f32 %v6632_v17, %v467_v31 }
  0xc8   : > { %v2085_v60 = vrot.slane %v6716_v54, 5  ;;  %v723_v61 = vshrl.u32 %v651_v52, 16  ;;  %v726_v62 = vshll.u32 %v651_v52, 16  ;;  %v1070_v63 = vld [vmem:[#allocation2 + $0x80] sm:$0x1]  ;;  %v2088_v1 = vrot.slane %v1157_v59, 5 }
  0xc9   : > { %v427_v4 = vpop.f32.mrf.mxu0  ;;  %v1071_v6 = vsel %vm6551_vm6, %v849_v58, %v1070_v63  ;;  %1069 = vst.msk [vmem:[#allocation2 + $0x7c] sm:$0xf] %vm524_vm3, %v848_v5  ;;  %v6731_v14 = vrot.slane %v851_v2, 7  ;;  %v1232_v18 = vshll.u32 %v6716_v54, 16  ;;  %v1073_v25 = vld [vmem:[#allocation2 + $0x84] sm:$0xf]  ;;  %v1229_v28 = vor.u32 %v1228_v16, %v1225_v47 }
  0xca   : > { %v2086_v7 = vsel %vm6591_vm11, %v5715_v43, %v2085_v60  ;;  %v2087_v8 = vrot.slane %v2085_v60, 4  ;;  %v725_v9 = vrot.slane %v723_v61, 7  ;;  %v428_v12 = vadd.f32 %v6632_v17, %v427_v4  ;;  %1072 = vst [vmem:[#allocation2 + $0x80] sm:$0x1] %v1071_v6  ;;  %v1024_v49 = vld [vmem:[#allocation2 + $0x30] sm:$0xf] }
  0xcb   : > { %v2194_v13 = vunpack.c.l.b16 %v2086_v7  ;;  %v856_v27 = vor.u32 %v854_v15, %v6731_v14  ;;  %v1234_v29 = vrot.slane %v1232_v18, 5  ;;  %v1230_v40 = vrot.slane %v1229_v28, 4 }
  0xcc   : > { %v2089_v10 = vsel %vm6591_vm11, %v2087_v8, %v2088_v1  ;;  %v728_v19 = vor.u32 %v726_v62, %v725_v9  ;;  %v730_v20 = vrot.slane %v725_v9, 4  ;;  %v498_v22 = vmax.f32 %v428_v12, 0.0 }
  0xcd   : > { %v2195_v24 = vunpack.c.l.b16 %v2089_v10  ;;  %v1074_v39 = vsel %vm6645_vm0, %v856_v27, %v1073_v25  ;;  %v1236_v41 = vshrl.u32 %v6716_v54, 16  ;;  %v1242_v42 = vshll.u32 %v1157_v59, 16  ;;  %v572_v59 = vld [vmem:[#allocation2 + $0x90] sm:$0x1]  ;;  %v469_v25 = vpop.f32.mrf.mxu3 }
  0xce   : > { %v729_v32 = vsel %vm6655_vm2, %v721_v44, %v728_v19  ;;  %v1022_v33 = vsel %vm6551_vm6, %v730_v20, %v1021_v11  ;;  %v652_v35 = vpack.c.bf16 %v498_v22, %v498_v22  ;;  %v857_v44 = vrot.slane %v6731_v14, 4  ;;  %v2021_v45 = vld [vmem:[#allocation2 + $0x24] sm:$0xe]  ;;  %1075 = vst [vmem:[#allocation2 + $0x84] sm:$0xf] %v1074_v39 }
  0xcf   : > { %v2224_v36 = vpack.c.b16 %v2195_v24, %v2194_v13  ;;  %1020 = vst.msk [vmem:[#allocation2 + $0x28] sm:$0xf] %vm524_vm3, %v729_v32  ;;  %v1235_v52 = vsel %vm6611_vm14, %v1230_v40, %v1234_v29  ;;  %v1238_v53 = vrot.slane %v1236_v41, 4  ;;  %v513_v55 = vmax.f32 %v465_v30, 0.0  ;;  %v6758_v1 = vld [vmem:[#allocation2 + $0x24] sm:$0xf] }
  0xd0   : > { %1023 = vst [vmem:[#allocation2 + $0x2c] sm:$0x1] %v1022_v33  ;;  %v732_v43 = vshrl.u32 %v652_v35, 16  ;;  %v735_v47 = vshll.u32 %v652_v35, 16  ;;  %v1244_v57 = vrot.slane %v1242_v42, 5  ;;  %v626_v58 = vsel %vm6561_vm8, 0, %v625_v37 }
  0xd1   : > { %5755 = vmatmul.msk.bf16.gmra.mxu3 %vm1639_vm15, %v2224_v36  ;;  %v429_v51 = vpop.f32.mrf.mxu0  ;;  %v1239_v60 = vor.u32 %v1238_v53, %v1234_v29  ;;  %627 = vst [vmem:[#allocation2 + $0x8c] sm:$0x1] %v626_v58  ;;  %v667_v61 = vpack.c.bf16 %v513_v55, %v513_v55  ;;  %v5716_v62 = vrot.slane %v2021_v45, 9  ;;  %v608_v63 = vsel %vm6561_vm8, 0, %v607_v38  ;;  %v1028_v42 = vld [vmem:[#allocation2 + $0x38] sm:$0x1] }
  0xd2   : > { %v6751_v54 = vrot.slane %v732_v43, 7  ;;  %v430_v56 = vadd.f32 %v6632_v17, %v429_v51  ;;  %609 = vst [vmem:[#allocation2 + $0x44] sm:$0x1] %v608_v63  ;;  %v514_v6 = vmax.f32 %v468_v46, 0.0  ;;  %v573_v11 = vsel %vm6551_vm6, 0, %v572_v59 }
  0xd3   : > { %v1240_v7 = vrot.slane %v1239_v60, 4  ;;  %v859_v8 = vshrl.u32 %v667_v61, 16  ;;  %v862_v9 = vshll.u32 %v667_v61, 16  ;;  %v1571_v14 = vunpack.c.l.b16 %v1235_v52  ;;  %574 = vst [vmem:[#allocation2 + $0x90] sm:$0x1] %v573_v11 }
  0xd4   : > { %v737_v2 = vor.u32 %v735_v47, %v6751_v54  ;;  %v738_v4 = vrot.slane %v6751_v54, 4  ;;  %v499_v5 = vmax.f32 %v430_v56, 0.0  ;;  %v1247_v16 = vshrl.u32 %v6758_v1, 16  ;;  %v628_v63 = vld [vmem:[#allocation2 + $0x98] sm:$0x1] }
  0xd5   : > { %v1245_v18 = vsel %vm6611_vm14, %v1240_v7, %v1244_v57  ;;  %v861_v19 = vrot.slane %v859_v8, 7  ;;  %v668_v24 = vpack.c.bf16 %v514_v6, %v514_v6  ;;  %v6792_v56 = vrot.slane %v2794_v23, 4  ;;  %v610_v11 = vld [vmem:[#allocation2 + $0x50] sm:$0x1] }
  0xd6   : > { %v1025_v12 = vsel %vm6645_vm0, %v737_v2, %v1024_v49  ;;  %v653_v13 = vpack.c.bf16 %v499_v5, %v499_v5  ;;  %v6222_v10 = vld [vmem:[#allocation2 + $0x24] sm:$0xff]  ;;  %v1572_v29 = vunpack.c.l.b16 %v1245_v18  ;;  %v1249_v6 = vrot.slane %v1247_v16, 4 }
  0xd7   : > { %v6766_v15 = vld [vmem:[#allocation2 + $0x28] sm:$0xf]  ;;  %1026 = vst [vmem:[#allocation2 + $0x30] sm:$0xf] %v1025_v12  ;;  %v6771_v20 = vld [vmem:[#allocation2 + $0x2c] sm:$0x1]  ;;  %5859 = vmatmul.msk.bf16.gmra.mxu0 %vm1639_vm15, %v6222_v10  ;;  %v864_v32 = vor.u32 %v862_v9, %v861_v19  ;;  %v472_v12 = vpop.f32.mrf.mxu3 }
  0xd8   : > { %v2092_v22 = vrot.slane %v6766_v15, 5  ;;  %v740_v27 = vshrl.u32 %v653_v13, 16  ;;  %v743_v28 = vshll.u32 %v653_v13, 16  ;;  %v2095_v30 = vrot.slane %v6771_v20, 5  ;;  %v1077_v40 = vld [vmem:[#allocation2 + $0x8c] sm:$0x1] }
  0xd9   : > { %v432_v31 = vpop.f32.mrf.mxu0  ;;  %v866_v33 = vrot.slane %v861_v19, 4  ;;  %v1601_v38 = vpack.c.b16 %v1572_v29, %v1571_v14  ;;  %v865_v43 = vsel %vm6655_vm2, %v857_v44, %v864_v32  ;;  %v868_v47 = vshrl.u32 %v668_v24, 16  ;;  %v1031_v13 = vld [vmem:[#allocation2 + $0x3c] sm:$0xf]  ;;  %v6331_v3 = vld [vmem:[#allocation2 + $0x2c] sm:$0x1] }
  0xda   : > { %v2093_v35 = vsel %vm6591_vm11, %v5716_v62, %v2092_v22  ;;  %v2094_v36 = vrot.slane %v2092_v22, 4  ;;  %v742_v37 = vrot.slane %v740_v27, 7  ;;  %v433_v39 = vadd.f32 %v6632_v17, %v432_v31  ;;  %1076 = vst.msk [vmem:[#allocation2 + $0x88] sm:$0xf] %vm524_vm3, %v865_v43  ;;  %v1080_v61 = vld [vmem:[#allocation2 + $0x90] sm:$0xf] }
  0xdb   : > { %v2196_v41 = vunpack.c.l.b16 %v2093_v35  ;;  %v1078_v45 = vsel %vm6551_vm6, %v866_v33, %v1077_v40  ;;  %5603 = vmatmul.msk.bf16.gmra.mxu1 %vm1639_vm15, %v1601_v38  ;;  %v6787_v55 = vrot.slane %v868_v47, 7  ;;  %v871_v54 = vshll.u32 %v668_v24, 16  ;;  %v554_v62 = vld [vmem:[#allocation2 + $0x48] sm:$0x1] }
  0xdc   : > { %v2096_v46 = vsel %vm6591_vm11, %v2094_v36, %v2095_v30  ;;  %v745_v49 = vor.u32 %v743_v28, %v742_v37  ;;  %v747_v51 = vrot.slane %v742_v37, 4  ;;  %v500_v52 = vmax.f32 %v433_v39, 0.0  ;;  %1079 = vst [vmem:[#allocation2 + $0x8c] sm:$0x1] %v1078_v45  ;;  %v575_v39 = vld [vmem:[#allocation2 + $0x9c] sm:$0x1] }
  0xdd   : > { %v2197_v53 = vunpack.c.l.b16 %v2096_v46  ;;  %v470_v44 = vadd.f32 %v6632_v17, %v469_v25  ;;  %v873_v2 = vor.u32 %v871_v54, %v6787_v55  ;;  %v874_v5 = vrot.slane %v6787_v55, 4 }
  0xde   : > { %v746_v57 = vsel %vm6655_vm2, %v738_v4, %v745_v49  ;;  %v1029_v58 = vsel %vm6551_vm6, %v747_v51, %v1028_v42  ;;  %v654_v59 = vpack.c.bf16 %v500_v52, %v500_v52  ;;  %v1250_v23 = vshll.u32 %v6758_v1, 16  ;;  %v2022_v19 = vld [vmem:[#allocation2 + $0x30] sm:$0xe] }
  0xdf   : > { %v2225_v60 = vpack.c.b16 %v2197_v53, %v2196_v41  ;;  %1027 = vst.msk [vmem:[#allocation2 + $0x34] sm:$0xf] %vm524_vm3, %v746_v57  ;;  %v1256_v8 = vshll.u32 %v6766_v15, 16  ;;  %v1260_v9 = vshrl.u32 %v6766_v15, 16  ;;  %v1081_v10 = vsel %vm6645_vm0, %v873_v2, %v1080_v61 }
  0xe0   : > { %1030 = vst [vmem:[#allocation2 + $0x38] sm:$0x1] %v1029_v58  ;;  %v749_v7 = vshrl.u32 %v654_v59, 16  ;;  %v752_v4 = vshll.u32 %v654_v59, 16  ;;  %v1252_v18 = vrot.slane %v1250_v23, 5  ;;  %v1266_v16 = vshll.u32 %v6771_v20, 16  ;;  %v6831_v58 = vpop.f32.mrf.mxu3 }
  0xe1   : > { %5756 = vmatmul.msk.bf16.gmra.mxu3 %vm1639_vm15, %v2225_v60  ;;  %v434_v14 = vpop.f32.mrf.mxu0  ;;  %v555_v1 = vsel %vm6551_vm6, 0, %v554_v62  ;;  %1082 = vst [vmem:[#allocation2 + $0x90] sm:$0xf] %v1081_v10  ;;  %v1258_v15 = vrot.slane %v1256_v8, 5  ;;  %v1262_v25 = vrot.slane %v1260_v9, 4  ;;  %v515_v29 = vmax.f32 %v470_v44, 0.0 }
  0xe2   : > { %v6810_v22 = vrot.slane %v749_v7, 7  ;;  %v435_v24 = vadd.f32 %v6632_v17, %v434_v14  ;;  %v1253_v27 = vor.u32 %v1252_v18, %v1249_v6  ;;  %v1268_v28 = vrot.slane %v1266_v16, 5  ;;  %556 = vst [vmem:[#allocation2 + $0x48] sm:$0x1] %v555_v1  ;;  %v1035_v6 = vld [vmem:[#allocation2 + $0x44] sm:$0x1] }
  0xe3   : > { %v629_v30 = vsel %vm6561_vm8, 0, %v628_v63  ;;  %v1263_v33 = vor.u32 %v1262_v25, %v1258_v15  ;;  %v669_v36 = vpack.c.bf16 %v515_v29, %v515_v29  ;;  %v5717_v37 = vrot.slane %v2022_v19, 9  ;;  %v1123_v1 = vld [vmem:[#allocation2 + $0x30] sm:$0xf] }
  0xe4   : > { %v754_v20 = vor.u32 %v752_v4, %v6810_v22  ;;  %v755_v31 = vrot.slane %v6810_v22, 4  ;;  %v501_v32 = vmax.f32 %v435_v24, 0.0  ;;  %630 = vst [vmem:[#allocation2 + $0x98] sm:$0x1] %v629_v30  ;;  %v1254_v35 = vrot.slane %v1253_v27, 4 }
  0xe5   : > { %v611_v38 = vsel %vm6561_vm8, 0, %v610_v11  ;;  %v1264_v42 = vrot.slane %v1263_v33, 4  ;;  %v473_v46 = vadd.f32 %v6632_v17, %v472_v12  ;;  %v876_v49 = vshrl.u32 %v669_v36, 16 }
  0xe6   : > { %v1032_v40 = vsel %vm6645_vm0, %v754_v20, %v1031_v13  ;;  %v655_v41 = vpack.c.bf16 %v501_v32, %v501_v32  ;;  %v6223_v43 = vld [vmem:[#allocation2 + $0x30] sm:$0xff]  ;;  %612 = vst [vmem:[#allocation2 + $0x50] sm:$0x1] %v611_v38  ;;  %v1259_v47 = vsel %vm6611_vm14, %v1254_v35, %v1258_v15  ;;  %v879_v51 = vshll.u32 %v669_v36, 16 }
  0xe7   : > { %v6821_v45 = vld [vmem:[#allocation2 + $0x34] sm:$0xf]  ;;  %1033 = vst [vmem:[#allocation2 + $0x3c] sm:$0xf] %v1032_v40  ;;  %v6826_v52 = vld [vmem:[#allocation2 + $0x38] sm:$0x1]  ;;  %v1269_v44 = vsel %vm6611_vm14, %v1264_v42, %v1268_v28  ;;  %v1573_v57 = vunpack.c.l.b16 %v1259_v47  ;;  %5860 = vmatmul.msk.bf16.gmra.mxu0 %vm1639_vm15, %v6223_v43 }
  0xe8   : > { %v757_v53 = vshrl.u32 %v655_v41, 16  ;;  %v760_v54 = vshll.u32 %v655_v41, 16  ;;  %v1574_v59 = vunpack.c.l.b16 %v1269_v44  ;;  %v878_v61 = vrot.slane %v876_v49, 7  ;;  %v557_v36 = vld [vmem:[#allocation2 + $0x54] sm:$0x1] }
  0xe9   : > { %v437_v60 = vpop.f32.mrf.mxu0  ;;  %v2099_v62 = vrot.slane %v6821_v45, 5  ;;  %v2102_v63 = vrot.slane %v6826_v52, 5  ;;  %v516_v7 = vmax.f32 %v473_v46, 0.0  ;;  %v576_v4 = vsel %vm6551_vm6, 0, %v575_v39 }
  0xea   : > { %v759_v2 = vrot.slane %v757_v53, 7  ;;  %v438_v23 = vadd.f32 %v6632_v17, %v437_v60  ;;  %v1602_v8 = vpack.c.b16 %v1574_v59, %v1573_v57  ;;  %v881_v9 = vor.u32 %v879_v51, %v878_v61  ;;  %577 = vst [vmem:[#allocation2 + $0x9c] sm:$0x1] %v576_v4  ;;  %v1038_v53 = vld [vmem:[#allocation2 + $0x48] sm:$0xf] }
  0xeb   : > { %v883_v11 = vrot.slane %v878_v61, 4  ;;  %v1084_v12 = vld [vmem:[#allocation2 + $0x98] sm:$0x1]  ;;  %v2100_v13 = vsel %vm6591_vm11, %v5717_v37, %v2099_v62  ;;  %v2101_v16 = vrot.slane %v2099_v62, 4  ;;  %v670_v15 = vpack.c.bf16 %v516_v7, %v516_v7  ;;  %v477_v37 = vpop.f32.mrf.mxu3 }
  0xec   : > { %v762_v14 = vor.u32 %v760_v54, %v759_v2  ;;  %v764_v10 = vrot.slane %v759_v2, 4  ;;  %v502_v18 = vmax.f32 %v438_v23, 0.0  ;;  %5604 = vmatmul.msk.bf16.gmra.mxu1 %vm1639_vm15, %v1602_v8  ;;  %v882_v19 = vsel %vm6655_vm2, %v874_v5, %v881_v9 }
  0xed   : > { %v1085_v22 = vsel %vm6551_vm6, %v883_v11, %v1084_v12  ;;  %v2198_v24 = vunpack.c.l.b16 %v2100_v13  ;;  %1083 = vst.msk [vmem:[#allocation2 + $0x94] sm:$0xf] %vm524_vm3, %v882_v19  ;;  %v2103_v55 = vsel %vm6591_vm11, %v2101_v16, %v2102_v63  ;;  %v885_v29 = vshrl.u32 %v670_v15, 16  ;;  %v631_v63 = vld [vmem:[#allocation2 + $0xa4] sm:$0x1] }
  0xee   : > { %v763_v25 = vsel %vm6655_vm2, %v755_v31, %v762_v14  ;;  %v1036_v27 = vsel %vm6551_vm6, %v764_v10, %v1035_v6  ;;  %v656_v28 = vpack.c.bf16 %v502_v18, %v502_v18  ;;  %v2199_v5 = vunpack.c.l.b16 %v2103_v55  ;;  %1086 = vst [vmem:[#allocation2 + $0x98] sm:$0x1] %v1085_v22  ;;  %v2023_v4 = vld [vmem:[#allocation2 + $0x3c] sm:$0xe]  ;;  %v613_v14 = vld [vmem:[#allocation2 + $0x5c] sm:$0x1] }
  0xef   : > { %1034 = vst.msk [vmem:[#allocation2 + $0x40] sm:$0xf] %vm524_vm3, %v763_v25  ;;  %v888_v30 = vshll.u32 %v670_v15, 16  ;;  %v1271_v20 = vshrl.u32 %v1123_v1, 16  ;;  %v1274_v35 = vshll.u32 %v1123_v1, 16  ;;  %v1280_v31 = vshll.u32 %v6821_v45, 16 }
  0xf0   : > { %1037 = vst [vmem:[#allocation2 + $0x44] sm:$0x1] %v1036_v27  ;;  %v766_v32 = vshrl.u32 %v656_v28, 16  ;;  %v769_v33 = vshll.u32 %v656_v28, 16  ;;  %v2226_v38 = vpack.c.b16 %v2199_v5, %v2198_v24  ;;  %v6856_v40 = vrot.slane %v885_v29, 7 }
  0xf1   : > { %v439_v39 = vpop.f32.mrf.mxu0  ;;  %v1273_v41 = vrot.slane %v1271_v20, 4  ;;  %v1284_v42 = vshrl.u32 %v6821_v45, 16  ;;  %v1087_v47 = vld [vmem:[#allocation2 + $0x9c] sm:$0xf]  ;;  %v1276_v49 = vrot.slane %v1274_v35, 5  ;;  %v1282_v51 = vrot.slane %v1280_v31, 5 }
  0xf2   : > { %v6859_v43 = vrot.slane %v766_v32, 7  ;;  %v440_v46 = vadd.f32 %v6632_v17, %v439_v39  ;;  %5757 = vmatmul.msk.bf16.gmra.mxu3 %vm1639_vm15, %v2226_v38  ;;  %v890_v54 = vor.u32 %v888_v30, %v6856_v40  ;;  %v1290_v57 = vshll.u32 %v6826_v52, 16 }
  0xf3   : > { %v1286_v44 = vrot.slane %v1284_v42, 4  ;;  %v2797_v59 = vshll.u32 %v6665_v0, 16  ;;  %v1277_v62 = vor.u32 %v1276_v49, %v1273_v41  ;;  %v558_v7 = vsel %vm6551_vm6, 0, %v557_v36  ;;  %v479_v5 = vpop.f32.mrf.mxu3 }
  0xf4   : > { %v771_v60 = vor.u32 %v769_v33, %v6859_v43  ;;  %v772_v45 = vrot.slane %v6859_v43, 4  ;;  %v503_v61 = vmax.f32 %v440_v46, 0.0  ;;  %v1088_v2 = vsel %vm6645_vm0, %v890_v54, %v1087_v47  ;;  %559 = vst [vmem:[#allocation2 + $0x54] sm:$0x1] %v558_v7  ;;  %v1042_v33 = vld [vmem:[#allocation2 + $0x50] sm:$0x1] }
  0xf5   : > { %v1287_v6 = vor.u32 %v1286_v44, %v1282_v51  ;;  %v1292_v23 = vrot.slane %v1290_v57, 5  ;;  %1089 = vst [vmem:[#allocation2 + $0x9c] sm:$0xf] %v1088_v2  ;;  %v1278_v9 = vrot.slane %v1277_v62, 4  ;;  %v475_v12 = vadd.f32 %v6632_v17, %v6831_v58  ;;  %v578_v57 = vld [vmem:[#allocation2 + $0xa8] sm:$0x1] }
  0xf6   : > { %v1039_v52 = vsel %vm6645_vm0, %v771_v60, %v1038_v53  ;;  %v657_v8 = vpack.c.bf16 %v503_v61, %v503_v61  ;;  %v6224_v11 = vld [vmem:[#allocation2 + $0x3c] sm:$0xff]  ;;  %v632_v18 = vsel %vm6561_vm8, 0, %v631_v63  ;;  %v478_v1 = vadd.f32 %v6632_v17, %v477_v37 }
  0xf7   : > { %v6876_v13 = vld [vmem:[#allocation2 + $0x40] sm:$0xf]  ;;  %1040 = vst [vmem:[#allocation2 + $0x48] sm:$0xf] %v1039_v52  ;;  %v1288_v10 = vrot.slane %v1287_v6, 4  ;;  %v1283_v24 = vsel %vm6611_vm14, %v1278_v9, %v1282_v51  ;;  %5861 = vmatmul.msk.bf16.gmra.mxu0 %vm1639_vm15, %v6224_v11  ;;  %v517_v58 = vmax.f32 %v475_v12, 0.0 }
  0xf8   : > { %v6880_v16 = vld [vmem:[#allocation2 + $0x44] sm:$0x1]  ;;  %v774_v19 = vshrl.u32 %v657_v8, 16  ;;  %v777_v22 = vshll.u32 %v657_v8, 16  ;;  %v1575_v25 = vunpack.c.l.b16 %v1283_v24  ;;  %633 = vst [vmem:[#allocation2 + $0xa4] sm:$0x1] %v632_v18 }
  0xf9   : > { %v1293_v15 = vsel %vm6611_vm14, %v1288_v10, %v1292_v23  ;;  %v442_v27 = vpop.f32.mrf.mxu0  ;;  %v5718_v28 = vrot.slane %v2023_v4, 9  ;;  %v2106_v55 = vrot.slane %v6876_v13, 5  ;;  %v671_v32 = vpack.c.bf16 %v517_v58, %v517_v58  ;;  %v1125_v60 = vld [vmem:[#allocation2 + $0x3c] sm:$0xf]  ;;  %v560_v24 = vld [vmem:[#allocation2 + $0x60] sm:$0x1] }
  0xfa   : > { %v776_v29 = vrot.slane %v774_v19, 7  ;;  %v1576_v30 = vunpack.c.l.b16 %v1293_v15  ;;  %v443_v20 = vadd.f32 %v6632_v17, %v442_v27  ;;  %v2109_v36 = vrot.slane %v6880_v16, 5 }
  0xfb   : > { %v2107_v35 = vsel %vm6591_vm11, %v5718_v28, %v2106_v55  ;;  %v2108_v31 = vrot.slane %v2106_v55, 4  ;;  %v614_v37 = vsel %vm6561_vm8, 0, %v613_v14  ;;  %v893_v43 = vshrl.u32 %v671_v32, 16  ;;  %v1045_v10 = vld [vmem:[#allocation2 + $0x54] sm:$0xf]  ;;  %v6921_v58 = vpop.f32.mrf.mxu3 }
  0xfc   : > { %v779_v38 = vor.u32 %v777_v22, %v776_v29  ;;  %v781_v39 = vrot.slane %v776_v29, 4  ;;  %v1603_v41 = vpack.c.b16 %v1576_v30, %v1575_v25  ;;  %v504_v42 = vmax.f32 %v443_v20, 0.0  ;;  %615 = vst [vmem:[#allocation2 + $0x5c] sm:$0x1] %v614_v37  ;;  %v634_v28 = vld [vmem:[#allocation2 + $0xb0] sm:$0x1] }
  0xfd   : > { %v896_v46 = vshll.u32 %v671_v32, 16  ;;  %v2110_v47 = vsel %vm6591_vm11, %v2108_v31, %v2109_v36  ;;  %v2200_v49 = vunpack.c.l.b16 %v2107_v35  ;;  %v891_v61 = vrot.slane %v6856_v40, 4 }
  0xfe   : > { %v780_v51 = vsel %vm6655_vm2, %v772_v45, %v779_v38  ;;  %v1043_v53 = vsel %vm6551_vm6, %v781_v39, %v1042_v33  ;;  %5605 = vmatmul.msk.bf16.gmra.mxu1 %vm1639_vm15, %v1603_v41  ;;  %v658_v54 = vpack.c.bf16 %v504_v42, %v504_v42  ;;  %v2201_v44 = vunpack.c.l.b16 %v2110_v47  ;;  %v2024_v55 = vld [vmem:[#allocation2 + $0x48] sm:$0xe] }
  0xff   : > { %1041 = vst.msk [vmem:[#allocation2 + $0x4c] sm:$0xf] %vm524_vm3, %v780_v51  ;;  %v895_v62 = vrot.slane %v893_v43, 7  ;;  %v518_v63 = vmax.f32 %v478_v1, 0.0  ;;  %v6906_v2 = vrot.slane %v2797_v59, 5  ;;  %v6909_v4 = vadd.f32 %v6632_v17, %v479_v5 }
 0x100   : > { %1044 = vst [vmem:[#allocation2 + $0x50] sm:$0x1] %v1043_v53  ;;  %v783_v45 = vshrl.u32 %v658_v54, 16  ;;  %v786_v6 = vshll.u32 %v658_v54, 16  ;;  %v1091_v23 = vld [vmem:[#allocation2 + $0xa4] sm:$0x1]  ;;  %v2227_v7 = vpack.c.b16 %v2201_v44, %v2200_v49 }
 0x101   : > { %v898_v52 = vor.u32 %v896_v46, %v895_v62  ;;  %v900_v8 = vrot.slane %v895_v62, 4  ;;  %v444_v9 = vpop.f32.mrf.mxu0  ;;  %v579_v40 = vsel %vm6551_vm6, 0, %v578_v57  ;;  %v672_v11 = vpack.c.bf16 %v518_v63, %v518_v63  ;;  %v6950_v63 = vld [vmem:[%s8627_s2] ss:$0 sm:$0xff] }
 0x102   : > { %v6913_v12 = vrot.slane %v783_v45, 7  ;;  %v445_v0 = vadd.f32 %v6632_v17, %v444_v9  ;;  %580 = vst [vmem:[#allocation2 + $0xa8] sm:$0x1] %v579_v40  ;;  %v1295_v59 = vshrl.u32 %v1125_v60, 16  ;;  %v1298_v14 = vshll.u32 %v1125_v60, 16  ;;  %5758 = vmatmul.msk.bf16.gmra.mxu3 %vm1639_vm15, %v2227_v7 }
 0x103   : > { %v899_v18 = vsel %vm6655_vm2, %v891_v61, %v898_v52  ;;  %v1092_v1 = vsel %vm6551_vm6, %v900_v8, %v1091_v23  ;;  %v902_v19 = vshrl.u32 %v672_v11, 16  ;;  %v905_v22 = vshll.u32 %v672_v11, 16 }
 0x104   : > { %v788_v15 = vor.u32 %v786_v6, %v6913_v12  ;;  %v789_v17 = vrot.slane %v6913_v12, 4  ;;  %1090 = vst.msk [vmem:[#allocation2 + $0xa0] sm:$0xf] %vm524_vm3, %v899_v18  ;;  %v505_v25 = vmax.f32 %v445_v0, 0.0  ;;  %v1297_v27 = vrot.slane %v1295_v59, 4 }
 0x105   : > { %1093 = vst [vmem:[#allocation2 + $0xa4] sm:$0x1] %v1092_v1  ;;  %v6926_v5 = vrot.slane %v902_v19, 7  ;;  %v1300_v29 = vrot.slane %v1298_v14, 5  ;;  %v1304_v30 = vshll.u32 %v6876_v13, 16  ;;  %v1308_v20 = vshrl.u32 %v6876_v13, 16  ;;  %v484_v1 = vpop.f32.mrf.mxu3 }
 0x106   : > { %v1046_v32 = vsel %vm6645_vm0, %v788_v15, %v1045_v10  ;;  %v659_v33 = vpack.c.bf16 %v505_v25, %v505_v25  ;;  %v1314_v35 = vshll.u32 %v6880_v16, 16  ;;  %v561_v31 = vsel %vm6551_vm6, 0, %v560_v24  ;;  %v6225_v36 = vld [vmem:[#allocation2 + $0x48] sm:$0xff]  ;;  %v1049_v6 = vld [vmem:[#allocation2 + $0x5c] sm:$0x1] }
 0x107   : > { %v6935_v37 = vld [vmem:[#allocation2 + $0x4c] sm:$0xf]  ;;  %1047 = vst [vmem:[#allocation2 + $0x54] sm:$0xf] %v1046_v32  ;;  %v907_v38 = vor.u32 %v905_v22, %v6926_v5  ;;  %v908_v39 = vrot.slane %v6926_v5, 4  ;;  %v1301_v41 = vor.u32 %v1300_v29, %v1297_v27  ;;  %v1306_v42 = vrot.slane %v1304_v30, 5  ;;  %5862 = vmatmul.msk.bf16.gmra.mxu0 %vm1639_vm15, %v6225_v36 }
 0x108   : > { %v6939_v13 = vld [vmem:[#allocation2 + $0x50] sm:$0x1]  ;;  %v791_v43 = vshrl.u32 %v659_v33, 16  ;;  %v794_v46 = vshll.u32 %v659_v33, 16  ;;  %v1310_v47 = vrot.slane %v1308_v20, 4  ;;  %v1316_v49 = vrot.slane %v1314_v35, 5 }
 0x109   : > { %562 = vst [vmem:[#allocation2 + $0x60] sm:$0x1] %v561_v31  ;;  %v1094_v16 = vld [vmem:[#allocation2 + $0xa8] sm:$0xf]  ;;  %v1302_v51 = vrot.slane %v1301_v41, 4  ;;  %v447_v53 = vpop.f32.mrf.mxu0  ;;  %v519_v54 = vmax.f32 %v6909_v4, 0.0  ;;  %v483_v30 = vadd.f32 %v6950_v63, %v6921_v58 }
 0x10a   : > { %v635_v44 = vsel %vm6561_vm8, 0, %v634_v28  ;;  %v5719_v57 = vrot.slane %v2024_v55, 9  ;;  %v793_v60 = vrot.slane %v791_v43, 7  ;;  %v1095_v61 = vsel %vm6645_vm0, %v907_v38, %v1094_v16  ;;  %v616_v12 = vld [vmem:[#allocation2 + $0x68] sm:$0x1] }
 0x10b   : > { %v1311_v62 = vor.u32 %v1310_v47, %v1306_v42  ;;  %v448_v45 = vadd.f32 %v6950_v63, %v447_v53  ;;  %636 = vst [vmem:[#allocation2 + $0xb0] sm:$0x1] %v635_v44  ;;  %v1307_v23 = vsel %vm6611_vm14, %v1302_v51, %v1306_v42  ;;  %v673_v7 = vpack.c.bf16 %v519_v54, %v519_v54  ;;  %v581_v18 = vld [vmem:[#allocation2 + $0xb4] sm:$0x1]  ;;  %v1127_v32 = vld [vmem:[#allocation2 + $0x48] sm:$0xf] }
 0x10c   : > { %1096 = vst [vmem:[#allocation2 + $0xa8] sm:$0xf] %v1095_v61  ;;  %v2113_v4 = vrot.slane %v6935_v37, 5  ;;  %v2116_v52 = vrot.slane %v6939_v13, 5  ;;  %v796_v8 = vor.u32 %v794_v46, %v793_v60  ;;  %v798_v9 = vrot.slane %v793_v60, 4 }
 0x10d   : > { %v1312_v40 = vrot.slane %v1311_v62, 4  ;;  %v1577_v11 = vunpack.c.l.b16 %v1307_v23  ;;  %v506_v0 = vmax.f32 %v448_v45, 0.0  ;;  %v910_v59 = vshrl.u32 %v673_v7, 16 }
 0x10e   : > { %v913_v14 = vshll.u32 %v673_v7, 16  ;;  %v2114_v10 = vsel %vm6591_vm11, %v5719_v57, %v2113_v4  ;;  %v797_v19 = vsel %vm6655_vm2, %v789_v17, %v796_v8  ;;  %v1050_v22 = vsel %vm6551_vm6, %v798_v9, %v1049_v6 }
 0x10f   : > { %v1317_v24 = vsel %vm6611_vm14, %v1312_v40, %v1316_v49  ;;  %v2115_v15 = vrot.slane %v2113_v4, 4  ;;  %1048 = vst.msk [vmem:[#allocation2 + $0x58] sm:$0xf] %vm524_vm3, %v797_v19  ;;  %v660_v27 = vpack.c.bf16 %v506_v0, %v506_v0  ;;  %v912_v28 = vrot.slane %v910_v59, 7  ;;  %v6243_v0 = vld [vmem:[%s8628_s3 + $0x98] sm:$0xff] }
 0x110   : > { %v1578_v25 = vunpack.c.l.b16 %v1317_v24  ;;  %v2202_v55 = vunpack.c.l.b16 %v2114_v10  ;;  %1051 = vst [vmem:[#allocation2 + $0x5c] sm:$0x1] %v1050_v22  ;;  %v617_v17 = vsel %vm6561_vm8, 0, %v616_v12  ;;  %v582_v20 = vsel %vm6551_vm6, 0, %v581_v18  ;;  %v1052_v53 = vld [vmem:[#allocation2 + $0x60] sm:$0xf]  ;;  %v487_v12 = vpop.f32.mrf.mxu3  ;;  %3310 = vmatpush.bf16.msrb.mxu1 %v6243_v0 }
 0x111   : > { %v2117_v29 = vsel %vm6591_vm11, %v2115_v15, %v2116_v52  ;;  %v800_v35 = vshrl.u32 %v660_v27, 16  ;;  %v803_v31 = vshll.u32 %v660_v27, 16  ;;  %v915_v36 = vor.u32 %v913_v14, %v912_v28  ;;  %v449_v41 = vpop.f32.mrf.mxu0  ;;  %618 = vst [vmem:[#allocation2 + $0x68] sm:$0x1] %v617_v17  ;;  %v637_v18 = vld [vmem:[#allocation2 + $0xbc] sm:$0x1] }
 0x112   : > { %v1604_v33 = vpack.c.b16 %v1578_v25, %v1577_v11  ;;  %v1098_v38 = vld [vmem:[#allocation2 + $0xb0] sm:$0x1]  ;;  %v917_v42 = vrot.slane %v912_v28, 4  ;;  %v2203_v43 = vunpack.c.l.b16 %v2117_v29  ;;  %v450_v46 = vadd.f32 %v6950_v63, %v449_v41  ;;  %583 = vst [vmem:[#allocation2 + $0xb4] sm:$0x1] %v582_v20 }
 0x113   : > { %v520_v47 = vmax.f32 %v483_v30, 0.0  ;;  %v6976_v58 = vrot.slane %v800_v35, 7  ;;  %v916_v49 = vsel %vm6655_vm2, %v908_v39, %v915_v36  ;;  %v1319_v16 = vshrl.u32 %v1127_v32, 16  ;;  %v563_v11 = vld [vmem:[#allocation2 + $0x6c] sm:$0x1]  ;;  %v6242_v27 = vld [vmem:[%s8628_s3 + $0x90] sm:$0xff] }
 0x114   : > { %5606 = vmatmul.msk.bf16.gmra.mxu1 %vm1639_vm15, %v1604_v33  ;;  %v1322_v51 = vshll.u32 %v1127_v32, 16  ;;  %1097 = vst.msk [vmem:[#allocation2 + $0xac] sm:$0xf] %vm524_vm3, %v916_v49  ;;  %v1099_v54 = vsel %vm6551_vm6, %v917_v42, %v1098_v38  ;;  %v2228_v44 = vpack.c.b16 %v2203_v43, %v2202_v55  ;;  %v507_v57 = vmax.f32 %v450_v46, 0.0  ;;  %v2025_v25 = vld [vmem:[#allocation2 + $0x54] sm:$0xe] }
 0x115   : > { %v674_v60 = vpack.c.bf16 %v520_v47, %v520_v47  ;;  %v805_v61 = vor.u32 %v803_v31, %v6976_v58  ;;  %v806_v62 = vrot.slane %v6976_v58, 4  ;;  %1100 = vst [vmem:[#allocation2 + $0xb0] sm:$0x1] %v1099_v54  ;;  %v1321_v5 = vrot.slane %v1319_v16, 4  ;;  %v619_v16 = vld [vmem:[#allocation2 + $0x74] sm:$0x1]  ;;  %3311 = vmatpush.bf16.msrb.mxu1 %v6242_v27 }
 0x116   : > { %v1324_v45 = vrot.slane %v1322_v51, 5  ;;  %5759 = vmatmul.msk.bf16.gmra.mxu3 %vm1639_vm15, %v2228_v44  ;;  %v661_v39 = vpack.c.bf16 %v507_v57, %v507_v57  ;;  %v1328_v7 = vshll.u32 %v6935_v37, 16  ;;  %v6226_v4 = vld [vmem:[#allocation2 + $0x54] sm:$0xff]  ;;  %v1332_v9 = vshrl.u32 %v6935_v37, 16  ;;  %v6241_v51 = vld [vmem:[%s8628_s3 + $0x88] sm:$0xff] }
 0x117   : > { %v919_v6 = vshrl.u32 %v674_v60, 16  ;;  %v922_v23 = vshll.u32 %v674_v60, 16  ;;  %v1053_v52 = vsel %vm6645_vm0, %v805_v61, %v1052_v53  ;;  %v1338_v40 = vshll.u32 %v6939_v13, 16  ;;  %5863 = vmatmul.msk.bf16.gmra.mxu0 %vm1639_vm15, %v6226_v4  ;;  %v7013_v42 = vld [vmem:[#allocation2 + $0x58] sm:$0xf]  ;;  %v6240_v4 = vld [vmem:[%s8628_s3 + $0x80] sm:$0xff] }
 0x118   : > { %v1325_v8 = vor.u32 %v1324_v45, %v1321_v5  ;;  %1054 = vst [vmem:[#allocation2 + $0x60] sm:$0xf] %v1053_v52  ;;  %v808_v59 = vshrl.u32 %v661_v39, 16  ;;  %v811_v14 = vshll.u32 %v661_v39, 16  ;;  %v485_v10 = vadd.f32 %v6950_v63, %v484_v1  ;;  %v1056_v30 = vld [vmem:[#allocation2 + $0x68] sm:$0x1] }
 0x119   : > { %v6999_v19 = vadd.f32 %v6950_v63, %v487_v12  ;;  %v7001_v37 = vrot.slane %v919_v6, 7  ;;  %v1330_v22 = vrot.slane %v1328_v7, 5  ;;  %v1334_v24 = vrot.slane %v1332_v9, 4  ;;  %v452_v15 = vpop.f32.mrf.mxu0  ;;  %v1101_v55 = vld [vmem:[#allocation2 + $0xb4] sm:$0xf]  ;;  %3312 = vmatpush.bf16.msrb.mxu1 %v6241_v51  ;;  %v6211_v12 = vld [vmem:[%s8628_s3 + $0x18] sm:$0xff] }
 0x11a   : > { %v1326_v13 = vrot.slane %v1325_v8, 4  ;;  %v810_v28 = vrot.slane %v808_v59, 7  ;;  %v1340_v29 = vrot.slane %v1338_v40, 5  ;;  %v453_v1 = vadd.f32 %v6950_v63, %v452_v15  ;;  %v7015_v43 = vld [vmem:[#allocation2 + $0x5c] sm:$0x1]  ;;  %1933 = vmatpush.bf16.msrb.mxu2 %v6211_v12 }
 0x11b   : > { %v564_v17 = vsel %vm6551_vm6, 0, %v563_v11  ;;  %v924_v20 = vor.u32 %v922_v23, %v7001_v37  ;;  %v925_v32 = vrot.slane %v7001_v37, 4  ;;  %v1335_v35 = vor.u32 %v1334_v24, %v1330_v22  ;;  %v584_v39 = vld [vmem:[#allocation2 + $0xc0] sm:$0x1] }
 0x11c   : > { %v1331_v33 = vsel %vm6611_vm14, %v1326_v13, %v1330_v22  ;;  %565 = vst [vmem:[#allocation2 + $0x6c] sm:$0x1] %v564_v17  ;;  %v813_v31 = vor.u32 %v811_v14, %v810_v28  ;;  %v815_v36 = vrot.slane %v810_v28, 4  ;;  %v508_v41 = vmax.f32 %v453_v1, 0.0 }
 0x11d   : > { %v1579_v38 = vunpack.c.l.b16 %v1331_v33  ;;  %v1102_v46 = vsel %vm6645_vm0, %v924_v20, %v1101_v55  ;;  %v1336_v47 = vrot.slane %v1335_v35, 4  ;;  %v521_v58 = vmax.f32 %v485_v10, 0.0  ;;  %v489_v33 = vpop.f32.mrf.mxu3  ;;  %3313 = vmatpush.bf16.msrb.mxu1 %v6240_v4 }
 0x11e   : > { %v638_v49 = vsel %vm6561_vm8, 0, %v637_v18  ;;  %v814_v53 = vsel %vm6655_vm2, %v806_v62, %v813_v31  ;;  %v1057_v54 = vsel %vm6551_vm6, %v815_v36, %v1056_v30  ;;  %1103 = vst [vmem:[#allocation2 + $0xb4] sm:$0xf] %v1102_v46  ;;  %v662_v44 = vpack.c.bf16 %v508_v41, %v508_v41  ;;  %v1129_v18 = vld [vmem:[#allocation2 + $0x54] sm:$0xf] }
 0x11f   : > { %v5720_v57 = vrot.slane %v2025_v25, 9  ;;  %1055 = vst.msk [vmem:[#allocation2 + $0x64] sm:$0xf] %vm524_vm3, %v814_v53  ;;  %v1341_v60 = vsel %vm6611_vm14, %v1336_v47, %v1340_v29  ;;  %v675_v61 = vpack.c.bf16 %v521_v58, %v521_v58  ;;  %v2120_v5 = vrot.slane %v7013_v42, 5 }
 0x120   : > { %v2123_v45 = vrot.slane %v7015_v43, 5  ;;  %1058 = vst [vmem:[#allocation2 + $0x68] sm:$0x1] %v1057_v54  ;;  %v1580_v6 = vunpack.c.l.b16 %v1341_v60  ;;  %v817_v62 = vshrl.u32 %v662_v44, 16  ;;  %v820_v23 = vshll.u32 %v662_v44, 16 }
 0x121   : > { %v620_v7 = vsel %vm6561_vm8, 0, %v619_v16  ;;  %639 = vst [vmem:[#allocation2 + $0xbc] sm:$0x1] %v638_v49  ;;  %v927_v52 = vshrl.u32 %v675_v61, 16  ;;  %v930_v8 = vshll.u32 %v675_v61, 16  ;;  %v2121_v9 = vsel %vm6591_vm11, %v5720_v57, %v2120_v5  ;;  %v454_v11 = vpop.f32.mrf.mxu0 }
 0x122   : > { %v2122_v40 = vrot.slane %v2120_v5, 4  ;;  %v1605_v0 = vpack.c.b16 %v1580_v6, %v1579_v38  ;;  %v7043_v59 = vrot.slane %v817_v62, 7  ;;  %v2204_v14 = vunpack.c.l.b16 %v2121_v9  ;;  %621 = vst [vmem:[#allocation2 + $0x74] sm:$0x1] %v620_v7  ;;  %v640_v54 = vld [vmem:[#allocation2 + $0xc8] sm:$0x1] }
 0x123   : > { %v455_v10 = vadd.f32 %v6950_v63, %v454_v11  ;;  %v1059_v13 = vld [vmem:[#allocation2 + $0x6c] sm:$0xf]  ;;  %v929_v22 = vrot.slane %v927_v52, 7  ;;  %v522_v15 = vmax.f32 %v6999_v19, 0.0  ;;  %v585_v25 = vsel %vm6551_vm6, 0, %v584_v39 }
 0x124   : > { %v2124_v24 = vsel %vm6591_vm11, %v2122_v40, %v2123_v45  ;;  %5607 = vmatmul.msk.bf16.gmra.mxu1 %vm1639_vm15, %v1605_v0  ;;  %v822_v27 = vor.u32 %v820_v23, %v7043_v59  ;;  %v823_v28 = vrot.slane %v7043_v59, 4  ;;  %586 = vst [vmem:[#allocation2 + $0xc0] sm:$0x1] %v585_v25  ;;  %v1343_v20 = vshrl.u32 %v1129_v18, 16  ;;  %v2026_v61 = vld [vmem:[#allocation2 + $0x60] sm:$0xe] }
 0x125   : > { %v2205_v55 = vunpack.c.l.b16 %v2124_v24  ;;  %v509_v29 = vmax.f32 %v455_v10, 0.0  ;;  %v932_v1 = vor.u32 %v930_v8, %v929_v22  ;;  %v934_v17 = vrot.slane %v929_v22, 4  ;;  %v1131_v10 = vld [vmem:[#allocation2 + $0x60] sm:$0xf] }
 0x126   : > { %v676_v30 = vpack.c.bf16 %v522_v15, %v522_v15  ;;  %v1060_v19 = vsel %vm6645_vm0, %v822_v27, %v1059_v13  ;;  %v1346_v36 = vshll.u32 %v1129_v18, 16  ;;  %v6227_v38 = vld [vmem:[#allocation2 + $0x60] sm:$0xff]  ;;  %v1345_v58 = vrot.slane %v1343_v20, 4 }
 0x127   : > { %v2229_v35 = vpack.c.b16 %v2205_v55, %v2204_v14  ;;  %v663_v31 = vpack.c.bf16 %v509_v29, %v509_v29  ;;  %1061 = vst [vmem:[#allocation2 + $0x6c] sm:$0xf] %v1060_v19  ;;  %v933_v41 = vsel %vm6655_vm2, %v925_v32, %v932_v1  ;;  %5864 = vmatmul.msk.bf16.gmra.mxu0 %vm1639_vm15, %v6227_v38  ;;  %v1352_v60 = vshll.u32 %v7013_v42, 16  ;;  %v1132_v12 = vld [vmem:[#allocation2 + $0x64] sm:$0xf]  ;;  %v7088_v55 = vpop.f32.mrf.mxu3  ;;  %v7093_v19 = vpop.f32.mrf.mxu1 }
 0x128   : > { %v936_v46 = vshrl.u32 %v676_v30, 16  ;;  %v939_v47 = vshll.u32 %v676_v30, 16  ;;  %1104 = vst.msk [vmem:[#allocation2 + $0xb8] sm:$0xf] %vm524_vm3, %v933_v41  ;;  %v1105_v49 = vld [vmem:[#allocation2 + $0xbc] sm:$0x1]  ;;  %v490_v53 = vadd.f32 %v6950_v63, %v489_v33  ;;  %v2800_v37 = vor.u32 %v6906_v2, %v6792_v56 }
 0x129   : > { %5760 = vmatmul.msk.bf16.gmra.mxu3 %vm1639_vm15, %v2229_v35  ;;  %v825_v16 = vshrl.u32 %v663_v31, 16  ;;  %v828_v51 = vshll.u32 %v663_v31, 16  ;;  %v1106_v32 = vsel %vm6551_vm6, %v934_v17, %v1105_v49  ;;  %v1348_v57 = vrot.slane %v1346_v36, 5  ;;  %v1063_v6 = vld [vmem:[#allocation2 + $0x74] sm:$0x1] }
 0x12a   : > { %v7068_v44 = vrot.slane %v936_v46, 7  ;;  %1107 = vst [vmem:[#allocation2 + $0xbc] sm:$0x1] %v1106_v32  ;;  %v1356_v45 = vshrl.u32 %v7013_v42, 16  ;;  %v1362_v39 = vshll.u32 %v7015_v43, 16  ;;  %v523_v63 = vmax.f32 %v490_v53, 0.0 }
 0x12b   : > { %v827_v5 = vrot.slane %v825_v16, 7  ;;  %v1108_v7 = vld [vmem:[#allocation2 + $0xc0] sm:$0xf]  ;;  %v1349_v4 = vor.u32 %v1348_v57, %v1345_v58  ;;  %v1354_v52 = vrot.slane %v1352_v60, 5  ;;  %v641_v43 = vsel %vm6561_vm8, 0, %v640_v54 }
 0x12c   : > { %v941_v62 = vor.u32 %v939_v47, %v7068_v44  ;;  %v942_v23 = vrot.slane %v7068_v44, 4  ;;  %v1358_v40 = vrot.slane %v1356_v45, 4  ;;  %v1364_v11 = vrot.slane %v1362_v39, 5  ;;  %v7079_v14 = vld [vmem:[#allocation2 + $0x68] sm:$0x1] }
 0x12d   : > { %v830_v8 = vor.u32 %v828_v51, %v827_v5  ;;  %v832_v9 = vrot.slane %v827_v5, 4  ;;  %v1350_v42 = vrot.slane %v1349_v4, 4  ;;  %v677_v59 = vpack.c.bf16 %v523_v63, %v523_v63  ;;  %642 = vst [vmem:[#allocation2 + $0xc8] sm:$0x1] %v641_v43  ;;  %v7097_v46 = vld [vmem:[#allocation2 + $0x10] sm:$0xf] }
 0x12e   : > { %v1109_v0 = vsel %vm6645_vm0, %v941_v62, %v1108_v7  ;;  %v1359_v22 = vor.u32 %v1358_v40, %v1354_v52  ;;  %v5721_v24 = vrot.slane %v2026_v61, 9  ;;  %v2127_v27 = vrot.slane %v1132_v12, 5  ;;  %v7101_v44 = vld [vmem:[#allocation2 + $0x14] sm:$0x1]  ;;  %v1133_v43 = vld [vmem:[#allocation2 + $0x6c] sm:$0xf] }
 0x12f   : > { %v831_v18 = vsel %vm6655_vm2, %v823_v28, %v830_v8  ;;  %v1064_v13 = vsel %vm6551_vm6, %v832_v9, %v1063_v6  ;;  %1110 = vst [vmem:[#allocation2 + $0xc0] sm:$0xf] %v1109_v0  ;;  %v1355_v34 = vsel %vm6611_vm14, %v1350_v42, %v1354_v52  ;;  %v944_v15 = vshrl.u32 %v677_v59, 16  ;;  %v7120_v42 = vpop.f32.mrf.mxu3 }
 0x130   : > { %1062 = vst.msk [vmem:[#allocation2 + $0x70] sm:$0xf] %vm524_vm3, %v831_v18  ;;  %v947_v25 = vshll.u32 %v677_v59, 16  ;;  %v1360_v29 = vrot.slane %v1359_v22, 4  ;;  %v1581_v1 = vunpack.c.l.b16 %v1355_v34  ;;  %v2130_v28 = vrot.slane %v7079_v14, 5  ;;  %v7124_v34 = vpop.f32.mrf.mxu1 }
 0x131   : > { %1065 = vst [vmem:[#allocation2 + $0x74] sm:$0x1] %v1064_v13  ;;  %v1367_v17 = vshrl.u32 %v1131_v10, 16  ;;  %v946_v30 = vrot.slane %v944_v15, 7  ;;  %v2128_v20 = vsel %vm6591_vm11, %v5721_v24, %v2127_v27  ;;  %v2129_v33 = vrot.slane %v2127_v27, 4 }
 0x132   : > { %v1370_v35 = vshll.u32 %v1131_v10, 16  ;;  %v1365_v31 = vsel %vm6611_vm14, %v1360_v29, %v1364_v11  ;;  %v2206_v36 = vunpack.c.l.b16 %v2128_v20  ;;  %v1376_v41 = vshll.u32 %v1132_v12, 16 }
 0x133   : > { %v1369_v38 = vrot.slane %v1367_v17, 4  ;;  %v1582_v47 = vunpack.c.l.b16 %v1365_v31  ;;  %v949_v58 = vor.u32 %v947_v25, %v946_v30  ;;  %v951_v49 = vrot.slane %v946_v30, 4  ;;  %v2748_v31 = vld [vmem:[#allocation2 + $0x18] sm:$0xf] }
 0x134   : > { %v2131_v16 = vsel %vm6591_vm11, %v2129_v33, %v2130_v28  ;;  %v1372_v53 = vrot.slane %v1370_v35, 5  ;;  %v1378_v54 = vrot.slane %v1376_v41, 5  ;;  %v1380_v32 = vshrl.u32 %v1132_v12, 16  ;;  %v7107_v45 = vpop.f32.mrf.mxu0  ;;  %v1112_v52 = vld [vmem:[#allocation2 + $0xc8] sm:$0x1] }
 0x135   : > { %v2207_v51 = vunpack.c.l.b16 %v2131_v16  ;;  %v1606_v57 = vpack.c.b16 %v1582_v47, %v1581_v1  ;;  %v950_v60 = vsel %vm6655_vm2, %v942_v23, %v949_v58  ;;  %v1386_v61 = vshll.u32 %v7079_v14, 16  ;;  %v2027_v23 = vld [vmem:[#allocation2 + $0x6c] sm:$0xe] }
 0x136   : > { %v2803_v5 = vshll.u32 %v7097_v46, 16  ;;  %1111 = vst.msk [vmem:[#allocation2 + $0xc4] sm:$0xf] %vm524_vm3, %v950_v60  ;;  %v1373_v63 = vor.u32 %v1372_v53, %v1369_v38  ;;  %v1382_v6 = vrot.slane %v1380_v32, 4  ;;  %v2807_v62 = vshrl.u32 %v7097_v46, 16 }
 0x137   : > { %v2230_v39 = vpack.c.b16 %v2207_v51, %v2206_v36  ;;  %v6228_v7 = vld [vmem:[#allocation2 + $0x6c] sm:$0xff]  ;;  %5608 = vmatmul.msk.bf16.gmra.mxu1 %vm1639_vm15, %v1606_v57  ;;  %v2813_v48 = vshll.u32 %v7101_v44, 16  ;;  %v1113_v12 = vsel %vm6551_vm6, %v951_v49, %v1112_v52  ;;  %v2801_v0 = vrot.slane %v2800_v37, 4  ;;  %v2749_v36 = vld [vmem:[#allocation2 + $0x1c] sm:$0xf] }
 0x138   : > { %v2805_v4 = vrot.slane %v2803_v5, 5  ;;  %v1374_v8 = vrot.slane %v1373_v63, 4  ;;  %v1383_v9 = vor.u32 %v1382_v6, %v1378_v54  ;;  %v2809_v40 = vrot.slane %v2807_v62, 4  ;;  %5865 = vmatmul.msk.bf16.gmra.mxu0 %vm1639_vm15, %v6228_v7  ;;  %v1134_v11 = vld [vmem:[#allocation2 + $0x70] sm:$0xf] }
 0x139   : > { %5761 = vmatmul.msk.bf16.gmra.mxu3 %vm1639_vm15, %v2230_v39  ;;  %1114 = vst [vmem:[#allocation2 + $0xc8] sm:$0x1] %v1113_v12  ;;  %v1388_v10 = vrot.slane %v1386_v61, 5  ;;  %v1164_v13 = vld [vmem:[#allocation2 + $0x74] sm:$0x1]  ;;  %v2815_v24 = vrot.slane %v2813_v48, 5 }
 0x13a   : > { %v1379_v59 = vsel %vm6611_vm14, %v1374_v8, %v1378_v54  ;;  %v1384_v14 = vrot.slane %v1383_v9, 4  ;;  %v2810_v18 = vor.u32 %v2809_v40, %v2805_v4  ;;  %v5722_v15 = vrot.slane %v2027_v23, 9  ;;  %v6210_v61 = vld [vmem:[%s8628_s3 + $0x10] sm:$0xff]  ;;  %v2750_v52 = vld [vmem:[#allocation2 + $0x20] sm:$0x1] }
 0x13b   : > { %v1583_v22 = vunpack.c.l.b16 %v1379_v59  ;;  %v2134_v25 = vrot.slane %v1134_v11, 5  ;;  %v1391_v37 = vshrl.u32 %v1133_v43, 16  ;;  %v1394_v27 = vshll.u32 %v1133_v43, 16  ;;  %1934 = vmatpush.bf16.msrb.mxu2 %v6210_v61  ;;  %v1135_v40 = vld [vmem:[#allocation2 + $0x78] sm:$0xf] }
 0x13c   : > { %v1389_v56 = vsel %vm6611_vm14, %v1384_v14, %v1388_v10  ;;  %v2811_v2 = vrot.slane %v2810_v18, 4  ;;  %v7128_v1 = vpop.f32.mrf.mxu0  ;;  %v2137_v17 = vrot.slane %v1164_v13, 5  ;;  %v1400_v30 = vshll.u32 %v1134_v11, 16  ;;  %v1136_v14 = vld [vmem:[#allocation2 + $0x7c] sm:$0xf] }
 0x13d   : > { %v1584_v29 = vunpack.c.l.b16 %v1389_v56  ;;  %v2136_v28 = vrot.slane %v2134_v25, 4  ;;  %v1393_v33 = vrot.slane %v1391_v37, 4  ;;  %v1396_v35 = vrot.slane %v1394_v27, 5  ;;  %v1165_v10 = vld [vmem:[#allocation2 + $0x80] sm:$0x1] }
 0x13e   : > { %v2816_v20 = vsel %vm6611_vm14, %v2811_v2, %v2815_v24  ;;  %v2806_v41 = vsel %vm6611_vm14, %v2801_v0, %v2805_v4  ;;  %v2135_v47 = vsel %vm6591_vm11, %v5722_v15, %v2134_v25  ;;  %v1402_v51 = vrot.slane %v1400_v30, 5  ;;  %v2028_v24 = vld [vmem:[#allocation2 + $0x78] sm:$0xe] }
 0x13f   : > { %v1607_v38 = vpack.c.b16 %v1584_v29, %v1583_v22  ;;  %v2138_v58 = vsel %vm6591_vm11, %v2136_v28, %v2137_v17  ;;  %v3187_v49 = vunpack.c.l.b16 %v2816_v20  ;;  %v1404_v53 = vshrl.u32 %v1134_v11, 16  ;;  %v6229_v22 = vld [vmem:[#allocation2 + $0x78] sm:$0xff] }
 0x140   : > { %v2209_v16 = vunpack.c.l.b16 %v2138_v58  ;;  %v1397_v54 = vor.u32 %v1396_v35, %v1393_v33  ;;  %v2818_v32 = vshrl.u32 %v2748_v31, 16  ;;  %v2821_v57 = vshll.u32 %v2748_v31, 16 }
 0x141   : > { %5609 = vmatmul.msk.bf16.vlgmr.msra.gmra.mxu2 %vm1639_vm15, %v1607_v38  ;;  %v2827_v60 = vshll.u32 %v2749_v36, 16  ;;  %v2208_v5 = vunpack.c.l.b16 %v2135_v47  ;;  %v1406_v39 = vrot.slane %v1404_v53, 4  ;;  %v1410_v63 = vshll.u32 %v1164_v13, 16 }
 0x142   : > { %v3186_v6 = vunpack.c.l.b16 %v2806_v41  ;;  %v2831_v4 = vshrl.u32 %v2749_v36, 16  ;;  %v2820_v8 = vrot.slane %v2818_v32, 4  ;;  %v2823_v9 = vrot.slane %v2821_v57, 5  ;;  %v2752_v41 = vld [vmem:[#allocation2 + $0x28] sm:$0xf] }
 0x143   : > { %v7144_v7 = vrot.slane %v2827_v60, 5  ;;  %v2231_v48 = vpack.c.b16 %v2209_v16, %v2208_v5  ;;  %v1407_v23 = vor.u32 %v1406_v39, %v1402_v51  ;;  %v7146_v12 = vpop.f32.mrf.mxu1  ;;  %v1398_v0 = vrot.slane %v1397_v54, 4 }
 0x144   : > { %v7142_v62 = vpop.f32.mrf.mxu3  ;;  %v3218_v11 = vpack.c.b16 %v3187_v49, %v3186_v6  ;;  %v2833_v43 = vrot.slane %v2831_v4, 4  ;;  %v7148_v59 = vpop.f32.mrf.mxu0  ;;  %v1412_v13 = vrot.slane %v1410_v63, 5  ;;  %v2141_v15 = vrot.slane %v1136_v14, 5  ;;  %v2751_v6 = vld [vmem:[#allocation2 + $0x24] sm:$0xf] }
 0x145   : > { %v1408_v18 = vrot.slane %v1407_v23, 4  ;;  %v1403_v25 = vsel %vm6611_vm14, %v1398_v0, %v1402_v51  ;;  %v1415_v2 = vshrl.u32 %v1135_v40, 16  ;;  %v1418_v37 = vshll.u32 %v1135_v40, 16 }
 0x146   : > { %v2834_v56 = vor.u32 %v2833_v43, %v7144_v7  ;;  %v2824_v29 = vor.u32 %v2823_v9, %v2820_v8  ;;  %v2837_v28 = vshll.u32 %v2750_v52, 16  ;;  %v1424_v17 = vshll.u32 %v1136_v14, 16 }
 0x147   : > { %5897 = vmatmul.msk.bf16.vlgmr.msrb.gmra.mxu1 %vm1639_vm15, %v3218_v11  ;;  %v1413_v27 = vsel %vm6611_vm14, %v1408_v18, %v1412_v13  ;;  %v5723_v20 = vrot.slane %v2028_v24, 9  ;;  %v2143_v33 = vrot.slane %v2141_v15, 4  ;;  %v2144_v35 = vrot.slane %v1165_v10, 5 }
 0x148   : > { %5866 = vmatmul.msk.bf16.gmra.mxu0 %vm1639_vm15, %v6229_v22  ;;  %v1586_v30 = vunpack.c.l.b16 %v1413_v27  ;;  %v2835_v31 = vrot.slane %v2834_v56, 4  ;;  %v1417_v36 = vrot.slane %v1415_v2, 4  ;;  %v1420_v38 = vrot.slane %v1418_v37, 5  ;;  %v2753_v56 = vld [vmem:[#allocation2 + $0x2c] sm:$0x1] }
 0x149   : > { %5762 = vmatmul.msk.bf16.gmra.mxu3 %vm1639_vm15, %v2231_v48  ;;  %v1585_v47 = vunpack.c.l.b16 %v1403_v25  ;;  %v2825_v49 = vrot.slane %v2824_v29, 4  ;;  %v2839_v16 = vrot.slane %v2837_v28, 5  ;;  %v1426_v51 = vrot.slane %v1424_v17, 5  ;;  %v1138_v28 = vld [vmem:[#allocation2 + $0x88] sm:$0xf] }
 0x14a   : > { %v1428_v53 = vshrl.u32 %v1136_v14, 16  ;;  %v2142_v57 = vsel %vm6591_vm11, %v5723_v20, %v2141_v15  ;;  %v2145_v60 = vsel %vm6591_vm11, %v2143_v33, %v2144_v35  ;;  %v2851_v61 = vshll.u32 %v2752_v41, 16  ;;  %v6230_v20 = vld [vmem:[#allocation2 + $0x84] sm:$0xff] }
 0x14b   : > { %v1608_v54 = vpack.c.b16 %v1586_v30, %v1585_v47  ;;  %v2840_v5 = vsel %vm6611_vm14, %v2835_v31, %v2839_v16  ;;  %v1421_v39 = vor.u32 %v1420_v38, %v1417_v36  ;;  %v2830_v4 = vsel %vm6611_vm14, %v2825_v49, %v7144_v7  ;;  %v7171_v48 = vpop.f32.mrf.mxu1  ;;  %v1137_v7 = vld [vmem:[#allocation2 + $0x84] sm:$0xf]  ;;  %v1166_v47 = vld [vmem:[#allocation2 + $0x8c] sm:$0x1] }
 0x14c   : > { %v7158_v58 = vpop.f32.mrf.mxu3  ;;  %v7160_v32 = vpop.f32.mrf.mxu0  ;;  %v1430_v63 = vrot.slane %v1428_v53, 4  ;;  %v2855_v23 = vshrl.u32 %v2752_v41, 16  ;;  %v2210_v52 = vunpack.c.l.b16 %v2142_v57  ;;  %v2211_v8 = vunpack.c.l.b16 %v2145_v60  ;;  %v2029_v36 = vld [vmem:[#allocation2 + $0x84] sm:$0xe] }
 0x14d   : > { %v1434_v40 = vshll.u32 %v1165_v10, 16  ;;  %v3189_v11 = vunpack.c.l.b16 %v2840_v5  ;;  %v2842_v0 = vshrl.u32 %v2751_v6, 16  ;;  %v7174_v43 = vrot.slane %v2851_v61, 5 }
 0x14e   : > { %v1431_v9 = vor.u32 %v1430_v63, %v1426_v51  ;;  %v2857_v14 = vrot.slane %v2855_v23, 4  ;;  %v1422_v18 = vrot.slane %v1421_v39, 4  ;;  %v2845_v13 = vshll.u32 %v2751_v6, 16  ;;  %v2755_v39 = vld [vmem:[#allocation2 + $0x34] sm:$0xf] }
 0x14f   : > { %v3188_v22 = vunpack.c.l.b16 %v2830_v4  ;;  %v1436_v25 = vrot.slane %v1434_v40, 5  ;;  %v2232_v37 = vpack.c.b16 %v2211_v8, %v2210_v52  ;;  %v2844_v27 = vrot.slane %v2842_v0, 4 }
 0x150   : > { %v1432_v15 = vrot.slane %v1431_v9, 4  ;;  %v2858_v10 = vor.u32 %v2857_v14, %v7174_v43  ;;  %v1427_v17 = vsel %vm6611_vm14, %v1422_v18, %v1426_v51  ;;  %v2847_v30 = vrot.slane %v2845_v13, 5 }
 0x151   : > { %5610 = vmatmul.msk.bf16.gmra.mxu2 %vm1639_vm15, %v1608_v54  ;;  %v3219_v2 = vpack.c.b16 %v3189_v11, %v3188_v22  ;;  %v1439_v33 = vshrl.u32 %v1137_v7, 16  ;;  %v1442_v35 = vshll.u32 %v1137_v7, 16  ;;  %v2861_v31 = vshll.u32 %v2753_v56, 16  ;;  %v2754_v22 = vld [vmem:[#allocation2 + $0x30] sm:$0xf] }
 0x152   : > { %v2148_v38 = vrot.slane %v1138_v28, 5  ;;  %v1437_v41 = vsel %vm6611_vm14, %v1432_v15, %v1436_v25  ;;  %v1448_v49 = vshll.u32 %v1138_v28, 16  ;;  %v1452_v16 = vshrl.u32 %v1138_v28, 16 }
 0x153   : > { %v1587_v53 = vunpack.c.l.b16 %v1427_v17  ;;  %v2859_v54 = vrot.slane %v2858_v10, 4  ;;  %v2848_v57 = vor.u32 %v2847_v30, %v2844_v27  ;;  %v5724_v60 = vrot.slane %v2029_v36, 9 }
 0x154   : > { %v7176_v24 = vpop.f32.mrf.mxu3  ;;  %v7179_v29 = vpop.f32.mrf.mxu0  ;;  %v1441_v61 = vrot.slane %v1439_v33, 4  ;;  %v1444_v5 = vrot.slane %v1442_v35, 5  ;;  %v1588_v63 = vunpack.c.l.b16 %v1437_v41  ;;  %v2863_v6 = vrot.slane %v2861_v31, 5  ;;  %v6209_v33 = vld [vmem:[%s8628_s3 + $0x8] sm:$0xff] }
 0x155   : > { %8652 = vst [vmem:[#allocation9_spill] sm:$0xff] %v7179_v29  ;;  %v2150_v23 = vrot.slane %v2148_v38, 4  ;;  %v2151_v52 = vrot.slane %v1166_v47, 5  ;;  %v1450_v8 = vrot.slane %v1448_v49, 5  ;;  %v1454_v9 = vrot.slane %v1452_v16, 4  ;;  %1935 = vmatpush.bf16.msrb.mxu2 %v6209_v33 }
 0x156   : > { %v2864_v40 = vsel %vm6611_vm14, %v2859_v54, %v2863_v6  ;;  %v2875_v0 = vshll.u32 %v2755_v39, 16  ;;  %v2879_v14 = vshrl.u32 %v2755_v39, 16  ;;  %v2849_v18 = vrot.slane %v2848_v57, 4  ;;  %v7213_v49 = vld [vmem:[#allocation2 + $0x98] sm:$0x1] }
 0x157   : > { %5898 = vmatmul.msk.bf16.gmra.mxu1 %vm1639_vm15, %v3219_v2  ;;  %v1445_v13 = vor.u32 %v1444_v5, %v1441_v61  ;;  %v1609_v7 = vpack.c.b16 %v1588_v63, %v1587_v53  ;;  %v2149_v15 = vsel %vm6591_vm11, %v5724_v60, %v2148_v38  ;;  %v2152_v25 = vsel %vm6591_vm11, %v2150_v23, %v2151_v52  ;;  %v2030_v57 = vld [vmem:[#allocation2 + $0x90] sm:$0xe] }
 0x158   : > { %5867 = vmatmul.msk.bf16.gmra.mxu0 %vm1639_vm15, %v6230_v20  ;;  %v7188_v51 = vpop.f32.mrf.mxu1  ;;  %v2854_v56 = vsel %vm6611_vm14, %v2849_v18, %v7174_v43  ;;  %v3191_v2 = vunpack.c.l.b16 %v2864_v40  ;;  %v1458_v27 = vshll.u32 %v1166_v47, 16  ;;  %v2866_v28 = vshrl.u32 %v2754_v22, 16  ;;  %v1140_v43 = vld [vmem:[#allocation2 + $0x94] sm:$0xf]  ;;  %v2756_v47 = vld [vmem:[#allocation2 + $0x38] sm:$0x1] }
 0x159   : > { %5763 = vmatmul.msk.bf16.gmra.mxu3 %vm1639_vm15, %v2232_v37  ;;  %v1455_v37 = vor.u32 %v1454_v9, %v1450_v8  ;;  %v2869_v17 = vshll.u32 %v2754_v22, 16  ;;  %v7206_v30 = vrot.slane %v2875_v0, 5  ;;  %v2881_v20 = vrot.slane %v2879_v14, 4  ;;  %v1139_v60 = vld [vmem:[#allocation2 + $0x90] sm:$0xf] }
 0x15a   : > { %v2212_v35 = vunpack.c.l.b16 %v2149_v15  ;;  %v2213_v31 = vunpack.c.l.b16 %v2152_v25  ;;  %v1446_v36 = vrot.slane %v1445_v13, 4  ;;  %v3190_v38 = vunpack.c.l.b16 %v2854_v56  ;;  %v6231_v40 = vld [vmem:[#allocation2 + $0x90] sm:$0xff] }
 0x15b   : > { %v2155_v16 = vrot.slane %v1140_v43, 5  ;;  %v1456_v53 = vrot.slane %v1455_v37, 4  ;;  %v1460_v54 = vrot.slane %v1458_v27, 5  ;;  %v2868_v5 = vrot.slane %v2866_v28, 4  ;;  %v2758_v27 = vld [vmem:[#allocation2 + $0x40] sm:$0xf] }
 0x15c   : > { %v7190_v4 = vpop.f32.mrf.mxu3  ;;  %v7194_v11 = vpop.f32.mrf.mxu0  ;;  %v3220_v61 = vpack.c.b16 %v3191_v2, %v3190_v38  ;;  %v2871_v39 = vrot.slane %v2869_v17, 5  ;;  %v2882_v63 = vor.u32 %v2881_v20, %v7206_v30  ;;  %v2233_v23 = vpack.c.b16 %v2213_v31, %v2212_v35 }
 0x15d   : > { %8653 = vst [vmem:[#allocation10_spill] sm:$0xff] %v7190_v4  ;;  %v1451_v52 = vsel %vm6611_vm14, %v1446_v36, %v1450_v8  ;;  %v2885_v9 = vshll.u32 %v2756_v47, 16  ;;  %v5725_v0 = vrot.slane %v2030_v57, 9  ;;  %v2157_v14 = vrot.slane %v2155_v16, 4 }
 0x15e   : > { %8654 = vst [vmem:[#allocation11_spill] sm:$0xff] %v7194_v11  ;;  %v2158_v18 = vrot.slane %v7213_v49, 5  ;;  %v1463_v13 = vshrl.u32 %v1139_v60, 16  ;;  %v1461_v22 = vsel %vm6611_vm14, %v1456_v53, %v1460_v54  ;;  %v1472_v15 = vshll.u32 %v1140_v43, 16 }
 0x15f   : > { %v1476_v25 = vshrl.u32 %v1140_v43, 16  ;;  %v2872_v8 = vor.u32 %v2871_v39, %v2868_v5  ;;  %v2883_v56 = vrot.slane %v2882_v63, 4  ;;  %v1589_v37 = vunpack.c.l.b16 %v1451_v52 }
 0x160   : > { %v7204_v10 = vpop.f32.mrf.mxu1  ;;  %v1590_v28 = vunpack.c.l.b16 %v1461_v22  ;;  %v2887_v17 = vrot.slane %v2885_v9, 5  ;;  %v2156_v20 = vsel %vm6591_vm11, %v5725_v0, %v2155_v16  ;;  %v2159_v33 = vsel %vm6591_vm11, %v2157_v14, %v2158_v18 }
 0x161   : > { %5611 = vmatmul.msk.bf16.gmra.mxu2 %vm1639_vm15, %v1609_v7  ;;  %v1466_v7 = vshll.u32 %v1139_v60, 16  ;;  %v1465_v31 = vrot.slane %v1463_v13, 4  ;;  %v1474_v38 = vrot.slane %v1472_v15, 5  ;;  %v1478_v43 = vrot.slane %v1476_v25, 4  ;;  %v2757_v60 = vld [vmem:[#allocation2 + $0x3c] sm:$0xf] }
 0x162   : > { %v2873_v47 = vrot.slane %v2872_v8, 4  ;;  %v2888_v53 = vsel %vm6611_vm14, %v2883_v56, %v2887_v17  ;;  %v2899_v54 = vshll.u32 %v2758_v27, 16  ;;  %v2903_v57 = vshrl.u32 %v2758_v27, 16  ;;  %v1141_v15 = vld [vmem:[#allocation2 + $0x9c] sm:$0xf] }
 0x163   : > { %v1468_v36 = vrot.slane %v1466_v7, 5  ;;  %v2214_v39 = vunpack.c.l.b16 %v2156_v20  ;;  %v2215_v63 = vunpack.c.l.b16 %v2159_v33  ;;  %v1479_v9 = vor.u32 %v1478_v43, %v1474_v38  ;;  %v6232_v33 = vld [vmem:[#allocation2 + $0x9c] sm:$0xff] }
 0x164   : > { %v7211_v41 = vpop.f32.mrf.mxu3  ;;  %v7216_v6 = vpop.f32.mrf.mxu0  ;;  %v2878_v16 = vsel %vm6611_vm14, %v2873_v47, %v7206_v30  ;;  %v2890_v0 = vshrl.u32 %v2757_v60, 16  ;;  %v2893_v14 = vshll.u32 %v2757_v60, 16  ;;  %v7243_v18 = vrot.slane %v2899_v54, 5  ;;  %v1142_v30 = vld [vmem:[#allocation2 + $0xa0] sm:$0xf] }
 0x165   : > { %8655 = vst [vmem:[#allocation12_spill] sm:$0xff] %v7211_v41  ;;  %v1469_v52 = vor.u32 %v1468_v36, %v1465_v31  ;;  %v2905_v13 = vrot.slane %v2903_v57, 4  ;;  %v3192_v7 = vunpack.c.l.b16 %v2878_v16  ;;  %v2234_v25 = vpack.c.b16 %v2215_v63, %v2214_v39  ;;  %v2031_v36 = vld [vmem:[#allocation2 + $0x9c] sm:$0xe]  ;;  %v1168_v39 = vld [vmem:[#allocation2 + $0xa4] sm:$0x1] }
 0x166   : > { %8656 = vst [vmem:[#allocation13_spill] sm:$0xff] %v7216_v6  ;;  %v1480_v56 = vrot.slane %v1479_v9, 4  ;;  %v2892_v17 = vrot.slane %v2890_v0, 4  ;;  %v1487_v43 = vshrl.u32 %v1141_v15, 16  ;;  %v1490_v47 = vshll.u32 %v1141_v15, 16 }
 0x167   : > { %5899 = vmatmul.msk.bf16.gmra.mxu1 %vm1639_vm15, %v3220_v61  ;;  %v1610_v61 = vpack.c.b16 %v1590_v28, %v1589_v37  ;;  %v1470_v8 = vrot.slane %v1469_v52, 4  ;;  %v2759_v28 = vld [vmem:[#allocation2 + $0x44] sm:$0x1]  ;;  %v2906_v20 = vor.u32 %v2905_v13, %v7243_v18  ;;  %v1500_v54 = vshrl.u32 %v1142_v30, 16 }
 0x168   : > { %5868 = vmatmul.msk.bf16.gmra.mxu0 %vm1639_vm15, %v6231_v40  ;;  %v1482_v40 = vshll.u32 %v7213_v49, 16  ;;  %v2895_v49 = vrot.slane %v2893_v14, 5  ;;  %v2162_v57 = vrot.slane %v1142_v30, 5  ;;  %v2909_v16 = vshll.u32 %v2759_v28, 16  ;;  %v2760_v28 = vld [vmem:[#allocation2 + $0x48] sm:$0xf] }
 0x169   : > { %5764 = vmatmul.msk.bf16.gmra.mxu3 %vm1639_vm15, %v2233_v23  ;;  %v7226_v2 = vpop.f32.mrf.mxu1  ;;  %v3193_v23 = vunpack.c.l.b16 %v2888_v53  ;;  %v1496_v53 = vshll.u32 %v1142_v30, 16  ;;  %v1475_v60 = vsel %vm6611_vm14, %v1470_v8, %v1474_v38  ;;  %v5726_v9 = vrot.slane %v2031_v36, 9 }
 0x16a   : > { %8657 = vst [vmem:[#allocation14_spill] sm:$0xff] %v7226_v2  ;;  %v1484_v37 = vrot.slane %v1482_v40, 5  ;;  %v2896_v63 = vor.u32 %v2895_v49, %v2892_v17  ;;  %v1489_v40 = vrot.slane %v1487_v43, 4  ;;  %v1492_v0 = vrot.slane %v1490_v47, 5 }
 0x16b   : > { %v3221_v27 = vpack.c.b16 %v3193_v23, %v3192_v7  ;;  %v2907_v23 = vrot.slane %v2906_v20, 4  ;;  %v7259_v14 = vrot.slane %v1496_v53, 5  ;;  %v1502_v13 = vrot.slane %v1500_v54, 4  ;;  %v2761_v7 = vld [vmem:[#allocation2 + $0x4c] sm:$0xf] }
 0x16c   : > { %v7232_v35 = vpop.f32.mrf.mxu3  ;;  %v7239_v5 = vpop.f32.mrf.mxu0  ;;  %v1591_v30 = vunpack.c.l.b16 %v1475_v60  ;;  %v2164_v15 = vrot.slane %v2162_v57, 4  ;;  %v2923_v17 = vshll.u32 %v2761_v7, 16  ;;  %v2927_v49 = vshrl.u32 %v2761_v7, 16 }
 0x16d   : > { %8658 = vst [vmem:[#allocation15_spill] sm:$0xff] %v7232_v35  ;;  %v1503_v36 = vor.u32 %v1502_v13, %v7259_v14  ;;  %v1506_v43 = vshll.u32 %v1168_v39, 16  ;;  %v2914_v60 = vshrl.u32 %v2760_v28, 16 }
 0x16e   : > { %8659 = vst [vmem:[#allocation16_spill] sm:$0xff] %v7239_v5 }
 0x16f   : > { %v1504_v13 = vrot.slane %v1503_v36, 4  ;;  %v1508_v7 = vrot.slane %v1506_v43, 5  ;;  %v6233_v43 = vld [vmem:[#allocation2 + $0xa8] sm:$0xff] }
 0x171   : > { %5612 = vmatmul.msk.bf16.gmra.mxu2 %vm1639_vm15, %v1610_v61  ;;  %v7245_v22 = vpop.f32.mrf.mxu1  ;;  %v1485_v61 = vsel %vm6611_vm14, %v1480_v56, %v1484_v37  ;;  %v2911_v56 = vrot.slane %v2909_v16, 5  ;;  %v2897_v37 = vrot.slane %v2896_v63, 4  ;;  %v1509_v36 = vsel %vm6611_vm14, %v1504_v13, %v1508_v7 }
 0x172   : > { %8660 = vst [vmem:[#allocation17_spill] sm:$0xff] %v7245_v22  ;;  %v1592_v38 = vunpack.c.l.b16 %v1485_v61  ;;  %v2917_v61 = vshll.u32 %v2760_v28, 16 }
 0x173   : > { %v2912_v20 = vsel %vm6611_vm14, %v2907_v23, %v2911_v56  ;;  %v7276_v23 = vrot.slane %v2923_v17, 5  ;;  %v1143_v56 = vld [vmem:[#allocation2 + $0xa8] sm:$0xf] }
 0x174   : > { %v7257_v52 = vpop.f32.mrf.mxu0  ;;  %v1611_v47 = vpack.c.b16 %v1592_v38, %v1591_v30  ;;  %v3195_v16 = vunpack.c.l.b16 %v2912_v20  ;;  %v2762_v30 = vld [vmem:[#allocation2 + $0x50] sm:$0x1] }
 0x175   : > { %v7248_v31 = vpop.f32.mrf.mxu3  ;;  %8662 = vst [vmem:[#allocation19_spill] sm:$0xff] %v7257_v52  ;;  %v2933_v17 = vshll.u32 %v2762_v30, 16 }
 0x176   : > { %8661 = vst [vmem:[#allocation18_spill] sm:$0xff] %v7248_v31 }
 0x177   : > { %5900 = vmatmul.msk.bf16.gmra.mxu1 %vm1639_vm15, %v3221_v27  ;;  %v2163_v27 = vsel %vm6591_vm11, %v5726_v9, %v2162_v57  ;;  %v2902_v57 = vsel %vm6611_vm14, %v2897_v37, %v7243_v18  ;;  %v2929_v9 = vrot.slane %v2927_v49, 4 }
 0x178   : > { %5869 = vmatmul.msk.bf16.gmra.mxu0 %vm1639_vm15, %v6232_v33  ;;  %v1493_v33 = vor.u32 %v1492_v0, %v1489_v40  ;;  %v2216_v63 = vunpack.c.l.b16 %v2163_v27  ;;  %v3194_v38 = vunpack.c.l.b16 %v2902_v57  ;;  %v2919_v27 = vrot.slane %v2917_v61, 5  ;;  %v2032_v57 = vld [vmem:[#allocation2 + $0xa8] sm:$0xe] }
 0x179   : > { %5765 = vmatmul.msk.bf16.gmra.mxu3 %vm1639_vm15, %v2234_v25  ;;  %v2165_v25 = vrot.slane %v1168_v39, 5  ;;  %v6208_v39 = vld [vmem:[%s8628_s3] sm:$0xff]  ;;  %v2930_v28 = vor.u32 %v2929_v9, %v7276_v23  ;;  %v1514_v61 = vshll.u32 %v1143_v56, 16  ;;  %v5727_v7 = vrot.slane %v2032_v57, 9 }
 0x17a   : > { %v1494_v0 = vrot.slane %v1493_v33, 4  ;;  %1936 = vmatpush.bf16.msrb.mxu2 %v6208_v39  ;;  %v3222_v37 = vpack.c.b16 %v3195_v16, %v3194_v38 }
 0x17b   : > { %v7261_v8 = vpop.f32.mrf.mxu1  ;;  %v2166_v54 = vsel %vm6591_vm11, %v2164_v15, %v2165_v25  ;;  %v2916_v15 = vrot.slane %v2914_v60, 4  ;;  %v1144_v25 = vld [vmem:[#allocation2 + $0xac] sm:$0xf]  ;;  %v1511_v60 = vshrl.u32 %v1143_v56, 16  ;;  %v1516_v26 = vrot.slane %v1514_v61, 5 }
 0x17c   : > { %8663 = vst [vmem:[#allocation20_spill] sm:$0xff] %v7261_v8  ;;  %v2217_v40 = vunpack.c.l.b16 %v2166_v54  ;;  %v7281_v18 = vpop.f32.mrf.mxu0  ;;  %v1499_v33 = vsel %vm6611_vm14, %v1494_v0, %v7259_v14  ;;  %v2169_v54 = vrot.slane %v1144_v25, 5  ;;  %v1520_v16 = vshll.u32 %v1144_v25, 16 }
 0x17d   : > { %v7268_v53 = vpop.f32.mrf.mxu3  ;;  %8665 = vst [vmem:[#allocation22_spill] sm:$0xff] %v7281_v18  ;;  %v1524_v9 = vshrl.u32 %v1144_v25, 16  ;;  %v1594_v14 = vunpack.c.l.b16 %v1509_v36  ;;  %v2920_v39 = vor.u32 %v2919_v27, %v2916_v15  ;;  %v2935_v0 = vrot.slane %v2933_v17, 5  ;;  %v2764_v25 = vld [vmem:[#allocation2 + $0x58] sm:$0xf] }
 0x17e   : > { %8664 = vst [vmem:[#allocation21_spill] sm:$0xff] %v7268_v53  ;;  %v2235_v20 = vpack.c.b16 %v2217_v40, %v2216_v63  ;;  %v2931_v40 = vrot.slane %v2930_v28, 4  ;;  %v1593_v13 = vunpack.c.l.b16 %v1499_v33  ;;  %v2171_v30 = vrot.slane %v2169_v54, 4  ;;  %v2763_v27 = vld [vmem:[#allocation2 + $0x54] sm:$0xf] }
 0x17f   : > { %v7296_v21 = vrot.slane %v1520_v16, 5  ;;  %v1526_v56 = vrot.slane %v1524_v9, 4  ;;  %v2921_v18 = vrot.slane %v2920_v39, 4  ;;  %v2170_v15 = vsel %vm6591_vm11, %v5727_v7, %v2169_v54 }
 0x180   : > { %v1612_v36 = vpack.c.b16 %v1594_v14, %v1593_v13  ;;  %v2947_v28 = vshll.u32 %v2764_v25, 16  ;;  %v2951_v17 = vshrl.u32 %v2764_v25, 16  ;;  %v2938_v39 = vshrl.u32 %v2763_v27, 16  ;;  %v6267_v25 = vld [vmem:[%s8628_s3 + $0xd8] sm:$0xff] }
 0x181   : > { %5613 = vmatmul.msk.bf16.gmra.mxu2 %vm1639_vm15, %v1611_v47  ;;  %v1169_v47 = vld [vmem:[#allocation2 + $0xb0] sm:$0x1]  ;;  %v2926_v9 = vsel %vm6611_vm14, %v2921_v18, %v7276_v23  ;;  %v2765_v18 = vld [vmem:[#allocation2 + $0x5c] sm:$0x1]  ;;  %4051 = vmatpush.bf16.msra.mxu3 %v6267_v25 }
 0x182   : > { %v2172_v38 = vrot.slane %v1169_v47, 5  ;;  %v1530_v61 = vshll.u32 %v1169_v47, 16  ;;  %v7314_v7 = vrot.slane %v2947_v28, 5  ;;  %v3196_v47 = vunpack.c.l.b16 %v2926_v9 }
 0x183   : > { %v7284_v49 = vpop.f32.mrf.mxu1  ;;  %v2957_v14 = vshll.u32 %v2765_v18, 16  ;;  %v2033_v18 = vld [vmem:[#allocation2 + $0xb4] sm:$0xe] }
 0x184   : > { %8666 = vst [vmem:[#allocation23_spill] sm:$0xff] %v7284_v49  ;;  %v2173_v33 = vsel %vm6591_vm11, %v2171_v30, %v2172_v38  ;;  %v7316_v30 = vld [vmem:[#allocation2 + $0x18] sm:$0xf]  ;;  %v1532_v23 = vrot.slane %v1530_v61, 5  ;;  %v8671_v61 = vrot.slane %v7097_v46, 5 }
 0x185   : > { %v7294_v63 = vpop.f32.mrf.mxu3  ;;  %v2219_v13 = vunpack.c.l.b16 %v2173_v33  ;;  %v4217_v28 = vshrl.u32 %v7316_v30, 16 }
 0x186   : > { %8667 = vst [vmem:[#allocation24_spill] sm:$0xff] %v7294_v63  ;;  %v2959_v63 = vrot.slane %v2957_v14, 5  ;;  %v6271_v14 = vld [vmem:[%s8628_s3 + $0xf8] sm:$0xff] }
 0x187   : > { %5901 = vmatmul.msk.bf16.gmra.mxu1 %vm1639_vm15, %v3222_v37  ;;  %v1513_v37 = vrot.slane %v1511_v60, 4  ;;  %v1527_v60 = vor.u32 %v1526_v56, %v7296_v21  ;;  %4733 = vmatpush.bf16.msra.mxu0 %v6271_v14  ;;  %v7388_v14 = vld [vmem:[#allocation2 + $0x20] sm:$0x1] }
 0x188   : > { %5870 = vmatmul.msk.bf16.gmra.mxu0 %vm1639_vm15, %v6233_v43  ;;  %v7300_v43 = vpop.f32.mrf.mxu0 }
 0x189   : > { %5766 = vmatmul.msk.bf16.gmra.mxu3 %vm1639_vm15, %v2235_v20  ;;  %v2936_v20 = vsel %vm6611_vm14, %v2931_v40, %v2935_v0  ;;  %8668 = vst [vmem:[#allocation25_spill] sm:$0xff] %v7300_v43  ;;  %v1517_v57 = vor.u32 %v1516_v26, %v1513_v37  ;;  %v2941_v40 = vshll.u32 %v2763_v27, 16  ;;  %v2218_v0 = vunpack.c.l.b16 %v2170_v15  ;;  %v7323_v15 = vld [vmem:[#allocation2 + $0xb8] sm:$0xf]  ;;  %v1145_v27 = vld [vmem:[#allocation2 + $0xb4] sm:$0xf] }
 0x18a   : > { %v3197_v54 = vunpack.c.l.b16 %v2936_v20  ;;  %v2953_v26 = vrot.slane %v2951_v17, 4  ;;  %v1528_v56 = vrot.slane %v1527_v60, 4  ;;  %v7327_v60 = vld [vmem:[#allocation2 + $0x1c] sm:$0xf]  ;;  %v1535_v25 = vshrl.u32 %v1145_v27, 16 }
 0x18b   : > { %v1518_v37 = vrot.slane %v1517_v57, 4  ;;  %v2236_v17 = vpack.c.b16 %v2219_v13, %v2218_v0  ;;  %v2943_v33 = vrot.slane %v2941_v40, 5  ;;  %v6234_v57 = vld [vmem:[#allocation2 + $0xb4] sm:$0xff]  ;;  %v7341_v0 = vld [vmem:[#allocation2 + $0xbc] sm:$0x1]  ;;  %v2176_v13 = vrot.slane %v7323_v15, 5 }
 0x18c   : > { %v3223_v20 = vpack.c.b16 %v3197_v54, %v3196_v47  ;;  %v2954_v9 = vor.u32 %v2953_v26, %v7314_v7  ;;  %v1533_v40 = vsel %vm6611_vm14, %v1528_v56, %v1532_v23  ;;  %v6266_v26 = vld [vmem:[%s8628_s3 + $0xd0] sm:$0xff]  ;;  %v1548_v56 = vshrl.u32 %v7323_v15, 16 }
 0x18d   : > { %v7318_v38 = vpop.f32.mrf.mxu3  ;;  %v7353_v23 = vrot.slane %v4217_v28, 4  ;;  %v1596_v43 = vunpack.c.l.b16 %v1533_v40  ;;  %4052 = vmatpush.bf16.msra.mxu3 %v6266_v26  ;;  %v2178_v53 = vrot.slane %v2176_v13, 4  ;;  %v2179_v52 = vrot.slane %v7341_v0, 5  ;;  %v6265_v40 = vld [vmem:[%s8628_s3 + $0xc8] sm:$0xff] }
 0x18e   : > { %8670 = vst [vmem:[#allocation27_spill] sm:$0xff] %v7318_v38  ;;  %v7331_v38 = vrot.slane %v8671_v61, 4  ;;  %v4226_v61 = vshll.u32 %v7327_v60, 16  ;;  %v1537_v28 = vrot.slane %v1535_v25, 4 }
 0x190   : > { %v7334_v54 = vpop.f32.mrf.mxu0 }
 0x191   : > { %v7307_v16 = vpop.f32.mrf.mxu1  ;;  %5614 = vmatmul.msk.bf16.gmra.mxu2 %vm1639_vm15, %v1612_v36  ;;  %v2940_v36 = vrot.slane %v2938_v39, 4  ;;  %8672 = vst [vmem:[#allocation28_spill] sm:$0xff] %v7334_v54  ;;  %v1523_v39 = vsel %vm6611_vm14, %v1518_v37, %v7296_v21  ;;  %v1538_v21 = vshll.u32 %v1145_v27, 16  ;;  %v1544_v37 = vshll.u32 %v7323_v15, 16  ;;  %v2767_v15 = vld [vmem:[#allocation2 + $0x64] sm:$0xf]  ;;  %4053 = vmatpush.bf16.msra.mxu3 %v6265_v40 }
 0x192   : > { %8669 = vst [vmem:[#allocation26_spill] sm:$0xff] %v7307_v16  ;;  %v4230_v54 = vshrl.u32 %v7327_v60, 16  ;;  %v1595_v16 = vunpack.c.l.b16 %v1523_v39  ;;  %v5728_v27 = vrot.slane %v2033_v18, 9  ;;  %v7369_v39 = vrot.slane %v4226_v61, 5 }
 0x193   : > { %v1540_v49 = vrot.slane %v1538_v21, 5  ;;  %v7359_v31 = vrot.slane %v1544_v37, 5  ;;  %v2971_v21 = vshll.u32 %v2767_v15, 16  ;;  %v2975_v37 = vshrl.u32 %v2767_v15, 16 }
 0x194   : > { %v4232_v26 = vrot.slane %v4230_v54, 4  ;;  %v2177_v54 = vsel %vm6591_vm11, %v5728_v27, %v2176_v13  ;;  %v1554_v40 = vshll.u32 %v7341_v0, 16  ;;  %v7398_v0 = vld [vmem:[#allocation2 + $0x24] sm:$0xf] }
 0x195   : > { %v2977_v27 = vrot.slane %v2975_v37, 4 }
 0x196   : > { %v4233_v13 = vor.u32 %v4232_v26, %v7369_v39  ;;  %v1556_v26 = vrot.slane %v1554_v40, 5  ;;  %v6268_v40 = vld [vmem:[%s8628_s3 + $0xe0] sm:$0xff] }
 0x197   : > { %5902 = vmatmul.msk.bf16.gmra.mxu1 %vm1639_vm15, %v3223_v20  ;;  %v4220_v20 = vshll.u32 %v7316_v30, 16  ;;  %v1550_v30 = vrot.slane %v1548_v56, 4  ;;  %v6264_v56 = vld [vmem:[%s8628_s3 + $0xc0] sm:$0xff] }
 0x198   : > { %5871 = vmatmul.msk.bf16.gmra.mxu0 %vm1639_vm15, %v6234_v57  ;;  %v2766_v57 = vld [vmem:[#allocation2 + $0x60] sm:$0xf]  ;;  %4054 = vmatpush.bf16.msra.mxu3 %v6264_v56  ;;  %v4234_v56 = vrot.slane %v4233_v13, 4  ;;  %v4850_v13 = vld [vmem:[#allocation2 + $0x18] sm:$0xe] }
 0x199   : > { %v7347_v47 = vpop.f32.mrf.mxu1  ;;  %5767 = vmatmul.msk.bf16.gmra.mxu3 %vm1639_vm15, %v2236_v17  ;;  %v2955_v17 = vrot.slane %v2954_v9, 4  ;;  %v2965_v9 = vshll.u32 %v2766_v57, 16  ;;  %v1551_v15 = vor.u32 %v1550_v30, %v7359_v31  ;;  %v2768_v30 = vld [vmem:[#allocation2 + $0x68] sm:$0x1] }
 0x19a   : > { %8673 = vst [vmem:[#allocation29_spill] sm:$0xff] %v7347_v47  ;;  %v2944_v47 = vor.u32 %v2943_v33, %v2940_v36  ;;  %v7367_v36 = vpop.f32.mrf.mxu3  ;;  %v2962_v33 = vshrl.u32 %v2766_v57, 16  ;;  %v1613_v57 = vpack.c.b16 %v1596_v43, %v1595_v16  ;;  %v7393_v16 = vpop.f32.mrf.mxu0 }
 0x19b   : > { %8674 = vst [vmem:[#allocation30_spill] sm:$0xff] %v7367_v36  ;;  %v2960_v25 = vsel %vm6611_vm14, %v2955_v17, %v2959_v63  ;;  %v6270_v36 = vld [vmem:[%s8628_s3 + $0xf0] sm:$0xff]  ;;  %v4222_v63 = vrot.slane %v4220_v20, 5  ;;  %v1541_v17 = vor.u32 %v1540_v49, %v1537_v28  ;;  %v2220_v20 = vunpack.c.l.b16 %v2177_v54  ;;  %v6235_v54 = vld [vmem:[#allocation2 + $0xc0] sm:$0xff] }
 0x19c   : > { %v2945_v18 = vrot.slane %v2944_v47, 4  ;;  %v2180_v47 = vsel %vm6591_vm11, %v2178_v53, %v2179_v52  ;;  %v3199_v43 = vunpack.c.l.b16 %v2960_v25  ;;  %8676 = vst [vmem:[#allocation32_spill] sm:$0xff] %v7393_v16  ;;  %v2964_v52 = vrot.slane %v2962_v33, 4  ;;  %4734 = vmatpush.bf16.msra.mxu0 %v6270_v36 }
 0x19d   : > { %v2967_v53 = vrot.slane %v2965_v9, 5  ;;  %v7396_v49 = vrot.slane %v2971_v21, 5  ;;  %v4236_v25 = vshll.u32 %v7388_v14, 16  ;;  %v3496_v33 = vrot.slane %v7101_v44, 5  ;;  %v6269_v21 = vld [vmem:[%s8628_s3 + $0xe8] sm:$0xff] }
 0x19e   : > { %v2950_v61 = vsel %vm6611_vm14, %v2945_v18, %v7314_v7  ;;  %v2221_v7 = vunpack.c.l.b16 %v2180_v47  ;;  %v4223_v18 = vor.u32 %v4222_v63, %v7353_v23  ;;  %v1542_v9 = vrot.slane %v1541_v17, 4 }
 0x19f   : > { %v3198_v28 = vunpack.c.l.b16 %v2950_v61  ;;  %v2968_v36 = vor.u32 %v2967_v53, %v2964_v52  ;;  %v4241_v47 = vshrl.u32 %v7398_v0, 16  ;;  %v2978_v23 = vor.u32 %v2977_v27, %v7396_v49  ;;  %v4172_v27 = vld [vmem:[#allocation2 + $0x28] sm:$0xf] }
 0x1a0   : > { %v2237_v61 = vpack.c.b16 %v2221_v7, %v2220_v20  ;;  %v2981_v63 = vshll.u32 %v2768_v30, 16  ;;  %4735 = vmatpush.bf16.msra.mxu0 %v6269_v21  ;;  %v7411_v44 = vsel %vm6591_vm11, %v7331_v38, %v3496_v33  ;;  %v4238_v52 = vrot.slane %v4236_v25, 5 }
 0x1a1   : > { %v7390_v5 = vpop.f32.mrf.mxu1  ;;  %5615 = vmatmul.msk.bf16.gmra.mxu2 %vm1639_vm15, %v1613_v57  ;;  %v1552_v57 = vrot.slane %v1551_v15, 4  ;;  %v3224_v37 = vpack.c.b16 %v3199_v43, %v3198_v28  ;;  %v6247_v15 = vld [vmem:[%s8628_s3 + $0xb8] sm:$0xff]  ;;  %v7422_v43 = vrot.slane %v4223_v18, 4  ;;  %v1547_v38 = vsel %vm6611_vm14, %v1542_v9, %v7359_v31 }
 0x1a2   : > { %8675 = vst [vmem:[#allocation31_spill] sm:$0xff] %v7390_v5  ;;  %v7414_v17 = vpop.f32.mrf.mxu3  ;;  %3736 = vmatpush.bf16.msra.mxu2 %v6247_v15  ;;  %v4239_v7 = vsel %vm6611_vm14, %v4234_v56, %v4238_v52  ;;  %v7437_v28 = vrot.slane %v4241_v47, 4  ;;  %v2969_v31 = vrot.slane %v2968_v36, 4  ;;  %v2979_v18 = vrot.slane %v2978_v23, 4  ;;  %v7442_v9 = vpop.f32.mrf.mxu0  ;;  %v6275_v36 = vld [vmem:[%s8628_s3 + $0x118] sm:$0xff] }
 0x1a3   : > { %8677 = vst [vmem:[#allocation33_spill] sm:$0xff] %v7414_v17  ;;  %v1557_v53 = vsel %vm6611_vm14, %v1552_v57, %v1556_v26  ;;  %v4229_v20 = vsel %vm6611_vm14, %v7422_v43, %v7369_v39  ;;  %v2983_v25 = vrot.slane %v2981_v63, 5  ;;  %v4244_v33 = vshll.u32 %v7398_v0, 16  ;;  %v2770_v39 = vld [vmem:[#allocation2 + $0x70] sm:$0xf]  ;;  %5159 = vmatpush.bf16.msra.mxu1 %v6275_v36 }
 0x1a4   : > { %4736 = vmatpush.bf16.msra.mxu0 %v6268_v40  ;;  %8679 = vst [vmem:[#allocation35_spill] sm:$0xff] %v7442_v9  ;;  %v1597_v57 = vunpack.c.l.b16 %v1547_v38  ;;  %v1598_v26 = vunpack.c.l.b16 %v1557_v53  ;;  %v6113_v21 = vrot.slane %v4850_v13, 9  ;;  %v2974_v56 = vsel %vm6611_vm14, %v2969_v31, %v7396_v49  ;;  %v4851_v23 = vld [vmem:[#allocation2 + $0x24] sm:$0xe]  ;;  %v4173_v53 = vld [vmem:[#allocation2 + $0x2c] sm:$0x1] }
 0x1a5   : > { %v4610_v47 = vunpack.c.l.b16 %v4239_v7  ;;  %v4254_v0 = vshrl.u32 %v4172_v27, 16  ;;  %v4919_v40 = vrot.slane %v7388_v14, 5  ;;  %v4923_v43 = vrot.slane %v4172_v27, 5 }
 0x1a6   : > { %v2995_v49 = vshll.u32 %v2770_v39, 16  ;;  %v2999_v38 = vshrl.u32 %v2770_v39, 16  ;;  %v1614_v13 = vpack.c.b16 %v1598_v26, %v1597_v57  ;;  %v6114_v9 = vrot.slane %v4851_v23, 9  ;;  %v7467_v23 = vld [vmem:[#allocation2 + $0x34] sm:$0xf] }
 0x1a7   : > { %5903 = vmatmul.msk.bf16.gmra.mxu1 %vm1639_vm15, %v3224_v37  ;;  %v4916_v37 = vrot.slane %v7327_v60, 5  ;;  %v2984_v60 = vsel %vm6611_vm14, %v2979_v18, %v2983_v25  ;;  %v4925_v14 = vrot.slane %v4923_v43, 4  ;;  %v4256_v25 = vrot.slane %v4254_v0, 4 }
 0x1a8   : > { %5872 = vmatmul.msk.bf16.gmra.mxu0 %vm1639_vm15, %v6235_v54  ;;  %v2769_v54 = vld [vmem:[#allocation2 + $0x6c] sm:$0xf]  ;;  %v3201_v18 = vunpack.c.l.b16 %v2984_v60  ;;  %v4924_v39 = vsel %vm6591_vm11, %v6114_v9, %v4923_v43  ;;  %v4926_v57 = vrot.slane %v4173_v53, 5  ;;  %v7465_v26 = vrot.slane %v2995_v49, 5  ;;  %v4852_v43 = vld [vmem:[#allocation2 + $0x30] sm:$0xe] }
 0x1a9   : > { %5768 = vmatmul.msk.bf16.gmra.mxu3 %vm1639_vm15, %v2237_v61  ;;  %v7439_v30 = vpop.f32.mrf.mxu1  ;;  %v4250_v61 = vshll.u32 %v4172_v27, 16  ;;  %v4917_v63 = vsel %vm6591_vm11, %v6113_v21, %v4916_v37  ;;  %v4918_v15 = vrot.slane %v4916_v37, 4  ;;  %v2986_v52 = vshrl.u32 %v2769_v54, 16 }
 0x1aa   : > { %8678 = vst [vmem:[#allocation34_spill] sm:$0xff] %v7439_v30  ;;  %v2989_v7 = vshll.u32 %v2769_v54, 16  ;;  %v5035_v21 = vunpack.c.l.b16 %v4917_v63  ;;  %v3001_v54 = vrot.slane %v2999_v38, 4  ;;  %v4246_v36 = vrot.slane %v4244_v33, 5  ;;  %v2771_v33 = vld [vmem:[#allocation2 + $0x74] sm:$0x1] }
 0x1ab   : > { %v4920_v31 = vsel %vm6591_vm11, %v4918_v15, %v4919_v40  ;;  %v7458_v17 = vrot.slane %v4250_v61, 5  ;;  %v3200_v63 = vunpack.c.l.b16 %v2974_v56  ;;  %v2988_v15 = vrot.slane %v2986_v52, 4  ;;  %v6248_v56 = vld [vmem:[#allocation2 + $0x18] sm:$0xff] }
 0x1ac   : > { %v5036_v37 = vunpack.c.l.b16 %v4920_v31  ;;  %v7460_v27 = vpop.f32.mrf.mxu3  ;;  %v2991_v40 = vrot.slane %v2989_v7, 5  ;;  %v4609_v0 = vunpack.c.l.b16 %v4229_v20  ;;  %v5037_v31 = vunpack.c.l.b16 %v4924_v39 }
 0x1ad   : > { %8680 = vst [vmem:[#allocation36_spill] sm:$0xff] %v7460_v27  ;;  %v3225_v49 = vpack.c.b16 %v3201_v18, %v3200_v63  ;;  %v7475_v27 = vpop.f32.mrf.mxu0  ;;  %v4257_v38 = vor.u32 %v4256_v25, %v7458_v17  ;;  %v3002_v52 = vor.u32 %v3001_v54, %v7465_v26  ;;  %v4260_v39 = vshll.u32 %v4173_v53, 16  ;;  %v3427_v63 = vld [vmem:[#allocation2 + $0xc] sm:$0xe] }
 0x1ae   : > { %v7469_v61 = vpack.c.b16 %v5036_v37, %v5035_v21  ;;  %8682 = vst [vmem:[#allocation38_spill] sm:$0xff] %v7475_v27  ;;  %v4930_v21 = vrot.slane %v7467_v23, 5  ;;  %v4641_v7 = vpack.c.b16 %v4610_v47, %v4609_v0  ;;  %v4247_v37 = vor.u32 %v4246_v36, %v7437_v28  ;;  %v2772_v0 = vld [vmem:[#allocation2 + $0x78] sm:$0xf] }
 0x1af   : > { %v2992_v18 = vor.u32 %v2991_v40, %v2988_v15  ;;  %v3005_v25 = vshll.u32 %v2771_v33, 16  ;;  %v3003_v36 = vrot.slane %v3002_v52, 4  ;;  %v2773_v40 = vld [vmem:[#allocation2 + $0x7c] sm:$0xf]  ;;  %v3613_v33 = vunpack.c.l.b16 %v7411_v44 }
 0x1b0   : > { %v4932_v28 = vrot.slane %v4930_v21, 4  ;;  %v8685_v52 = vrot.slane %v7097_v46, 5 }
 0x1b1   : > { %5616 = vmatmul.msk.bf16.gmra.mxu2 %vm1639_vm15, %v1614_v13  ;;  %v4927_v13 = vsel %vm6591_vm11, %v4925_v14, %v4926_v57  ;;  %v7481_v14 = vld [vmem:[#allocation2 + $0x38] sm:$0x1]  ;;  %v6115_v57 = vrot.slane %v4852_v43, 9  ;;  %v2993_v53 = vrot.slane %v2992_v18, 4  ;;  %v4262_v43 = vrot.slane %v4260_v39, 5 }
 0x1b2   : > { %v5038_v9 = vunpack.c.l.b16 %v4927_v13  ;;  %v4258_v13 = vrot.slane %v4257_v38, 4  ;;  %v4933_v54 = vrot.slane %v7481_v14, 5  ;;  %v3013_v18 = vshll.u32 %v2772_v0, 16 }
 0x1b3   : > { %v4931_v47 = vsel %vm6591_vm11, %v6115_v57, %v4930_v21  ;;  %v6192_v57 = vld [vmem:[#allocation2] sm:$0xff] }
 0x1b4   : > { %v7473_v60 = vpop.f32.mrf.mxu1  ;;  %v7483_v20 = vpack.c.b16 %v5038_v9, %v5037_v31  ;;  %v4248_v31 = vrot.slane %v4247_v37, 4  ;;  %v5913_v9 = vrot.slane %v3427_v63, 9  ;;  %v7491_v15 = vpop.f32.mrf.mxu3  ;;  %v5039_v21 = vunpack.c.l.b16 %v4931_v47  ;;  %v7506_v47 = vld [vmem:[#allocation2 + $0x40] sm:$0xf] }
 0x1b5   : > { %8681 = vst [vmem:[#allocation37_spill] sm:$0xff] %v7473_v60  ;;  %v3010_v63 = vshrl.u32 %v2772_v0, 16  ;;  %v4263_v39 = vsel %vm6611_vm14, %v4258_v13, %v4262_v43  ;;  %v7510_v46 = vpop.f32.mrf.mxu0  ;;  %v4278_v13 = vshrl.u32 %v7467_v23, 16 }
 0x1b6   : > { %8683 = vst [vmem:[#allocation39_spill] sm:$0xff] %v7491_v15  ;;  %v3494_v37 = vsel %vm6591_vm11, %v5913_v9, %v8685_v52  ;;  %v4174_v15 = vld [vmem:[#allocation2 + $0x30] sm:$0xf]  ;;  %v4253_v0 = vsel %vm6611_vm14, %v4248_v31, %v7458_v17  ;;  %v4274_v9 = vshll.u32 %v7467_v23, 16  ;;  %v3015_v17 = vrot.slane %v3013_v18, 5 }
 0x1b7   : > { %5904 = vmatmul.msk.bf16.gmra.mxu1 %vm1639_vm15, %v3225_v49  ;;  %v4934_v49 = vsel %vm6591_vm11, %v4932_v28, %v4933_v54  ;;  %v3612_v28 = vunpack.c.l.b16 %v3494_v37  ;;  %v3019_v54 = vshll.u32 %v2773_v40, 16  ;;  %8686 = vst [vmem:[#allocation41_spill] sm:$0xff] %v7510_v46  ;;  %v3012_v37 = vrot.slane %v3010_v63, 4  ;;  %v4853_v31 = vld [vmem:[#allocation2 + $0x3c] sm:$0xe] }
 0x1b8   : > { %6097 = vmatmul.msk.bf16.vlgmr.msra.gmra.mxu0 %vm1639_vm15, %v4641_v7  ;;  %v5040_v7 = vunpack.c.l.b16 %v4934_v49  ;;  %v4937_v46 = vrot.slane %v7506_v47, 5  ;;  %v7526_v60 = vrot.slane %v4274_v9, 5 }
 0x1b9   : > { %6057 = vmatmul.msk.bf16.vlgmr.msra.gmra.mxu3 %vm1639_vm15, %v6248_v56  ;;  %v3007_v56 = vrot.slane %v3005_v25, 5  ;;  %v3023_v25 = vshrl.u32 %v2773_v40, 16  ;;  %v7517_v43 = vpack.c.b16 %v3613_v33, %v3612_v28  ;;  %v4612_v40 = vunpack.c.l.b16 %v4263_v39 }
 0x1ba   : > { %v7508_v49 = vpack.c.b16 %v5040_v7, %v5039_v21  ;;  %v4268_v21 = vshll.u32 %v4174_v15, 16  ;;  %v7522_v7 = vld [vmem:[#allocation2 + $0x44] sm:$0x1]  ;;  %v3021_v23 = vrot.slane %v3019_v54, 5  ;;  %v4611_v28 = vunpack.c.l.b16 %v4253_v0 }
 0x1bb   : > { %v3008_v44 = vsel %vm6611_vm14, %v3003_v36, %v3007_v56  ;;  %v2998_v36 = vsel %vm6611_vm14, %v2993_v53, %v7465_v26  ;;  %v4265_v56 = vshrl.u32 %v4174_v15, 16  ;;  %v3025_v33 = vrot.slane %v3023_v25, 4 }
 0x1bc   : > { %v7496_v38 = vpop.f32.mrf.mxu1  ;;  %v3203_v52 = vunpack.c.l.b16 %v3008_v44  ;;  %v3202_v27 = vunpack.c.l.b16 %v2998_v36  ;;  %v4280_v26 = vrot.slane %v4278_v13, 4  ;;  %v4939_v53 = vrot.slane %v4937_v46, 4  ;;  %v7533_v18 = vpop.f32.mrf.mxu3  ;;  %v6249_v36 = vld [vmem:[#allocation2 + $0x24] sm:$0xff] }
 0x1bd   : > { %8684 = vst [vmem:[#allocation40_spill] sm:$0xff] %v7496_v38  ;;  %v2774_v38 = vld [vmem:[#allocation2 + $0x80] sm:$0x1]  ;;  %v6116_v44 = vrot.slane %v4853_v31, 9  ;;  %v4940_v63 = vrot.slane %v7522_v7, 5  ;;  %v3016_v54 = vor.u32 %v3015_v17, %v3012_v37  ;;  %v4642_v25 = vpack.c.b16 %v4612_v40, %v4611_v28 }
 0x1be   : > { %8688 = vst [vmem:[#allocation43_spill] sm:$0xff] %v7533_v18  ;;  %v3226_v16 = vpack.c.b16 %v3203_v52, %v3202_v27  ;;  %v4270_v0 = vrot.slane %v4268_v21, 5  ;;  %v3026_v30 = vor.u32 %v3025_v33, %v3021_v23  ;;  %v3029_v9 = vshll.u32 %v2774_v38, 16  ;;  %v7543_v27 = vpop.f32.mrf.mxu0  ;;  %v2775_v21 = vld [vmem:[#allocation2 + $0x84] sm:$0xf] }
 0x1bf   : > { %v4938_v13 = vsel %vm6591_vm11, %v6116_v44, %v4937_v46  ;;  %v4941_v5 = vsel %vm6591_vm11, %v4939_v53, %v4940_v63  ;;  %8689 = vst [vmem:[#allocation44_spill] sm:$0xff] %v7543_v27  ;;  %v3017_v40 = vrot.slane %v3016_v54, 4  ;;  %v4284_v38 = vshll.u32 %v7481_v14, 16  ;;  %v2776_v31 = vld [vmem:[#allocation2 + $0x88] sm:$0xf] }
 0x1c0   : > { %v5041_v52 = vunpack.c.l.b16 %v4938_v13  ;;  %v5042_v37 = vunpack.c.l.b16 %v4941_v5  ;;  %v3027_v46 = vrot.slane %v3026_v30, 4  ;;  %v3031_v17 = vrot.slane %v3029_v9, 5  ;;  %v7556_v9 = vld [vmem:[#allocation2 + $0x4c] sm:$0xf] }
 0x1c1   : > { %5697 = vmatmul.msk.bf16.vlgmr.msrb.gmra.mxu2 %vm1639_vm15, %v6192_v57  ;;  %v4267_v57 = vrot.slane %v4265_v56, 4  ;;  %v4281_v56 = vor.u32 %v4280_v26, %v7526_v60  ;;  %v3034_v63 = vshrl.u32 %v2775_v21, 16  ;;  %v3022_v54 = vsel %vm6611_vm14, %v3017_v40, %v3021_v23 }
 0x1c2   : > { %v7546_v53 = vpack.c.b16 %v5042_v37, %v5041_v52  ;;  %v3043_v14 = vshll.u32 %v2776_v31, 16  ;;  %v4286_v5 = vrot.slane %v4284_v38, 5  ;;  %v3032_v30 = vsel %vm6611_vm14, %v3027_v46, %v3031_v17  ;;  %v7567_v17 = vld [vmem:[#allocation2 + $0x50] sm:$0x1] }
 0x1c3   : > { %v4271_v33 = vor.u32 %v4270_v0, %v4267_v57  ;;  %v4282_v28 = vrot.slane %v4281_v56, 4  ;;  %v6193_v56 = vld [vmem:[#allocation2 + $0xc] sm:$0xff]  ;;  %v4298_v37 = vshll.u32 %v7506_v47, 16  ;;  %v4302_v23 = vshrl.u32 %v7506_v47, 16 }
 0x1c4   : > { %v7528_v15 = vpop.f32.mrf.mxu1  ;;  %v7530_v39 = vpop.f32.mrf.mxu2  ;;  %v3204_v40 = vunpack.c.l.b16 %v3022_v54  ;;  %v3036_v38 = vrot.slane %v3034_v63, 4 }
 0x1c5   : > { %8687 = vst [vmem:[#allocation42_spill] sm:$0xff] %v7530_v39  ;;  %v4272_v57 = vrot.slane %v4271_v33, 4  ;;  %v7558_v13 = vpop.f32.mrf.mxu3  ;;  %v4287_v52 = vsel %vm6611_vm14, %v4282_v28, %v4286_v5  ;;  %v3205_v33 = vunpack.c.l.b16 %v3032_v30  ;;  %v4854_v28 = vld [vmem:[#allocation2 + $0x48] sm:$0xe]  ;;  %v2777_v5 = vld [vmem:[#allocation2 + $0x8c] sm:$0x1] }
 0x1c6   : > { %8691 = vst [vmem:[#allocation46_spill] sm:$0xff] %v7558_v13  ;;  %v3045_v13 = vrot.slane %v3043_v14, 5  ;;  %v7571_v54 = vpop.f32.mrf.mxu0  ;;  %v4304_v18 = vrot.slane %v4302_v23, 4 }
 0x1c7   : > { %5905 = vmatmul.msk.bf16.gmra.mxu1 %vm1639_vm15, %v3226_v16  ;;  %v4177_v16 = vld [vmem:[#allocation2 + $0x3c] sm:$0xf]  ;;  %v4277_v46 = vsel %vm6611_vm14, %v4272_v57, %v7526_v60  ;;  %8692 = vst [vmem:[#allocation47_spill] sm:$0xff] %v7571_v54  ;;  %v3227_v8 = vpack.c.b16 %v3205_v33, %v3204_v40  ;;  %v2778_v33 = vld [vmem:[#allocation2 + $0x90] sm:$0xf] }
 0x1c8   : > { %6098 = vmatmul.msk.bf16.gmra.mxu0 %vm1639_vm15, %v4642_v25  ;;  %v3037_v25 = vshll.u32 %v2775_v21, 16  ;;  %v4289_v0 = vshrl.u32 %v4177_v16, 16  ;;  %v4292_v21 = vshll.u32 %v4177_v16, 16  ;;  %v4944_v16 = vrot.slane %v7556_v9, 5  ;;  %v7617_v54 = vld [vmem:[#allocation2 + $0x5c] sm:$0x1] }
 0x1c9   : > { %6058 = vmatmul.msk.bf16.gmra.mxu3 %vm1639_vm15, %v6249_v36  ;;  %v3047_v36 = vshrl.u32 %v2776_v31, 16  ;;  %v4613_v63 = vunpack.c.l.b16 %v4277_v46 }
 0x1ca   : > { %v3039_v31 = vrot.slane %v3037_v25, 5  ;;  %v4291_v47 = vrot.slane %v4289_v0, 4  ;;  %v7573_v25 = vrot.slane %v4298_v37, 5  ;;  %v4946_v60 = vrot.slane %v4944_v16, 4  ;;  %v6250_v0 = vld [vmem:[#allocation2 + $0x30] sm:$0xff] }
 0x1cb   : > { %v3049_v27 = vrot.slane %v3047_v36, 4  ;;  %v4294_v14 = vrot.slane %v4292_v21, 5  ;;  %v6117_v36 = vrot.slane %v4854_v28, 9  ;;  %v4308_v21 = vshll.u32 %v7522_v7, 16 }
 0x1cc   : > { %v7548_v26 = vpop.f32.mrf.mxu1  ;;  %v7550_v44 = vpop.f32.mrf.mxu2  ;;  %v3040_v30 = vor.u32 %v3039_v31, %v3036_v38  ;;  %v4305_v46 = vor.u32 %v4304_v18, %v7573_v25  ;;  %v4322_v18 = vshll.u32 %v7556_v9, 16 }
 0x1cd   : > { %8690 = vst [vmem:[#allocation45_spill] sm:$0xff] %v7550_v44  ;;  %v4614_v44 = vunpack.c.l.b16 %v4287_v52  ;;  %v3050_v35 = vor.u32 %v3049_v27, %v3045_v13  ;;  %v3053_v52 = vshll.u32 %v2777_v5, 16  ;;  %v4945_v37 = vsel %vm6591_vm11, %v6117_v36, %v4944_v16  ;;  %v7589_v40 = vpop.f32.mrf.mxu3  ;;  %v2779_v5 = vld [vmem:[#allocation2 + $0x94] sm:$0xf] }
 0x1ce   : > { %v3041_v38 = vrot.slane %v3040_v30, 4  ;;  %v4295_v27 = vor.u32 %v4294_v14, %v4291_v47  ;;  %8694 = vst [vmem:[#allocation49_spill] sm:$0xff] %v7589_v40  ;;  %v5043_v28 = vunpack.c.l.b16 %v4945_v37  ;;  %v4326_v14 = vshrl.u32 %v7556_v9, 16 }
 0x1cf   : > { %v4643_v6 = vpack.c.b16 %v4614_v44, %v4613_v63  ;;  %v3051_v44 = vrot.slane %v3050_v35, 4  ;;  %v3055_v31 = vrot.slane %v3053_v52, 5  ;;  %v4306_v63 = vrot.slane %v4305_v46, 4 }
 0x1d0   : > { %v3058_v35 = vshrl.u32 %v2778_v33, 16  ;;  %v4296_v47 = vrot.slane %v4295_v27, 4  ;;  %v3067_v37 = vshll.u32 %v2779_v5, 16  ;;  %v7612_v27 = vrot.slane %v4322_v18, 5 }
 0x1d1   : > { %5698 = vmatmul.msk.bf16.gmra.mxu2 %vm1639_vm15, %v6193_v56  ;;  %v4947_v56 = vrot.slane %v7567_v17, 5  ;;  %v3056_v52 = vsel %vm6611_vm14, %v3051_v44, %v3055_v31  ;;  %v4328_v31 = vrot.slane %v4326_v14, 4 }
 0x1d2   : > { %v3060_v44 = vrot.slane %v3058_v35, 4 }
 0x1d3   : > { %v4948_v23 = vsel %vm6591_vm11, %v4946_v60, %v4947_v56  ;;  %v4180_v60 = vld [vmem:[#allocation2 + $0x48] sm:$0xf]  ;;  %v7601_v56 = vpop.f32.mrf.mxu0 }
 0x1d4   : > { %v7575_v57 = vpop.f32.mrf.mxu1  ;;  %v7577_v39 = vpop.f32.mrf.mxu2  ;;  %v5044_v16 = vunpack.c.l.b16 %v4948_v23  ;;  %8696 = vst [vmem:[#allocation51_spill] sm:$0xff] %v7601_v56  ;;  %v3071_v23 = vshrl.u32 %v2779_v5, 16  ;;  %v4313_v46 = vshrl.u32 %v4180_v60, 16  ;;  %v4316_v9 = vshll.u32 %v4180_v60, 16 }
 0x1d5   : > { %8693 = vst [vmem:[#allocation48_spill] sm:$0xff] %v7577_v39  ;;  %v3207_v56 = vunpack.c.l.b16 %v3056_v52 }
 0x1d6   : > { %v7592_v7 = vpack.c.b16 %v5044_v16, %v5043_v28  ;;  %v6194_v28 = vld [vmem:[#allocation2 + $0x18] sm:$0xff]  ;;  %v3073_v40 = vrot.slane %v3071_v23, 4  ;;  %v4315_v60 = vrot.slane %v4313_v46, 4  ;;  %v4318_v18 = vrot.slane %v4316_v9, 5 }
 0x1d7   : > { %5906 = vmatmul.msk.bf16.gmra.mxu1 %vm1639_vm15, %v3227_v8  ;;  %v4310_v8 = vrot.slane %v4308_v21, 5  ;;  %v7605_v21 = vld [vmem:[#allocation2 + $0x58] sm:$0xf]  ;;  %v4954_v23 = vrot.slane %v7617_v54, 5  ;;  %v6251_v9 = vld [vmem:[#allocation2 + $0x3c] sm:$0xff] }
 0x1d8   : > { %6099 = vmatmul.msk.bf16.gmra.mxu0 %vm1639_vm15, %v4643_v6  ;;  %v3046_v6 = vsel %vm6611_vm14, %v3041_v38, %v3045_v13  ;;  %v4301_v13 = vsel %vm6611_vm14, %v4296_v47, %v7573_v25  ;;  %v4951_v25 = vrot.slane %v7605_v21, 5  ;;  %v2780_v47 = vld [vmem:[#allocation2 + $0x98] sm:$0x1] }
 0x1d9   : > { %6059 = vmatmul.msk.bf16.gmra.mxu3 %vm1639_vm15, %v6250_v0  ;;  %v3061_v0 = vshll.u32 %v2778_v33, 16  ;;  %v4311_v38 = vsel %vm6611_vm14, %v4306_v63, %v4310_v8  ;;  %v3206_v16 = vunpack.c.l.b16 %v3046_v6  ;;  %v4855_v33 = vld [vmem:[#allocation2 + $0x54] sm:$0xe]  ;;  %v7620_v8 = vpop.f32.mrf.mxu3 }
 0x1da   : > { %v4616_v63 = vunpack.c.l.b16 %v4311_v38  ;;  %8697 = vst [vmem:[#allocation52_spill] sm:$0xff] %v7620_v8  ;;  %v6118_v6 = vrot.slane %v4855_v33, 9  ;;  %v4953_v35 = vrot.slane %v4951_v25, 4  ;;  %v3077_v38 = vshll.u32 %v2780_v47, 16 }
 0x1db   : > { %v3063_v5 = vrot.slane %v3061_v0, 5  ;;  %v3228_v52 = vpack.c.b16 %v3207_v56, %v3206_v16  ;;  %v4615_v0 = vunpack.c.l.b16 %v4301_v13  ;;  %v7633_v56 = vpop.f32.mrf.mxu0  ;;  %v6246_v13 = vld [vmem:[%s8628_s3 + $0xb0] sm:$0xff]  ;;  %v4319_v16 = vor.u32 %v4318_v18, %v4315_v60 }
 0x1dc   : > { %v7594_v36 = vpop.f32.mrf.mxu1  ;;  %v7596_v30 = vpop.f32.mrf.mxu2  ;;  %v4952_v46 = vsel %vm6591_vm11, %v6118_v6, %v4951_v25  ;;  %v4955_v8 = vsel %vm6591_vm11, %v4953_v35, %v4954_v23  ;;  %8700 = vst [vmem:[#allocation55_spill] sm:$0xff] %v7633_v56  ;;  %v3079_v47 = vrot.slane %v3077_v38, 5  ;;  %3737 = vmatpush.bf16.msra.mxu2 %v6246_v13  ;;  %v2781_v35 = vld [vmem:[#allocation2 + $0x9c] sm:$0xf]  ;;  %v6274_v18 = vld [vmem:[%s8628_s3 + $0x110] sm:$0xff] }
 0x1dd   : > { %8695 = vst [vmem:[#allocation50_spill] sm:$0xff] %v7596_v30  ;;  %v7615_v30 = vrot.slane %v3067_v37, 5  ;;  %v4329_v37 = vor.u32 %v4328_v31, %v7612_v27  ;;  %v3064_v39 = vor.u32 %v3063_v5, %v3060_v44  ;;  %v4644_v33 = vpack.c.b16 %v4616_v63, %v4615_v0  ;;  %v4183_v38 = vld [vmem:[#allocation2 + $0x54] sm:$0xf]  ;;  %5160 = vmatpush.bf16.msra.mxu1 %v6274_v18 }
 0x1de   : > { %v5045_v44 = vunpack.c.l.b16 %v4952_v46  ;;  %v5046_v31 = vunpack.c.l.b16 %v4955_v8  ;;  %v4320_v0 = vrot.slane %v4319_v16, 4 }
 0x1df   : > { %v3074_v22 = vor.u32 %v3073_v40, %v7615_v30  ;;  %v4332_v40 = vshll.u32 %v7567_v17, 16  ;;  %v3065_v5 = vrot.slane %v3064_v39, 4  ;;  %v4330_v63 = vrot.slane %v4329_v37, 4 }
 0x1e0   : > { %v7642_v6 = vpack.c.b16 %v5046_v31, %v5045_v44  ;;  %v4325_v8 = vsel %vm6611_vm14, %v4320_v0, %v7612_v27  ;;  %v4346_v44 = vshll.u32 %v7605_v21, 16  ;;  %v4350_v31 = vshrl.u32 %v7605_v21, 16  ;;  %v2783_v21 = vld [vmem:[#allocation2 + $0xa4] sm:$0x1] }
 0x1e1   : > { %5699 = vmatmul.msk.bf16.gmra.mxu2 %vm1639_vm15, %v6194_v28  ;;  %v3075_v25 = vrot.slane %v3074_v22, 4  ;;  %v4334_v23 = vrot.slane %v4332_v40, 5  ;;  %v3070_v22 = vsel %vm6611_vm14, %v3065_v5, %v7615_v30  ;;  %v7661_v46 = vpop.f32.mrf.mxu3  ;;  %v7663_v40 = vld [vmem:[#allocation2 + $0x64] sm:$0xf]  ;;  %v4617_v5 = vunpack.c.l.b16 %v4325_v8 }
 0x1e2   : > { %8703 = vst [vmem:[#allocation58_spill] sm:$0xff] %v7661_v46  ;;  %v6195_v30 = vld [vmem:[#allocation2 + $0x24] sm:$0xff]  ;;  %v4337_v27 = vshrl.u32 %v4183_v38, 16  ;;  %v3208_v0 = vunpack.c.l.b16 %v3070_v22  ;;  %v4958_v18 = vrot.slane %v7663_v40, 5  ;;  %v7673_v8 = vrot.slane %v4346_v44, 5 }
 0x1e3   : > { %v3080_v39 = vsel %vm6611_vm14, %v3075_v25, %v3079_v47  ;;  %v4335_v37 = vsel %vm6611_vm14, %v4330_v63, %v4334_v23  ;;  %v4340_v25 = vshll.u32 %v4183_v38, 16  ;;  %v4856_v47 = vld [vmem:[#allocation2 + $0x60] sm:$0xe]  ;;  %v7667_v63 = vpop.f32.mrf.mxu0  ;;  %v4352_v38 = vrot.slane %v4350_v31, 4 }
 0x1e4   : > { %v7622_v14 = vpop.f32.mrf.mxu1  ;;  %v7624_v28 = vpop.f32.mrf.mxu2  ;;  %8704 = vst [vmem:[#allocation59_spill] sm:$0xff] %v7667_v63  ;;  %v4618_v23 = vunpack.c.l.b16 %v4335_v37  ;;  %v4960_v41 = vrot.slane %v4958_v18, 4  ;;  %v4339_v22 = vrot.slane %v4337_v27, 4  ;;  %v3101_v44 = vshll.u32 %v2783_v21, 16 }
 0x1e5   : > { %8698 = vst [vmem:[#allocation53_spill] sm:$0xff] %v7622_v14  ;;  %v4342_v2 = vrot.slane %v4340_v25, 5 }
 0x1e6   : > { %8699 = vst [vmem:[#allocation54_spill] sm:$0xff] %v7624_v28  ;;  %v4645_v11 = vpack.c.b16 %v4618_v23, %v4617_v5 }
 0x1e7   : > { %5907 = vmatmul.msk.bf16.gmra.mxu1 %vm1639_vm15, %v3228_v52  ;;  %v2782_v52 = vld [vmem:[#allocation2 + $0xa0] sm:$0xf] }
 0x1e8   : > { %6100 = vmatmul.msk.bf16.gmra.mxu0 %vm1639_vm15, %v4644_v33  ;;  %v3085_v33 = vshll.u32 %v2781_v35, 16  ;;  %v3091_v13 = vshll.u32 %v2782_v52, 16  ;;  %v3095_v16 = vshrl.u32 %v2782_v52, 16  ;;  %v7670_v52 = vld [vmem:[#allocation2 + $0x68] sm:$0x1] }
 0x1e9   : > { %6060 = vmatmul.msk.bf16.gmra.mxu3 %vm1639_vm15, %v6251_v9  ;;  %v3082_v9 = vshrl.u32 %v2781_v35, 16  ;;  %v3209_v35 = vunpack.c.l.b16 %v3080_v39  ;;  %v4961_v39 = vrot.slane %v7670_v52, 5  ;;  %v7686_v27 = vpop.f32.mrf.mxu3 }
 0x1ea   : > { %v3087_v46 = vrot.slane %v3085_v33, 5  ;;  %v3093_v56 = vrot.slane %v3091_v13, 5  ;;  %v3097_v28 = vrot.slane %v3095_v16, 4  ;;  %v6252_v33 = vld [vmem:[#allocation2 + $0x48] sm:$0xff]  ;;  %8707 = vst [vmem:[#allocation62_spill] sm:$0xff] %v7686_v27 }
 0x1eb   : > { %v3229_v37 = vpack.c.b16 %v3209_v35, %v3208_v0  ;;  %v4962_v31 = vsel %vm6591_vm11, %v4960_v41, %v4961_v39  ;;  %v4343_v0 = vor.u32 %v4342_v2, %v4339_v22  ;;  %v3103_v35 = vrot.slane %v3101_v44, 5  ;;  %v2785_v41 = vld [vmem:[#allocation2 + $0xac] sm:$0xf] }
 0x1ec   : > { %v7644_v60 = vpop.f32.mrf.mxu1  ;;  %v7646_v17 = vpop.f32.mrf.mxu2  ;;  %v3098_v16 = vor.u32 %v3097_v28, %v3093_v56  ;;  %v5048_v25 = vunpack.c.l.b16 %v4962_v31  ;;  %v4356_v28 = vshll.u32 %v7617_v54, 16  ;;  %v4370_v2 = vshll.u32 %v7663_v40, 16 }
 0x1ed   : > { %8701 = vst [vmem:[#allocation56_spill] sm:$0xff] %v7644_v60  ;;  %v6119_v60 = vrot.slane %v4856_v47, 9  ;;  %v4353_v47 = vor.u32 %v4352_v38, %v7673_v8  ;;  %v4374_v54 = vshrl.u32 %v7663_v40, 16  ;;  %v3115_v22 = vshll.u32 %v2785_v41, 16 }
 0x1ee   : > { %8702 = vst [vmem:[#allocation57_spill] sm:$0xff] %v7646_v17  ;;  %v3084_v17 = vrot.slane %v3082_v9, 4 }
 0x1ef   : > { %v4959_v9 = vsel %vm6591_vm11, %v6119_v60, %v4958_v18  ;;  %v2784_v60 = vld [vmem:[#allocation2 + $0xa8] sm:$0xf]  ;;  %v7693_v18 = vpop.f32.mrf.mxu0  ;;  %v4354_v21 = vrot.slane %v4353_v47, 4  ;;  %v6196_v47 = vld [vmem:[#allocation2 + $0x30] sm:$0xff] }
 0x1f0   : > { %v3088_v13 = vor.u32 %v3087_v46, %v3084_v17  ;;  %v5047_v5 = vunpack.c.l.b16 %v4959_v9  ;;  %v3099_v46 = vrot.slane %v3098_v16, 4  ;;  %8708 = vst [vmem:[#allocation63_spill] sm:$0xff] %v7693_v18  ;;  %v4186_v9 = vld [vmem:[#allocation2 + $0x60] sm:$0xf]  ;;  %v4358_v16 = vrot.slane %v4356_v28, 5 }
 0x1f1   : > { %5700 = vmatmul.msk.bf16.gmra.mxu2 %vm1639_vm15, %v6195_v30  ;;  %v4364_v40 = vshll.u32 %v4186_v9, 16  ;;  %v4376_v28 = vrot.slane %v4374_v54, 4 }
 0x1f2   : > { %v3089_v17 = vrot.slane %v3088_v13, 4  ;;  %v7691_v23 = vpack.c.b16 %v5048_v25, %v5047_v5  ;;  %v4344_v13 = vrot.slane %v4343_v0, 4  ;;  %v3104_v31 = vsel %vm6611_vm14, %v3099_v46, %v3103_v35  ;;  %v2786_v46 = vld [vmem:[#allocation2 + $0xb0] sm:$0x1] }
 0x1f3   : > { %v4359_v25 = vsel %vm6611_vm14, %v4354_v21, %v4358_v16  ;;  %v7710_v0 = vrot.slane %v4370_v2, 5  ;;  %v3117_v35 = vrot.slane %v3115_v22, 5  ;;  %v4366_v2 = vrot.slane %v4364_v40, 5 }
 0x1f4   : > { %v7675_v63 = vpop.f32.mrf.mxu1  ;;  %v7677_v30 = vpop.f32.mrf.mxu2  ;;  %v3094_v44 = vsel %vm6611_vm14, %v3089_v17, %v3093_v56  ;;  %v4349_v5 = vsel %vm6611_vm14, %v4344_v13, %v7673_v8  ;;  %v3211_v17 = vunpack.c.l.b16 %v3104_v31  ;;  %v4620_v8 = vunpack.c.l.b16 %v4359_v25  ;;  %v7715_v13 = vld [vmem:[#allocation2 + $0x70] sm:$0xf] }
 0x1f5   : > { %8705 = vst [vmem:[#allocation60_spill] sm:$0xff] %v7675_v63  ;;  %v3210_v56 = vunpack.c.l.b16 %v3094_v44  ;;  %v4619_v21 = vunpack.c.l.b16 %v4349_v5  ;;  %v4377_v54 = vor.u32 %v4376_v28, %v7710_v0  ;;  %v4965_v25 = vrot.slane %v7715_v13, 5  ;;  %v7725_v5 = vld [vmem:[#allocation2 + $0x74] sm:$0x1] }
 0x1f6   : > { %8706 = vst [vmem:[#allocation61_spill] sm:$0xff] %v7677_v30  ;;  %v7713_v30 = vpop.f32.mrf.mxu3 }
 0x1f7   : > { %5908 = vmatmul.msk.bf16.gmra.mxu1 %vm1639_vm15, %v3229_v37  ;;  %v3109_v37 = vshll.u32 %v2784_v60, 16  ;;  %8711 = vst [vmem:[#allocation66_spill] sm:$0xff] %v7713_v30  ;;  %v7720_v44 = vpop.f32.mrf.mxu0  ;;  %v3230_v22 = vpack.c.b16 %v3211_v17, %v3210_v56  ;;  %v6253_v30 = vld [vmem:[#allocation2 + $0x54] sm:$0xff]  ;;  %v4646_v27 = vpack.c.b16 %v4620_v8, %v4619_v21  ;;  %v4378_v56 = vrot.slane %v4377_v54, 4 }
 0x1f8   : > { %6101 = vmatmul.msk.bf16.gmra.mxu0 %vm1639_vm15, %v4645_v11  ;;  %v3106_v11 = vshrl.u32 %v2784_v60, 16  ;;  %v4361_v60 = vshrl.u32 %v4186_v9, 16  ;;  %8713 = vst [vmem:[#allocation68_spill] sm:$0xff] %v7720_v44  ;;  %v4968_v8 = vrot.slane %v7725_v5, 5  ;;  %v2787_v21 = vld [vmem:[#allocation2 + $0xb4] sm:$0xf] }
 0x1f9   : > { %6061 = vmatmul.msk.bf16.gmra.mxu3 %vm1639_vm15, %v6252_v33  ;;  %v3119_v33 = vshrl.u32 %v2785_v41, 16  ;;  %v3111_v41 = vrot.slane %v3109_v37, 5  ;;  %v3125_v37 = vshll.u32 %v2786_v46, 16  ;;  %v4967_v46 = vrot.slane %v4965_v25, 4 }
 0x1fa   : > { %v4363_v16 = vrot.slane %v4361_v60, 4 }
 0x1fb   : > { %v3121_v18 = vrot.slane %v3119_v33, 4 }
 0x1fc   : > { %v7695_v38 = vpop.f32.mrf.mxu1  ;;  %v7697_v39 = vpop.f32.mrf.mxu2  ;;  %v4367_v28 = vor.u32 %v4366_v2, %v4363_v16 }
 0x1fd   : > { %8709 = vst [vmem:[#allocation64_spill] sm:$0xff] %v7695_v38  ;;  %v3122_v33 = vor.u32 %v3121_v18, %v3117_v35 }
 0x1fe   : > { %8710 = vst [vmem:[#allocation65_spill] sm:$0xff] %v7697_v39  ;;  %v3108_v39 = vrot.slane %v3106_v11, 4 }
 0x1ff   : > { %v3123_v18 = vrot.slane %v3122_v33, 4 }
 0x200   : > { %v3112_v11 = vor.u32 %v3111_v41, %v3108_v39  ;;  %v4380_v39 = vshll.u32 %v7670_v52, 16  ;;  %v3127_v41 = vrot.slane %v3125_v37, 5  ;;  %v4969_v52 = vsel %vm6591_vm11, %v4967_v46, %v4968_v8 }
 0x201   : > { %5701 = vmatmul.msk.bf16.gmra.mxu2 %vm1639_vm15, %v6196_v47  ;;  %v4857_v47 = vld [vmem:[#allocation2 + $0x6c] sm:$0xe]  ;;  %v5050_v37 = vunpack.c.l.b16 %v4969_v52 }
 0x202   : > { %v6120_v60 = vrot.slane %v4857_v47, 9  ;;  %v3113_v40 = vrot.slane %v3112_v11, 4  ;;  %v3128_v54 = vsel %vm6611_vm14, %v3123_v18, %v3127_v41  ;;  %v3130_v47 = vshrl.u32 %v2787_v21, 16 }
 0x203   : > { %v3213_v18 = vunpack.c.l.b16 %v3128_v54 }
 0x204   : > { %v7717_v9 = vpop.f32.mrf.mxu2  ;;  %v7722_v31 = vpop.f32.mrf.mxu1  ;;  %v4966_v17 = vsel %vm6591_vm11, %v6120_v60, %v4965_v25  ;;  %v3118_v2 = vsel %vm6611_vm14, %v3113_v40, %v3117_v35  ;;  %v4189_v25 = vld [vmem:[#allocation2 + $0x6c] sm:$0xf]  ;;  %v4394_v35 = vshll.u32 %v7715_v13, 16  ;;  %v4398_v40 = vshrl.u32 %v7715_v13, 16 }
 0x205   : > { %8712 = vst [vmem:[#allocation67_spill] sm:$0xff] %v7717_v9  ;;  %v4382_v9 = vrot.slane %v4380_v39, 5  ;;  %v5049_v16 = vunpack.c.l.b16 %v4966_v17  ;;  %v3133_v39 = vshll.u32 %v2787_v21, 16  ;;  %v6197_v17 = vld [vmem:[#allocation2 + $0x3c] sm:$0xff]  ;;  %v3132_v52 = vrot.slane %v3130_v47, 4 }
 0x206   : > { %8714 = vst [vmem:[#allocation69_spill] sm:$0xff] %v7722_v31  ;;  %v7758_v44 = vrot.slane %v4394_v35, 5  ;;  %v2791_v35 = vld [vmem:[#allocation2 + $0xc4] sm:$0xf] }
 0x207   : > { %5909 = vmatmul.msk.bf16.gmra.mxu1 %vm1639_vm15, %v3230_v22  ;;  %v2788_v22 = vld [vmem:[#allocation2 + $0xb8] sm:$0xf]  ;;  %v4383_v33 = vsel %vm6611_vm14, %v4378_v56, %v4382_v9  ;;  %v7746_v8 = vpack.c.b16 %v5050_v37, %v5049_v16  ;;  %v4385_v9 = vshrl.u32 %v4189_v25, 16  ;;  %v3212_v56 = vunpack.c.l.b16 %v3118_v2  ;;  %v6254_v2 = vld [vmem:[#allocation2 + $0x60] sm:$0xff] }
 0x208   : > { %6102 = vmatmul.msk.bf16.gmra.mxu0 %vm1639_vm15, %v4646_v27  ;;  %v4368_v27 = vrot.slane %v4367_v28, 4  ;;  %v3139_v60 = vshll.u32 %v2788_v22, 16  ;;  %v3143_v46 = vshrl.u32 %v2788_v22, 16  ;;  %v4622_v21 = vunpack.c.l.b16 %v4383_v33 }
 0x209   : > { %6062 = vmatmul.msk.bf16.gmra.mxu3 %vm1639_vm15, %v6253_v30  ;;  %v7736_v30 = vpop.f32.mrf.mxu3  ;;  %v4388_v22 = vshll.u32 %v4189_v25, 16  ;;  %v3135_v16 = vrot.slane %v3133_v39, 5  ;;  %v3231_v38 = vpack.c.b16 %v3213_v18, %v3212_v56  ;;  %v7773_v18 = vld [vmem:[#allocation2 + $0x7c] sm:$0xf] }
 0x20a   : > { %8715 = vst [vmem:[#allocation70_spill] sm:$0xff] %v7736_v30  ;;  %v4373_v41 = vsel %vm6611_vm14, %v4368_v27, %v7710_v0  ;;  %v3141_v37 = vrot.slane %v3139_v60, 5  ;;  %v2789_v30 = vld [vmem:[#allocation2 + $0xbc] sm:$0x1]  ;;  %v4387_v0 = vrot.slane %v4385_v9, 4 }
 0x20b   : > { %v4621_v31 = vunpack.c.l.b16 %v4373_v41  ;;  %v4390_v27 = vrot.slane %v4388_v22, 5  ;;  %v3136_v54 = vor.u32 %v3135_v16, %v3132_v52  ;;  %v3149_v25 = vshll.u32 %v2789_v30, 16  ;;  %v2790_v60 = vld [vmem:[#allocation2 + $0xc0] sm:$0xf]  ;;  %v4192_v9 = vld [vmem:[#allocation2 + $0x78] sm:$0xf] }
 0x20c   : > { %v7738_v11 = vpop.f32.mrf.mxu2  ;;  %v7750_v28 = vpop.f32.mrf.mxu1  ;;  %v4404_v41 = vshll.u32 %v7725_v5, 16  ;;  %v3157_v56 = vshll.u32 %v2790_v60, 16  ;;  %v3163_v22 = vshll.u32 %v2791_v35, 16  ;;  %v3167_v52 = vshrl.u32 %v2791_v35, 16  ;;  %v6273_v16 = vld [vmem:[%s8628_s3 + $0x108] sm:$0xff] }
 0x20d   : > { %8716 = vst [vmem:[#allocation71_spill] sm:$0xff] %v7738_v11  ;;  %v7748_v11 = vpop.f32.mrf.mxu0  ;;  %v4647_v47 = vpack.c.b16 %v4622_v21, %v4621_v31  ;;  %v3151_v31 = vrot.slane %v3149_v25, 5  ;;  %v4409_v5 = vshrl.u32 %v4192_v9, 16  ;;  %5161 = vmatpush.bf16.msra.mxu1 %v6273_v16  ;;  %v4418_v25 = vshll.u32 %v7773_v18, 16 }
 0x20e   : > { %8717 = vst [vmem:[#allocation72_spill] sm:$0xff] %v7748_v11  ;;  %v3145_v11 = vrot.slane %v3143_v46, 4  ;;  %v3159_v35 = vrot.slane %v3157_v56, 5 }
 0x20f   : > { %8718 = vst [vmem:[#allocation73_spill] sm:$0xff] %v7750_v28  ;;  %v4400_v28 = vrot.slane %v4398_v40, 4  ;;  %v4391_v40 = vor.u32 %v4390_v27, %v4387_v0  ;;  %v4406_v27 = vrot.slane %v4404_v41, 5  ;;  %v4420_v56 = vrot.slane %v4418_v25, 5 }
 0x210   : > { %v3146_v33 = vor.u32 %v3145_v11, %v3141_v37  ;;  %v3137_v11 = vrot.slane %v3136_v54, 4 }
 0x211   : > { %5702 = vmatmul.msk.bf16.gmra.mxu2 %vm1639_vm15, %v6197_v17  ;;  %v7762_v63 = vpop.f32.mrf.mxu3  ;;  %v4401_v39 = vor.u32 %v4400_v28, %v7758_v44  ;;  %v4392_v0 = vrot.slane %v4391_v40, 4 }
 0x212   : > { %8720 = vst [vmem:[#allocation75_spill] sm:$0xff] %v7762_v63  ;;  %v3147_v30 = vrot.slane %v3146_v33, 4  ;;  %v3142_v54 = vsel %vm6611_vm14, %v3137_v11, %v3141_v37 }
 0x213   : > { %v4402_v28 = vrot.slane %v4401_v39, 4  ;;  %v6198_v39 = vld [vmem:[#allocation2 + $0x48] sm:$0xff]  ;;  %v4397_v37 = vsel %vm6611_vm14, %v4392_v0, %v7758_v44  ;;  %v3214_v11 = vunpack.c.l.b16 %v3142_v54  ;;  %v6272_v0 = vld [vmem:[%s8628_s3 + $0x100] sm:$0xff] }
 0x214   : > { %v7760_v13 = vpop.f32.mrf.mxu2  ;;  %v7770_v17 = vpop.f32.mrf.mxu1  ;;  %v3152_v33 = vsel %vm6611_vm14, %v3147_v30, %v3151_v31  ;;  %v4411_v31 = vrot.slane %v4409_v5, 4  ;;  %v4623_v44 = vunpack.c.l.b16 %v4397_v37  ;;  %v6245_v5 = vld [vmem:[%s8628_s3 + $0xa8] sm:$0xff]  ;;  %5162 = vmatpush.bf16.msra.mxu1 %v6272_v0 }
 0x215   : > { %8719 = vst [vmem:[#allocation74_spill] sm:$0xff] %v7760_v13  ;;  %v7768_v46 = vpop.f32.mrf.mxu0  ;;  %v4407_v40 = vsel %vm6611_vm14, %v4402_v28, %v4406_v27  ;;  %v3169_v13 = vrot.slane %v3167_v52, 4  ;;  %v3215_v30 = vunpack.c.l.b16 %v3152_v33  ;;  %v4194_v52 = vld [vmem:[#allocation2 + $0x80] sm:$0x1]  ;;  %v6255_v33 = vld [vmem:[#allocation2 + $0x6c] sm:$0xff]  ;;  %3738 = vmatpush.bf16.msra.mxu2 %v6245_v5 }
 0x216   : > { %8721 = vst [vmem:[#allocation76_spill] sm:$0xff] %v7768_v46 }
 0x217   : > { %5910 = vmatmul.msk.bf16.gmra.mxu1 %vm1639_vm15, %v3231_v38  ;;  %8722 = vst [vmem:[#allocation77_spill] sm:$0xff] %v7770_v17  ;;  %v3154_v38 = vshrl.u32 %v2790_v60, 16 }
 0x218   : > { %6103 = vmatmul.msk.bf16.gmra.mxu0 %vm1639_vm15, %v4647_v47  ;;  %v4422_v47 = vshrl.u32 %v7773_v18, 16 }
 0x219   : > { %6063 = vmatmul.msk.bf16.gmra.mxu3 %vm1639_vm15, %v6254_v2  ;;  %v4412_v2 = vshll.u32 %v4192_v9, 16  ;;  %v3156_v60 = vrot.slane %v3154_v38, 4  ;;  %v7788_v41 = vpop.f32.mrf.mxu3  ;;  %v2792_v9 = vld [vmem:[#allocation2 + $0xc8] sm:$0x1]  ;;  %v4624_v38 = vunpack.c.l.b16 %v4407_v40  ;;  %v4858_v40 = vld [vmem:[#allocation2 + $0x78] sm:$0xe] }
 0x21a   : > { %8724 = vst [vmem:[#allocation79_spill] sm:$0xff] %v7788_v41  ;;  %v4424_v46 = vrot.slane %v4422_v47, 4  ;;  %v6121_v37 = vrot.slane %v4858_v40, 9 }
 0x21b   : > { %v4414_v16 = vrot.slane %v4412_v2, 5  ;;  %v3160_v27 = vor.u32 %v3159_v35, %v3156_v60  ;;  %v3232_v2 = vpack.c.b16 %v3215_v30, %v3214_v11  ;;  %v4648_v25 = vpack.c.b16 %v4624_v38, %v4623_v44 }
 0x21c   : > { %v7775_v21 = vpop.f32.mrf.mxu2  ;;  %v7796_v28 = vpop.f32.mrf.mxu1  ;;  %v4425_v47 = vor.u32 %v4424_v46, %v4420_v56  ;;  %v4972_v60 = vrot.slane %v7773_v18, 5  ;;  %v4975_v30 = vrot.slane %v4194_v52, 5 }
 0x21d   : > { %8723 = vst [vmem:[#allocation78_spill] sm:$0xff] %v7775_v21  ;;  %v3165_v21 = vrot.slane %v3163_v22, 5  ;;  %v7794_v63 = vpop.f32.mrf.mxu0  ;;  %v3173_v22 = vshll.u32 %v2792_v9, 16  ;;  %v4415_v54 = vor.u32 %v4414_v16, %v4411_v31 }
 0x21e   : > { %8725 = vst [vmem:[#allocation80_spill] sm:$0xff] %v7794_v63  ;;  %v4974_v11 = vrot.slane %v4972_v60, 4  ;;  %v4426_v46 = vrot.slane %v4425_v47, 4  ;;  %v4973_v18 = vsel %vm6591_vm11, %v6121_v37, %v4972_v60  ;;  %v6199_v37 = vld [vmem:[#allocation2 + $0x54] sm:$0xff] }
 0x21f   : > { %8726 = vst [vmem:[#allocation81_spill] sm:$0xff] %v7796_v28  ;;  %v3170_v17 = vor.u32 %v3169_v13, %v3165_v21  ;;  %v3161_v13 = vrot.slane %v3160_v27, 4  ;;  %v3175_v35 = vrot.slane %v3173_v22, 5  ;;  %v4416_v31 = vrot.slane %v4415_v54, 4  ;;  %v4195_v22 = vld [vmem:[#allocation2 + $0x84] sm:$0xf] }
 0x220   : > { %v4976_v27 = vsel %vm6591_vm11, %v4974_v11, %v4975_v30  ;;  %v5051_v44 = vunpack.c.l.b16 %v4973_v18  ;;  %v4433_v60 = vshrl.u32 %v4195_v22, 16  ;;  %v4436_v40 = vshll.u32 %v4195_v22, 16 }
 0x221   : > { %5703 = vmatmul.msk.bf16.gmra.mxu2 %vm1639_vm15, %v6198_v39  ;;  %v4428_v39 = vshll.u32 %v4194_v52, 16  ;;  %v3171_v9 = vrot.slane %v3170_v17, 4  ;;  %v7810_v16 = vpop.f32.mrf.mxu3  ;;  %v5052_v0 = vunpack.c.l.b16 %v4976_v27  ;;  %v3166_v5 = vsel %vm6611_vm14, %v3161_v13, %v3165_v21 }
 0x222   : > { %8728 = vst [vmem:[#allocation83_spill] sm:$0xff] %v7810_v16  ;;  %v4421_v47 = vsel %vm6611_vm14, %v4416_v31, %v4420_v56  ;;  %v3216_v21 = vunpack.c.l.b16 %v3166_v5  ;;  %v4435_v18 = vrot.slane %v4433_v60, 4  ;;  %v4438_v27 = vrot.slane %v4436_v40, 5  ;;  %v4859_v60 = vld [vmem:[#allocation2 + $0x84] sm:$0xe] }
 0x223   : > { %v4430_v38 = vrot.slane %v4428_v39, 5  ;;  %v3176_v52 = vsel %vm6611_vm14, %v3171_v9, %v3175_v35  ;;  %v4625_v9 = vunpack.c.l.b16 %v4421_v47  ;;  %v6122_v40 = vrot.slane %v4859_v60, 9  ;;  %v6200_v60 = vld [vmem:[#allocation2 + $0x60] sm:$0xff] }
 0x224   : > { %v7798_v41 = vpop.f32.mrf.mxu2  ;;  %v3217_v13 = vunpack.c.l.b16 %v3176_v52  ;;  %v4439_v5 = vor.u32 %v4438_v27, %v4435_v18  ;;  %v4203_v16 = vld [vmem:[#allocation2 + $0xa4] sm:$0x1] }
 0x225   : > { %8727 = vst [vmem:[#allocation82_spill] sm:$0xff] %v7798_v41  ;;  %v7822_v54 = vpop.f32.mrf.mxu0  ;;  %v4431_v39 = vsel %vm6611_vm14, %v4426_v46, %v4430_v38  ;;  %v4197_v46 = vld [vmem:[#allocation2 + $0x8c] sm:$0x1]  ;;  %v6256_v38 = vld [vmem:[#allocation2 + $0x78] sm:$0xff] }
 0x226   : > { %8730 = vst [vmem:[#allocation85_spill] sm:$0xff] %v7822_v54  ;;  %v4626_v30 = vunpack.c.l.b16 %v4431_v39  ;;  %v4452_v39 = vshll.u32 %v4197_v46, 16 }
 0x227   : > { %5911 = vmatmul.msk.bf16.gmra.mxu1 %vm1639_vm15, %v3232_v2  ;;  %v4196_v2 = vld [vmem:[#allocation2 + $0x88] sm:$0xf] }
 0x228   : > { %6104 = vmatmul.msk.bf16.gmra.mxu0 %vm1639_vm15, %v4648_v25  ;;  %v7826_v25 = vpack.c.b16 %v5052_v0, %v5051_v44  ;;  %v4442_v11 = vshll.u32 %v4196_v2, 16  ;;  %v4446_v35 = vshrl.u32 %v4196_v2, 16  ;;  %v3233_v44 = vpack.c.b16 %v3217_v13, %v3216_v21 }
 0x229   : > { %6064 = vmatmul.msk.bf16.gmra.mxu3 %vm1639_vm15, %v6255_v33  ;;  %v7824_v33 = vpop.f32.mrf.mxu1  ;;  %v7833_v56 = vpop.f32.mrf.mxu3  ;;  %v4649_v22 = vpack.c.b16 %v4626_v30, %v4625_v9  ;;  %v4979_v52 = vrot.slane %v4196_v2, 5  ;;  %v4982_v21 = vrot.slane %v4197_v46, 5  ;;  %v4440_v13 = vrot.slane %v4439_v5, 4  ;;  %v4198_v30 = vld [vmem:[#allocation2 + $0x90] sm:$0xf] }
 0x22a   : > { %8731 = vst [vmem:[#allocation86_spill] sm:$0xff] %v7824_v33  ;;  %v4444_v0 = vrot.slane %v4442_v11, 5  ;;  %v4454_v9 = vrot.slane %v4452_v39, 5  ;;  %v4457_v46 = vshrl.u32 %v4198_v30, 16  ;;  %v4460_v5 = vshll.u32 %v4198_v30, 16 }
 0x22b   : > { %8732 = vst [vmem:[#allocation87_spill] sm:$0xff] %v7833_v56  ;;  %v4980_v2 = vsel %vm6591_vm11, %v6122_v40, %v4979_v52  ;;  %v4860_v56 = vld [vmem:[#allocation2 + $0x90] sm:$0xe] }
 0x22c   : > { %v7816_v17 = vpop.f32.mrf.mxu2 }
 0x22d   : > { %8729 = vst [vmem:[#allocation84_spill] sm:$0xff] %v7816_v17  ;;  %v4448_v17 = vrot.slane %v4446_v35, 4  ;;  %v7837_v41 = vpop.f32.mrf.mxu0 }
 0x22e   : > { %8734 = vst [vmem:[#allocation89_spill] sm:$0xff] %v7837_v41 }
 0x22f   : > { %v4449_v47 = vor.u32 %v4448_v17, %v4444_v0  ;;  %v5053_v17 = vunpack.c.l.b16 %v4980_v2 }
 0x231   : > { %5704 = vmatmul.msk.bf16.gmra.mxu2 %vm1639_vm15, %v6199_v37  ;;  %v7839_v54 = vpop.f32.mrf.mxu1  ;;  %v4981_v37 = vrot.slane %v4979_v52, 4  ;;  %v4450_v35 = vrot.slane %v4449_v47, 4  ;;  %v4445_v52 = vsel %vm6611_vm14, %v4440_v13, %v4444_v0  ;;  %v4200_v0 = vld [vmem:[#allocation2 + $0x98] sm:$0x1]  ;;  %v6257_v13 = vld [vmem:[#allocation2 + $0x84] sm:$0xff] }
 0x232   : > { %8735 = vst [vmem:[#allocation90_spill] sm:$0xff] %v7839_v54  ;;  %v4627_v2 = vunpack.c.l.b16 %v4445_v52  ;;  %v4476_v41 = vshll.u32 %v4200_v0, 16  ;;  %v4989_v52 = vrot.slane %v4200_v0, 5 }
 0x233   : > { %v4983_v11 = vsel %vm6591_vm11, %v4981_v37, %v4982_v21  ;;  %v4455_v47 = vsel %vm6611_vm14, %v4450_v35, %v4454_v9 }
 0x234   : > { %v7835_v31 = vpop.f32.mrf.mxu2  ;;  %v5054_v18 = vunpack.c.l.b16 %v4983_v11  ;;  %v4628_v11 = vunpack.c.l.b16 %v4455_v47 }
 0x235   : > { %8733 = vst [vmem:[#allocation88_spill] sm:$0xff] %v7835_v31  ;;  %v7858_v37 = vpop.f32.mrf.mxu0 }
 0x236   : > { %8738 = vst [vmem:[#allocation93_spill] sm:$0xff] %v7858_v37 }
 0x237   : > { %5912 = vmatmul.msk.bf16.gmra.mxu1 %vm1639_vm15, %v3233_v44  ;;  %v4199_v44 = vld [vmem:[#allocation2 + $0x94] sm:$0xf] }
 0x238   : > { %6105 = vmatmul.msk.bf16.gmra.mxu0 %vm1639_vm15, %v4649_v22  ;;  %v7852_v22 = vpop.f32.mrf.mxu3  ;;  %v4466_v39 = vshll.u32 %v4199_v44, 16  ;;  %v4470_v40 = vshrl.u32 %v4199_v44, 16  ;;  %v4986_v9 = vrot.slane %v4199_v44, 5 }
 0x239   : > { %6065 = vmatmul.msk.bf16.gmra.mxu3 %vm1639_vm15, %v6256_v38  ;;  %v7850_v38 = vpack.c.b16 %v5054_v18, %v5053_v17  ;;  %8737 = vst [vmem:[#allocation92_spill] sm:$0xff] %v7852_v22  ;;  %v7860_v21 = vpop.f32.mrf.mxu1  ;;  %v4459_v17 = vrot.slane %v4457_v46, 4  ;;  %v4462_v18 = vrot.slane %v4460_v5, 5  ;;  %v4650_v22 = vpack.c.b16 %v4628_v11, %v4627_v2  ;;  %v4201_v11 = vld [vmem:[#allocation2 + $0x9c] sm:$0xf] }
 0x23a   : > { %8739 = vst [vmem:[#allocation94_spill] sm:$0xff] %v7860_v21  ;;  %v4468_v30 = vrot.slane %v4466_v39, 5  ;;  %v6123_v46 = vrot.slane %v4860_v56, 9  ;;  %v4988_v5 = vrot.slane %v4986_v9, 4  ;;  %v4478_v2 = vrot.slane %v4476_v41, 5 }
 0x23b   : > { %v4463_v35 = vor.u32 %v4462_v18, %v4459_v17  ;;  %v4202_v56 = vld [vmem:[#allocation2 + $0xa0] sm:$0xf] }
 0x23c   : > { %v7848_v27 = vpop.f32.mrf.mxu2  ;;  %v4987_v39 = vsel %vm6591_vm11, %v6123_v46, %v4986_v9  ;;  %v4990_v44 = vsel %vm6591_vm11, %v4988_v5, %v4989_v52  ;;  %v6201_v9 = vld [vmem:[#allocation2 + $0x6c] sm:$0xff]  ;;  %v4490_v52 = vshll.u32 %v4202_v56, 16 }
 0x23d   : > { %8736 = vst [vmem:[#allocation91_spill] sm:$0xff] %v7848_v27  ;;  %v4472_v27 = vrot.slane %v4470_v40, 4  ;;  %v4464_v47 = vrot.slane %v4463_v35, 4  ;;  %v5055_v17 = vunpack.c.l.b16 %v4987_v39  ;;  %v5056_v18 = vunpack.c.l.b16 %v4990_v44 }
 0x23e   : > { %v4484_v35 = vshll.u32 %v4201_v11, 16 }
 0x23f   : > { %v4473_v37 = vor.u32 %v4472_v27, %v4468_v30  ;;  %v7881_v0 = vpack.c.b16 %v5056_v18, %v5055_v17  ;;  %v4469_v46 = vsel %vm6611_vm14, %v4464_v47, %v4468_v30  ;;  %v4492_v18 = vrot.slane %v4490_v52, 5  ;;  %v6258_v47 = vld [vmem:[#allocation2 + $0x90] sm:$0xff] }
 0x240   : > { %v4629_v39 = vunpack.c.l.b16 %v4469_v46  ;;  %v4486_v17 = vrot.slane %v4484_v35, 5  ;;  %v4500_v46 = vshll.u32 %v4203_v16, 16  ;;  %v4996_v52 = vrot.slane %v4203_v16, 5 }
 0x241   : > { %5705 = vmatmul.msk.bf16.gmra.mxu2 %vm1639_vm15, %v6200_v60  ;;  %v7867_v60 = vpop.f32.mrf.mxu3  ;;  %v7877_v27 = vpop.f32.mrf.mxu1  ;;  %v4474_v40 = vrot.slane %v4473_v37, 4  ;;  %v4494_v37 = vshrl.u32 %v4202_v56, 16 }
 0x242   : > { %8740 = vst [vmem:[#allocation95_spill] sm:$0xff] %v7867_v60 }
 0x243   : > { %8742 = vst [vmem:[#allocation97_spill] sm:$0xff] %v7877_v27  ;;  %v4479_v5 = vsel %vm6611_vm14, %v4474_v40, %v4478_v2  ;;  %v4496_v60 = vrot.slane %v4494_v37, 4  ;;  %v4993_v27 = vrot.slane %v4202_v56, 5 }
 0x244   : > { %v7863_v31 = vpop.f32.mrf.mxu2  ;;  %v4630_v44 = vunpack.c.l.b16 %v4479_v5 }
 0x245   : > { %v4995_v5 = vrot.slane %v4993_v27, 4 }
 0x246   : > { %v4651_v40 = vpack.c.b16 %v4630_v44, %v4629_v39  ;;  %v4502_v39 = vrot.slane %v4500_v46, 5 }
 0x247   : > { %6153 = vmatmul.msk.bf16.vlgmr.msra.gmra.mxu1 %vm1639_vm15, %v7469_v61  ;;  %v7875_v61 = vpop.f32.mrf.mxu0 }
 0x248   : > { %6106 = vmatmul.msk.bf16.gmra.mxu0 %vm1639_vm15, %v4650_v22  ;;  %8741 = vst [vmem:[#allocation96_spill] sm:$0xff] %v7875_v61 }
 0x249   : > { %6066 = vmatmul.msk.bf16.gmra.mxu3 %vm1639_vm15, %v6257_v13  ;;  %v4481_v13 = vshrl.u32 %v4201_v11, 16  ;;  %v7888_v41 = vpop.f32.mrf.mxu3  ;;  %v7894_v30 = vpop.f32.mrf.mxu1 }
 0x24a   : > { %8743 = vst [vmem:[#allocation98_spill] sm:$0xff] %v7888_v41 }
 0x24b   : > { %v4483_v61 = vrot.slane %v4481_v13, 4  ;;  %8745 = vst [vmem:[#allocation100_spill] sm:$0xff] %v7894_v30  ;;  %v4861_v13 = vld [vmem:[#allocation2 + $0x9c] sm:$0xe] }
 0x24c   : > { %v7879_v22 = vpop.f32.mrf.mxu2  ;;  %v6124_v35 = vrot.slane %v4861_v13, 9 }
 0x24d   : > { %v4487_v2 = vor.u32 %v4486_v17, %v4483_v61  ;;  %v4997_v61 = vsel %vm6591_vm11, %v4995_v5, %v4996_v52 }
 0x24e   : > { %v5058_v44 = vunpack.c.l.b16 %v4997_v61 }
 0x24f   : > { %v7892_v63 = vpop.f32.mrf.mxu0  ;;  %v4488_v37 = vrot.slane %v4487_v2, 4 }
 0x250   : > { %8744 = vst [vmem:[#allocation99_spill] sm:$0xff] %v7892_v63  ;;  %v4994_v63 = vsel %vm6591_vm11, %v6124_v35, %v4993_v27  ;;  %v6202_v35 = vld [vmem:[#allocation2 + $0x78] sm:$0xff] }
 0x251   : > { %5706 = vmatmul.msk.bf16.gmra.mxu2 %vm1639_vm15, %v6201_v9  ;;  %v4497_v9 = vor.u32 %v4496_v60, %v4492_v18  ;;  %v5057_v60 = vunpack.c.l.b16 %v4994_v63  ;;  %v7904_v17 = vpop.f32.mrf.mxu3  ;;  %v7912_v27 = vpop.f32.mrf.mxu1 }
 0x252   : > { %8746 = vst [vmem:[#allocation101_spill] sm:$0xff] %v7904_v17 }
 0x253   : > { %v4498_v56 = vrot.slane %v4497_v9, 4  ;;  %v7908_v13 = vpack.c.b16 %v5058_v44, %v5057_v60  ;;  %8748 = vst [vmem:[#allocation103_spill] sm:$0xff] %v7912_v27  ;;  %v4493_v9 = vsel %vm6611_vm14, %v4488_v37, %v4492_v18  ;;  %v6244_v27 = vld [vmem:[%s8628_s3 + $0xa0] sm:$0xff]  ;;  %v4206_v18 = vld [vmem:[#allocation2 + $0xb0] sm:$0x1] }
 0x254   : > { %v7890_v11 = vpop.f32.mrf.mxu2  ;;  %v4631_v52 = vunpack.c.l.b16 %v4493_v9  ;;  %3739 = vmatpush.bf16.msra.mxu2 %v6244_v27  ;;  %v4862_v9 = vld [vmem:[#allocation2 + $0xa8] sm:$0xe] }
 0x255   : > { %v4503_v63 = vsel %vm6611_vm14, %v4498_v56, %v4502_v39  ;;  %v6259_v56 = vld [vmem:[#allocation2 + $0x9c] sm:$0xff] }
 0x256   : > { %v4632_v61 = vunpack.c.l.b16 %v4503_v63  ;;  %v6125_v63 = vrot.slane %v4862_v9, 9 }
 0x257   : > { %6154 = vmatmul.msk.bf16.gmra.mxu1 %vm1639_vm15, %v7483_v20  ;;  %v4204_v20 = vld [vmem:[#allocation2 + $0xa8] sm:$0xf]  ;;  %v7910_v41 = vpop.f32.mrf.mxu0 }
 0x258   : > { %6107 = vmatmul.msk.bf16.gmra.mxu0 %vm1639_vm15, %v4651_v40  ;;  %v4205_v40 = vld [vmem:[#allocation2 + $0xac] sm:$0xf]  ;;  %v4505_v16 = vshrl.u32 %v4204_v20, 16  ;;  %v4508_v2 = vshll.u32 %v4204_v20, 16  ;;  %8747 = vst [vmem:[#allocation102_spill] sm:$0xff] %v7910_v41  ;;  %v4652_v39 = vpack.c.b16 %v4632_v61, %v4631_v52 }
 0x259   : > { %6067 = vmatmul.msk.bf16.gmra.mxu3 %vm1639_vm15, %v6258_v47  ;;  %v4514_v46 = vshll.u32 %v4205_v40, 16  ;;  %v4518_v5 = vshrl.u32 %v4205_v40, 16  ;;  %v7924_v37 = vpop.f32.mrf.mxu3  ;;  %v7932_v54 = vpop.f32.mrf.mxu1  ;;  %v4207_v61 = vld [vmem:[#allocation2 + $0xb4] sm:$0xf] }
 0x25a   : > { %v4507_v60 = vrot.slane %v4505_v16, 4  ;;  %v4510_v44 = vrot.slane %v4508_v2, 5  ;;  %v4524_v2 = vshll.u32 %v4206_v18, 16  ;;  %8749 = vst [vmem:[#allocation104_spill] sm:$0xff] %v7932_v54  ;;  %v4529_v9 = vshrl.u32 %v4207_v61, 16  ;;  %v6203_v54 = vld [vmem:[#allocation2 + $0x84] sm:$0xff] }
 0x25b   : > { %v4516_v20 = vrot.slane %v4514_v46, 5  ;;  %v4520_v17 = vrot.slane %v4518_v5, 4  ;;  %v5003_v5 = vrot.slane %v4206_v18, 5  ;;  %v4532_v33 = vshll.u32 %v4207_v61, 16 }
 0x25c   : > { %v7906_v47 = vpop.f32.mrf.mxu2  ;;  %v4511_v30 = vor.u32 %v4510_v44, %v4507_v60  ;;  %v4526_v52 = vrot.slane %v4524_v2, 5 }
 0x25d   : > { %v4521_v16 = vor.u32 %v4520_v17, %v4516_v20 }
 0x25e   : > { %v4512_v27 = vrot.slane %v4511_v30, 4 }
 0x25f   : > { %v7930_v21 = vpop.f32.mrf.mxu0  ;;  %v4522_v17 = vrot.slane %v4521_v16, 4 }
 0x260   : > { %v4517_v30 = vsel %vm6611_vm14, %v4512_v27, %v4516_v20  ;;  %v4209_v27 = vld [vmem:[#allocation2 + $0xbc] sm:$0x1] }
 0x261   : > { %5707 = vmatmul.msk.bf16.gmra.mxu2 %vm1639_vm15, %v6202_v35  ;;  %v5000_v35 = vrot.slane %v4205_v40, 5  ;;  %v7946_v2 = vpop.f32.mrf.mxu3  ;;  %v7951_v61 = vpop.f32.mrf.mxu1 }
 0x262   : > { %8750 = vst [vmem:[#allocation105_spill] sm:$0xff] %v7951_v61 }
 0x263   : > { %v5002_v46 = vrot.slane %v5000_v35, 4  ;;  %v5001_v40 = vsel %vm6591_vm11, %v6125_v63, %v5000_v35  ;;  %v4527_v35 = vsel %vm6611_vm14, %v4522_v17, %v4526_v52  ;;  %v6260_v17 = vld [vmem:[#allocation2 + $0xa8] sm:$0xff] }
 0x264   : > { %v7919_v41 = vpop.f32.mrf.mxu2  ;;  %v5059_v60 = vunpack.c.l.b16 %v5001_v40  ;;  %v4531_v40 = vrot.slane %v4529_v9, 4  ;;  %v4863_v9 = vld [vmem:[#allocation2 + $0xb4] sm:$0xe] }
 0x267   : > { %6155 = vmatmul.msk.bf16.gmra.mxu1 %vm1639_vm15, %v7508_v49  ;;  %v5004_v49 = vsel %vm6591_vm11, %v5002_v46, %v5003_v5  ;;  %v4633_v46 = vunpack.c.l.b16 %v4517_v30  ;;  %v4634_v5 = vunpack.c.l.b16 %v4527_v35  ;;  %v4548_v30 = vshll.u32 %v4209_v27, 16 }
 0x268   : > { %6108 = vmatmul.msk.bf16.gmra.mxu0 %vm1639_vm15, %v4652_v39  ;;  %v5060_v44 = vunpack.c.l.b16 %v5004_v49  ;;  %v4208_v39 = vld [vmem:[#allocation2 + $0xb8] sm:$0xf]  ;;  %v4534_v49 = vrot.slane %v4532_v33, 5  ;;  %v6126_v33 = vrot.slane %v4863_v9, 9  ;;  %v6204_v9 = vld [vmem:[#allocation2 + $0x90] sm:$0xff] }
 0x269   : > { %6068 = vmatmul.msk.bf16.gmra.mxu3 %vm1639_vm15, %v6259_v56  ;;  %v4538_v63 = vshll.u32 %v4208_v39, 16  ;;  %v4542_v16 = vshrl.u32 %v4208_v39, 16  ;;  %v4653_v52 = vpack.c.b16 %v4634_v5, %v4633_v46  ;;  %v5007_v4 = vrot.slane %v4208_v39, 5 }
 0x26a   : > { %v7940_v18 = vpack.c.b16 %v5060_v44, %v5059_v60  ;;  %v7949_v60 = vpop.f32.mrf.mxu0  ;;  %v4535_v14 = vor.u32 %v4534_v49, %v4531_v40 }
 0x26b   : > { %v4540_v44 = vrot.slane %v4538_v63, 5  ;;  %v4544_v28 = vrot.slane %v4542_v16, 4  ;;  %v5009_v35 = vrot.slane %v5007_v4, 4  ;;  %v5010_v63 = vrot.slane %v4209_v27, 5  ;;  %v7959_v16 = vpop.f32.mrf.mxu3 }
 0x26c   : > { %v7938_v56 = vpop.f32.mrf.mxu2  ;;  %v4536_v61 = vrot.slane %v4535_v14, 4  ;;  %v5008_v46 = vsel %vm6591_vm11, %v6126_v33, %v5007_v4 }
 0x26d   : > { %v5011_v39 = vsel %vm6591_vm11, %v5009_v35, %v5010_v63  ;;  %v5061_v5 = vunpack.c.l.b16 %v5008_v46  ;;  %v6261_v63 = vld [vmem:[#allocation2 + $0xb4] sm:$0xff] }
 0x26e   : > { %v5062_v40 = vunpack.c.l.b16 %v5011_v39  ;;  %v4541_v14 = vsel %vm6611_vm14, %v4536_v61, %v4540_v44 }
 0x270   : > { %v7971_v27 = vpack.c.b16 %v5062_v40, %v5061_v5 }
 0x271   : > { %5708 = vmatmul.msk.bf16.gmra.mxu2 %vm1639_vm15, %v6203_v54  ;;  %v4545_v54 = vor.u32 %v4544_v28, %v4540_v44  ;;  %v4550_v28 = vrot.slane %v4548_v30, 5  ;;  %v4210_v44 = vld [vmem:[#allocation2 + $0xc0] sm:$0xf] }
 0x272   : > { %v4553_v40 = vshrl.u32 %v4210_v44, 16 }
 0x273   : > { %v7978_v33 = vpop.f32.mrf.mxu3 }
 0x274   : > { %v7953_v20 = vpop.f32.mrf.mxu2  ;;  %8754 = vst [vmem:[#allocation109_spill] sm:$0xff] %v7978_v33 }
 0x275   : > { %8751 = vst [vmem:[#allocation106_spill] sm:$0xff] %v7953_v20 }
 0x277   : > { %6156 = vmatmul.msk.bf16.gmra.mxu1 %vm1639_vm15, %v7546_v53  ;;  %v4546_v53 = vrot.slane %v4545_v54, 4  ;;  %v4635_v54 = vunpack.c.l.b16 %v4541_v14 }
 0x278   : > { %6109 = vmatmul.msk.bf16.gmra.mxu0 %vm1639_vm15, %v4653_v52  ;;  %v7969_v52 = vpop.f32.mrf.mxu1 }
 0x279   : > { %6069 = vmatmul.msk.bf16.gmra.mxu3 %vm1639_vm15, %v6260_v17  ;;  %v7967_v17 = vpop.f32.mrf.mxu0  ;;  %8753 = vst [vmem:[#allocation108_spill] sm:$0xff] %v7969_v52  ;;  %v4551_v4 = vsel %vm6611_vm14, %v4546_v53, %v4550_v28  ;;  %v7992_v53 = vld [vmem:[#allocation2 + $0xc4] sm:$0xf]  ;;  %v7994_v28 = vld [vmem:[#allocation2 + $0xc8] sm:$0x1] }
 0x27a   : > { %v4636_v30 = vunpack.c.l.b16 %v4551_v4  ;;  %v4562_v14 = vshll.u32 %v7992_v53, 16 }
 0x27b   : > { %v7997_v4 = vpop.f32.mrf.mxu3 }
 0x27c   : > { %v7965_v49 = vpop.f32.mrf.mxu2  ;;  %v4654_v46 = vpack.c.b16 %v4636_v30, %v4635_v54  ;;  %8759 = vst [vmem:[#allocation114_spill] sm:$0xff] %v7997_v4  ;;  %v4566_v54 = vshrl.u32 %v7992_v53, 16  ;;  %v6205_v30 = vld [vmem:[#allocation2 + $0x9c] sm:$0xff] }
 0x27d   : > { %8752 = vst [vmem:[#allocation107_spill] sm:$0xff] %v7965_v49 }
 0x27e   : > { %v4568_v52 = vrot.slane %v4566_v54, 4 }
 0x280   : > { %v7984_v5 = vpop.f32.mrf.mxu1 }
 0x281   : > { %5709 = vmatmul.msk.bf16.gmra.mxu2 %vm1639_vm15, %v6204_v9  ;;  %v7982_v39 = vpop.f32.mrf.mxu0  ;;  %8757 = vst [vmem:[#allocation112_spill] sm:$0xff] %v7984_v5  ;;  %v4556_v9 = vshll.u32 %v4210_v44, 16  ;;  %v4564_v5 = vrot.slane %v4562_v14, 5 }
 0x282   : > { %8756 = vst [vmem:[#allocation111_spill] sm:$0xff] %v7982_v39 }
 0x283   : > { %v4569_v49 = vor.u32 %v4568_v52, %v4564_v5 }
 0x284   : > { %v7980_v35 = vpop.f32.mrf.mxu2 }
 0x285   : > { %8755 = vst [vmem:[#allocation110_spill] sm:$0xff] %v7980_v35  ;;  %v4570_v29 = vrot.slane %v4569_v49, 4 }
 0x287   : > { %6157 = vmatmul.msk.bf16.gmra.mxu1 %vm1639_vm15, %v7592_v7  ;;  %v4572_v7 = vshll.u32 %v7994_v28, 16 }
 0x288   : > { %6110 = vmatmul.msk.bf16.gmra.mxu0 %vm1639_vm15, %v4654_v46  ;;  %v4558_v46 = vrot.slane %v4556_v9, 5  ;;  %v8003_v35 = vpop.f32.mrf.mxu1 }
 0x289   : > { %6070 = vmatmul.msk.bf16.gmra.mxu3 %vm1639_vm15, %v6261_v63  ;;  %v4555_v63 = vrot.slane %v4553_v40, 4  ;;  %8760 = vst [vmem:[#allocation115_spill] sm:$0xff] %v8003_v35  ;;  %v4574_v20 = vrot.slane %v4572_v7, 5  ;;  %v6262_v40 = vld [vmem:[#allocation2 + $0xc0] sm:$0xff] }
 0x28b   : > { %v4559_v44 = vor.u32 %v4558_v46, %v4555_v63  ;;  %v4575_v9 = vsel %vm6611_vm14, %v4570_v29, %v4574_v20  ;;  %v6207_v63 = vld [vmem:[#allocation2 + $0xb4] sm:$0xff] }
 0x28c   : > { %v7990_v61 = vpop.f32.mrf.mxu2  ;;  %v4638_v54 = vunpack.c.l.b16 %v4575_v9  ;;  %v6328_v9 = vld [vmem:[#allocation2 + $0x1c] sm:$0xf] }
 0x28d   : > { %8758 = vst [vmem:[#allocation113_spill] sm:$0xff] %v7990_v61  ;;  %v8001_v61 = vpop.f32.mrf.mxu0  ;;  %v4560_v39 = vrot.slane %v4559_v44, 4 }
 0x28f   : > { %v4565_v33 = vsel %vm6611_vm14, %v4560_v39, %v4564_v5  ;;  %v6206_v5 = vld [vmem:[#allocation2 + $0xa8] sm:$0xff] }
 0x290   : > { %v4637_v14 = vunpack.c.l.b16 %v4565_v33  ;;  %v8019_v49 = vpop.f32.mrf.mxu1 }
 0x291   : > { %5710 = vmatmul.msk.bf16.gmra.mxu2 %vm1639_vm15, %v6205_v30  ;;  %v8014_v30 = vpop.f32.mrf.mxu3  ;;  %8761 = vst [vmem:[#allocation116_spill] sm:$0xff] %v8019_v49 }
 0x292   : > { %v4655_v52 = vpack.c.b16 %v4638_v54, %v4637_v14  ;;  %v3500_v14 = vrot.slane %v6328_v9, 5 }
 0x294   : > { %v8006_v4 = vpop.f32.mrf.mxu2 }
 0x295   : > { %v8017_v7 = vpop.f32.mrf.mxu0 }
 0x297   : > { %6158 = vmatmul.msk.bf16.gmra.mxu1 %vm1639_vm15, %v7642_v6 }
 0x298   : > { %6111 = vmatmul.msk.bf16.gmra.mxu0 %vm1639_vm15, %v4655_v52  ;;  %v8027_v6 = vpop.f32.mrf.mxu1  ;;  %v3502_v52 = vrot.slane %v3500_v14, 4 }
 0x299   : > { %6071 = vmatmul.msk.bf16.gmra.mxu3 %vm1639_vm15, %v6262_v40  ;;  %8762 = vst [vmem:[#allocation117_spill] sm:$0xff] %v8027_v6 }
 0x29c   : > { %v8022_v39 = vpop.f32.mrf.mxu2 }
 0x2a0   : > { %v8033_v33 = vpop.f32.mrf.mxu1 }
 0x2a1   : > { %5711 = vmatmul.msk.bf16.gmra.mxu2 %vm1639_vm15, %v6206_v5  ;;  %8763 = vst [vmem:[#allocation118_spill] sm:$0xff] %v8033_v33  ;;  %v3428_v5 = vld [vmem:[#allocation2 + $0x18] sm:$0xe] }
 0x2a4   : > { %v8025_v29 = vpop.f32.mrf.mxu2 }
 0x2a7   : > { %6159 = vmatmul.msk.bf16.gmra.mxu1 %vm1639_vm15, %v7691_v23 }
 0x2a8   : > { %v8040_v44 = vpop.f32.mrf.mxu1 }
 0x2a9   : > { %8765 = vst [vmem:[#allocation120_spill] sm:$0xff] %v8040_v44 }
 0x2ac   : > { %v8031_v20 = vpop.f32.mrf.mxu2 }
 0x2b0   : > { %v8046_v23 = vpop.f32.mrf.mxu1 }
 0x2b1   : > { %5712 = vmatmul.msk.bf16.gmra.mxu2 %vm1639_vm15, %v6207_v63  ;;  %8767 = vst [vmem:[#allocation122_spill] sm:$0xff] %v8046_v23  ;;  %v6329_v63 = vld [vmem:[#allocation2 + $0x20] sm:$0x1] }
 0x2b2   : > { %v3503_v33 = vrot.slane %v6329_v63, 5 }
 0x2b4   : > { %v8036_v46 = vpop.f32.mrf.mxu2  ;;  %v3504_v44 = vsel %vm6591_vm11, %v3502_v52, %v3503_v33  ;;  %v3510_v33 = vrot.slane %v6331_v3, 5 }
 0x2b5   : > { %8764 = vst [vmem:[#allocation119_spill] sm:$0xff] %v8036_v46  ;;  %v3615_v6 = vunpack.c.l.b16 %v3504_v44 }
 0x2b7   : > { %6160 = vmatmul.msk.bf16.gmra.mxu1 %vm1639_vm15, %v7746_v8  ;;  %v5914_v8 = vrot.slane %v3428_v5, 9  ;;  %v3429_v5 = vld [vmem:[#allocation2 + $0x24] sm:$0xe] }
 0x2b8   : > { %v8058_v23 = vpop.f32.mrf.mxu1  ;;  %v5915_v44 = vrot.slane %v3429_v5, 9  ;;  %v3430_v5 = vld [vmem:[#allocation2 + $0x30] sm:$0xe] }
 0x2b9   : > { %v3501_v9 = vsel %vm6591_vm11, %v5914_v8, %v3500_v14  ;;  %8770 = vst [vmem:[#allocation125_spill] sm:$0xff] %v8058_v23 }
 0x2ba   : > { %v3614_v49 = vunpack.c.l.b16 %v3501_v9  ;;  %v6332_v9 = vld [vmem:[#allocation2 + $0x34] sm:$0xf] }
 0x2bb   : > { %v3514_v23 = vrot.slane %v6332_v9, 5  ;;  %v6334_v9 = vld [vmem:[#allocation2 + $0x40] sm:$0xf] }
 0x2bc   : > { %v8042_v40 = vpop.f32.mrf.mxu2  ;;  %v3645_v35 = vpack.c.b16 %v3615_v6, %v3614_v49 }
 0x2bd   : > { %8766 = vst [vmem:[#allocation121_spill] sm:$0xff] %v8042_v40 }
 0x2c0   : > { %v8063_v52 = vpop.f32.mrf.mxu1 }
 0x2c1   : > { %5953 = vmatmul.msk.bf16.vlgmr.msra.gmra.mxu2 %vm1639_vm15, %v7517_v43  ;;  %8772 = vst [vmem:[#allocation127_spill] sm:$0xff] %v8063_v52 }
 0x2c4   : > { %v8048_v54 = vpop.f32.mrf.mxu2 }
 0x2c5   : > { %8768 = vst [vmem:[#allocation123_spill] sm:$0xff] %v8048_v54  ;;  %v6330_v54 = vld [vmem:[#allocation2 + $0x28] sm:$0xf] }
 0x2c6   : > { %v3507_v40 = vrot.slane %v6330_v54, 5 }
 0x2c7   : > { %6161 = vmatmul.msk.bf16.gmra.mxu1 %vm1639_vm15, %v7826_v25 }
 0x2c8   : > { %v3509_v25 = vrot.slane %v3507_v40, 4  ;;  %v3508_v49 = vsel %vm6591_vm11, %v5915_v44, %v3507_v40  ;;  %v8073_v3 = vpop.f32.mrf.mxu1  ;;  %v5916_v40 = vrot.slane %v3430_v5, 9 }
 0x2c9   : > { %v3616_v54 = vunpack.c.l.b16 %v3508_v49  ;;  %8774 = vst [vmem:[#allocation129_spill] sm:$0xff] %v8073_v3  ;;  %v3521_v3 = vrot.slane %v6334_v9, 5 }
 0x2ca   : > { %v3511_v14 = vsel %vm6591_vm11, %v3509_v25, %v3510_v33  ;;  %v3515_v44 = vsel %vm6591_vm11, %v5916_v40, %v3514_v23 }
 0x2cb   : > { %v3617_v6 = vunpack.c.l.b16 %v3511_v14 }
 0x2cc   : > { %v8056_v43 = vpop.f32.mrf.mxu2 }
 0x2cd   : > { %8769 = vst [vmem:[#allocation124_spill] sm:$0xff] %v8056_v43  ;;  %v3646_v8 = vpack.c.b16 %v3617_v6, %v3616_v54  ;;  %v3618_v54 = vunpack.c.l.b16 %v3515_v44  ;;  %v6341_v43 = vld [vmem:[#allocation2 + $0x68] sm:$0x1] }
 0x2d0   : > { %v8084_v14 = vpop.f32.mrf.mxu1 }
 0x2d1   : > { %5954 = vmatmul.msk.bf16.gmra.mxu2 %vm1639_vm15, %v3645_v35  ;;  %8776 = vst [vmem:[#allocation131_spill] sm:$0xff] %v8084_v14  ;;  %v6336_v14 = vld [vmem:[#allocation2 + $0x4c] sm:$0xf] }
 0x2d4   : > { %v8061_v63 = vpop.f32.mrf.mxu2 }
 0x2d5   : > { %8771 = vst [vmem:[#allocation126_spill] sm:$0xff] %v8061_v63  ;;  %v6333_v63 = vld [vmem:[#allocation2 + $0x38] sm:$0x1] }
 0x2d6   : > { %v3517_v25 = vrot.slane %v6333_v63, 5 }
 0x2d7   : > { %6162 = vmatmul.msk.bf16.gmra.mxu1 %vm1639_vm15, %v7850_v38  ;;  %v3516_v38 = vrot.slane %v3514_v23, 4 }
 0x2d8   : > { %v8091_v5 = vpop.f32.mrf.mxu1 }
 0x2d9   : > { %v3518_v33 = vsel %vm6591_vm11, %v3516_v38, %v3517_v25  ;;  %v3431_v38 = vld [vmem:[#allocation2 + $0x3c] sm:$0xe]  ;;  %v6335_v25 = vld [vmem:[#allocation2 + $0x44] sm:$0x1] }
 0x2da   : > { %v3619_v49 = vunpack.c.l.b16 %v3518_v33  ;;  %v5917_v23 = vrot.slane %v3431_v38, 9  ;;  %v3432_v38 = vld [vmem:[#allocation2 + $0x48] sm:$0xe] }
 0x2dc   : > { %v8071_v35 = vpop.f32.mrf.mxu2  ;;  %v3522_v33 = vsel %vm6591_vm11, %v5917_v23, %v3521_v3 }
 0x2dd   : > { %8773 = vst [vmem:[#allocation128_spill] sm:$0xff] %v8071_v35  ;;  %v5014_v35 = vrot.slane %v7992_v53, 5 }
 0x2e1   : > { %5955 = vmatmul.msk.bf16.gmra.mxu2 %vm1639_vm15, %v3646_v8  ;;  %v3647_v8 = vpack.c.b16 %v3619_v49, %v3618_v54  ;;  %v3620_v54 = vunpack.c.l.b16 %v3522_v33 }
 0x2e4   : > { %v8076_v52 = vpop.f32.mrf.mxu2 }
 0x2e5   : > { %8775 = vst [vmem:[#allocation130_spill] sm:$0xff] %v8076_v52  ;;  %v3524_v52 = vrot.slane %v6335_v25, 5 }
 0x2e7   : > { %6163 = vmatmul.msk.bf16.gmra.mxu1 %vm1639_vm15, %v7881_v0  ;;  %v3523_v0 = vrot.slane %v3521_v3, 4  ;;  %v5918_v3 = vrot.slane %v3432_v38, 9 }
 0x2e9   : > { %v3525_v40 = vsel %vm6591_vm11, %v3523_v0, %v3524_v52 }
 0x2ea   : > { %v3621_v44 = vunpack.c.l.b16 %v3525_v40 }
 0x2ec   : > { %v8086_v6 = vpop.f32.mrf.mxu2  ;;  %v3648_v9 = vpack.c.b16 %v3621_v44, %v3620_v54 }
 0x2ed   : > { %8777 = vst [vmem:[#allocation132_spill] sm:$0xff] %v8086_v6  ;;  %v6337_v6 = vld [vmem:[#allocation2 + $0x50] sm:$0x1] }
 0x2ee   : > { %v3531_v52 = vrot.slane %v6337_v6, 5 }
 0x2f1   : > { %5956 = vmatmul.msk.bf16.gmra.mxu2 %vm1639_vm15, %v3647_v8  ;;  %v8101_v8 = vpop.f32.mrf.mxu1 }
 0x2f4   : > { %v8089_v63 = vpop.f32.mrf.mxu2 }
 0x2f5   : > { %8778 = vst [vmem:[#allocation133_spill] sm:$0xff] %v8089_v63  ;;  %v3528_v63 = vrot.slane %v6336_v14, 5 }
 0x2f7   : > { %6164 = vmatmul.msk.bf16.gmra.mxu1 %vm1639_vm15, %v7908_v13  ;;  %v3530_v13 = vrot.slane %v3528_v63, 4  ;;  %v3529_v14 = vsel %vm6591_vm11, %v5918_v3, %v3528_v63  ;;  %v4864_v63 = vld [vmem:[#allocation2 + $0xc0] sm:$0xe] }
 0x2f8   : > { %v3622_v44 = vunpack.c.l.b16 %v3529_v14 }
 0x2f9   : > { %v3532_v0 = vsel %vm6591_vm11, %v3530_v13, %v3531_v52  ;;  %v8110_v23 = vpop.f32.mrf.mxu1  ;;  %v3433_v13 = vld [vmem:[#allocation2 + $0x54] sm:$0xe]  ;;  %v6339_v52 = vld [vmem:[#allocation2 + $0x5c] sm:$0x1] }
 0x2fa   : > { %v3623_v40 = vunpack.c.l.b16 %v3532_v0  ;;  %v5919_v3 = vrot.slane %v3433_v13, 9 }
 0x2fc   : > { %v8099_v49 = vpop.f32.mrf.mxu2  ;;  %v3649_v54 = vpack.c.b16 %v3623_v40, %v3622_v44  ;;  %v6127_v40 = vrot.slane %v4864_v63, 9  ;;  %v5016_v44 = vrot.slane %v5014_v35, 4 }
 0x2fd   : > { %8779 = vst [vmem:[#allocation134_spill] sm:$0xff] %v8099_v49  ;;  %v3538_v49 = vrot.slane %v6339_v52, 5 }
 0x301   : > { %5957 = vmatmul.msk.bf16.gmra.mxu2 %vm1639_vm15, %v3648_v9  ;;  %v6338_v9 = vld [vmem:[#allocation2 + $0x58] sm:$0xf]  ;;  %v8117_v6 = vpop.f32.mrf.mxu1 }
 0x304   : > { %v8104_v25 = vpop.f32.mrf.mxu2 }
 0x305   : > { %8780 = vst [vmem:[#allocation135_spill] sm:$0xff] %v8104_v25  ;;  %v3535_v25 = vrot.slane %v6338_v9, 5 }
 0x307   : > { %6165 = vmatmul.msk.bf16.gmra.mxu1 %vm1639_vm15, %v7940_v18  ;;  %v3537_v38 = vrot.slane %v3535_v25, 4  ;;  %v3536_v14 = vsel %vm6591_vm11, %v5919_v3, %v3535_v25 }
 0x308   : > { %v3624_v53 = vunpack.c.l.b16 %v3536_v14  ;;  %v3545_v14 = vrot.slane %v6341_v43, 5 }
 0x309   : > { %v3539_v0 = vsel %vm6591_vm11, %v3537_v38, %v3538_v49  ;;  %v8131_v52 = vpop.f32.mrf.mxu1  ;;  %v6340_v38 = vld [vmem:[#allocation2 + $0x64] sm:$0xf] }
 0x30a   : > { %v3625_v9 = vunpack.c.l.b16 %v3539_v0 }
 0x30c   : > { %v8114_v33 = vpop.f32.mrf.mxu2  ;;  %v3650_v49 = vpack.c.b16 %v3625_v9, %v3624_v53 }
 0x30d   : > { %8781 = vst [vmem:[#allocation136_spill] sm:$0xff] %v8114_v33  ;;  %v3542_v33 = vrot.slane %v6340_v38, 5 }
 0x30f   : > { %v3544_v3 = vrot.slane %v3542_v33, 4 }
 0x311   : > { %5958 = vmatmul.msk.bf16.gmra.mxu2 %vm1639_vm15, %v3649_v54  ;;  %v5017_v54 = vrot.slane %v7994_v28, 5  ;;  %v8140_v46 = vpop.f32.mrf.mxu1 }
 0x313   : > { %v5018_v13 = vsel %vm6591_vm11, %v5016_v44, %v5017_v54 }
 0x314   : > { %v8119_v18 = vpop.f32.mrf.mxu2  ;;  %v5064_v63 = vunpack.c.l.b16 %v5018_v13  ;;  %v6342_v13 = vld [vmem:[#allocation2 + $0x70] sm:$0xf] }
 0x315   : > { %8782 = vst [vmem:[#allocation137_spill] sm:$0xff] %v8119_v18 }
 0x317   : > { %6166 = vmatmul.msk.bf16.gmra.mxu1 %vm1639_vm15, %v7971_v27  ;;  %v5015_v27 = vsel %vm6591_vm11, %v6127_v40, %v5014_v35  ;;  %v3546_v40 = vsel %vm6591_vm11, %v3544_v3, %v3545_v14  ;;  %v1939_v3 = vadd.f32 %v7863_v31, %v7093_v19  ;;  %v3436_v19 = vld [vmem:[#allocation2 + $0x78] sm:$0xe]  ;;  %v6344_v31 = vld [vmem:[#allocation2 + $0x7c] sm:$0xf] }
 0x318   : > { %v5063_v25 = vunpack.c.l.b16 %v5015_v27  ;;  %v3627_v54 = vunpack.c.l.b16 %v3546_v40 }
 0x31a   : > { %v5081_v0 = vpack.c.b16 %v5064_v63, %v5063_v25  ;;  %v3435_v25 = vld [vmem:[#allocation2 + $0x6c] sm:$0xe] }
 0x31c   : > { %v8129_v18 = vpop.f32.mrf.mxu2 }
 0x31d   : > { %8783 = vst [vmem:[#allocation138_spill] sm:$0xff] %v8129_v18  ;;  %v3434_v18 = vld [vmem:[#allocation2 + $0x60] sm:$0xe] }
 0x31e   : > { %v5920_v35 = vrot.slane %v3434_v18, 9  ;;  %v6343_v18 = vld [vmem:[#allocation2 + $0x74] sm:$0x1] }
 0x31f   : > { %v3552_v63 = vrot.slane %v6343_v18, 5 }
 0x320   : > { %v3543_v44 = vsel %vm6591_vm11, %v5920_v35, %v3542_v33  ;;  %v2399_v35 = vadd.f32 %v7088_v55, %v1939_v3 }
 0x321   : > { %5959 = vmatmul.msk.bf16.gmra.mxu2 %vm1639_vm15, %v3650_v49  ;;  %v3626_v53 = vunpack.c.l.b16 %v3543_v44  ;;  %v3549_v49 = vrot.slane %v6342_v13, 5 }
 0x322   : > { %v2713_v13 = vadd.f32 %v7107_v45, %v2399_v35  ;;  %v8177_v35 = vpop.f32.mrf.mxu0 }
 0x323   : > { %v3651_v27 = vpack.c.b16 %v3627_v54, %v3626_v53  ;;  %v3551_v38 = vrot.slane %v3549_v49, 4  ;;  %v1941_v53 = vadd.f32 %v7879_v22, %v7124_v34  ;;  %v8167_v34 = vpop.f32.mrf.mxu3  ;;  %v1944_v22 = vadd.f32 %v7890_v11, %v7146_v12 }
 0x324   : > { %v8138_v28 = vpop.f32.mrf.mxu2  ;;  %v3395_v55 = vadd.f32 %v7528_v15, %v2713_v13 }
 0x325   : > { %v3553_v33 = vsel %vm6591_vm11, %v3551_v38, %v3552_v63  ;;  %v5922_v38 = vrot.slane %v3436_v19, 9  ;;  %v6345_v63 = vld [vmem:[#allocation2 + $0x80] sm:$0x1] }
 0x326   : > { %v3629_v40 = vunpack.c.l.b16 %v3553_v33  ;;  %v3559_v3 = vrot.slane %v6345_v63, 5 }
 0x327   : > { %6167 = vmatmul.msk.bf16.gmra.mxu1 %vm1639_vm15, %v5081_v0  ;;  %v5921_v0 = vrot.slane %v3435_v25, 9  ;;  %v3556_v25 = vrot.slane %v6344_v31, 5 }
 0x329   : > { %v3550_v14 = vsel %vm6591_vm11, %v5921_v0, %v3549_v49  ;;  %v2400_v49 = vadd.f32 %v7120_v42, %v1941_v53  ;;  %v3558_v18 = vrot.slane %v3556_v25, 4  ;;  %v3557_v45 = vsel %vm6591_vm11, %v5922_v38, %v3556_v25  ;;  %v8185_v53 = vpop.f32.mrf.mxu1  ;;  %v6346_v25 = vld [vmem:[#allocation2 + $0x88] sm:$0xf] }
 0x32a   : > { %v3628_v54 = vunpack.c.l.b16 %v3550_v14  ;;  %v3630_v12 = vunpack.c.l.b16 %v3557_v45  ;;  %v3563_v38 = vrot.slane %v6346_v25, 5 }
 0x32b   : > { %v2714_v42 = vadd.f32 %v7128_v1, %v2400_v49  ;;  %v3560_v15 = vsel %vm6591_vm11, %v3558_v18, %v3559_v3  ;;  %v1946_v49 = vadd.f32 %v7906_v47, %v7171_v48  ;;  %v8198_v63 = vpop.f32.mrf.mxu3 }
 0x32c   : > { %v8147_v9 = vpop.f32.mrf.mxu2  ;;  %v3631_v11 = vunpack.c.l.b16 %v3560_v15  ;;  %v3565_v45 = vrot.slane %v3563_v38, 4 }
 0x32d   : > { %v2402_v48 = vadd.f32 %v7158_v58, %v1946_v49  ;;  %v6348_v49 = vld [vmem:[#allocation2 + $0x94] sm:$0xf] }
 0x32e   : > { %v3653_v31 = vpack.c.b16 %v3631_v11, %v3630_v12  ;;  %v1949_v12 = vadd.f32 %v7919_v41, %v7188_v51 }
 0x331   : > { %5960 = vmatmul.msk.bf16.gmra.mxu2 %vm1639_vm15, %v3651_v27  ;;  %v3652_v27 = vpack.c.b16 %v3629_v40, %v3628_v54  ;;  %v8183_v54 = vld [vmem:[%s8629_s4] ss:$0 sm:$0xff] }
 0x334   : > { %v8150_v43 = vpop.f32.mrf.mxu2 }
 0x33c   : > { %v8159_v44 = vpop.f32.mrf.mxu2 }
 0x341   : > { %5961 = vmatmul.msk.bf16.gmra.mxu2 %vm1639_vm15, %v3652_v27  ;;  %v3396_v27 = vadd.f32 %v7548_v26, %v2714_v42 }
 0x344   : > { %v3741_v0 = vpop.f32.mrf.mxu2 }
 0x345   : > { %v3821_v33 = vadd.f32 %v3741_v0, %v3395_v55  ;;  %v8202_v0 = vpop.f32.mrf.mxu0 }
 0x347   : > { %v4136_v14 = vadd.f32 %v7924_v37, %v3821_v33  ;;  %v2401_v37 = vadd.f32 %v7142_v62, %v1944_v22  ;;  %v6347_v22 = vld [vmem:[#allocation2 + $0x8c] sm:$0x1] }
 0x349   : > { %v4818_v40 = vadd.f32 %v7930_v21, %v4136_v14  ;;  %v2715_v62 = vadd.f32 %v7148_v59, %v2401_v37  ;;  %v3566_v14 = vrot.slane %v6347_v22, 5 }
 0x34b   : > { %v5244_v1 = vadd.f32 %v8091_v5, %v4818_v40  ;;  %v3437_v5 = vld [vmem:[#allocation2 + $0x84] sm:$0xe]  ;;  %v3397_v47 = vadd.f32 %v7575_v57, %v2715_v62  ;;  %v3567_v58 = vsel %vm6591_vm11, %v3565_v45, %v3566_v14  ;;  %v2716_v57 = vadd.f32 %v7160_v32, %v2402_v48  ;;  %v8784_v62 = vld [vmem:[#allocation109_spill] sm:$0xff]  ;;  %v6349_v48 = vld [vmem:[#allocation2 + $0x98] sm:$0x1] }
 0x34c   : > { %v3743_v13 = vpop.f32.mrf.mxu2  ;;  %v5923_v33 = vrot.slane %v3437_v5, 9  ;;  %v8785_v5 = vld [vmem:[#allocation9_spill] sm:$0xff] }
 0x34d   : > { %v5280_v21 = vadd.f32 %v8183_v54, %v5244_v1  ;;  %v3822_v19 = vadd.f32 %v3743_v13, %v3396_v27  ;;  %v8223_v27 = vpop.f32.mrf.mxu3  ;;  %v3398_v51 = vadd.f32 %v7594_v36, %v2716_v57  ;;  %v8230_v41 = vpop.f32.mrf.mxu0 }
 0x34e   : > { %v3564_v40 = vsel %vm6591_vm11, %v5923_v33, %v3563_v38  ;;  %v8786_v33 = vld [vmem:[#allocation111_spill] sm:$0xff] }
 0x34f   : > { %v5312_v55 = vmax.f32 %v5280_v21, 0.0  ;;  %v4137_v18 = vadd.f32 %v7946_v2, %v3822_v19  ;;  %v8211_v2 = vpop.f32.mrf.mxu1  ;;  %v3632_v13 = vunpack.c.l.b16 %v3564_v40  ;;  %v3633_v21 = vunpack.c.l.b16 %v3567_v58 }
 0x350   : > { %v2403_v19 = vadd.f32 %v7176_v24, %v1949_v12  ;;  %v1951_v24 = vadd.f32 %v7938_v56, %v7204_v10  ;;  %v8788_v56 = vld [vmem:[#allocation53_spill] sm:$0xff] }
 0x351   : > { %v5344_v26 = vpack.c.bf16 %v5312_v55, %v5312_v55  ;;  %v4819_v3 = vadd.f32 %v7949_v60, %v4137_v18  ;;  %5962 = vmatmul.msk.bf16.gmra.mxu2 %vm1639_vm15, %v3653_v31  ;;  %v3570_v55 = vrot.slane %v6348_v49, 5 }
 0x352   : > { %v2717_v36 = vadd.f32 %v8785_v5, %v2403_v19 }
 0x353   : > { %5376 = vst.msk [vmem:[%s8205_s15] sm:$0xf] %vm524_vm3, %v5344_v26  ;;  %v5245_v59 = vadd.f32 %v8101_v8, %v4819_v3  ;;  %v3438_v26 = vld [vmem:[#allocation2 + $0x90] sm:$0xe]  ;;  %v3572_v14 = vrot.slane %v3570_v55, 4 }
 0x354   : > { %v3746_v60 = vpop.f32.mrf.mxu2  ;;  %v5924_v22 = vrot.slane %v3438_v26, 9 }
 0x355   : > { %v5281_v42 = vadd.f32 %v8183_v54, %v5245_v59  ;;  %v3823_v15 = vadd.f32 %v3746_v60, %v3397_v47  ;;  %v3573_v59 = vrot.slane %v6349_v48, 5  ;;  %v8787_v47 = vld [vmem:[#allocation10_spill] sm:$0xff] }
 0x356   : > { %v2404_v60 = vadd.f32 %v8787_v47, %v1951_v24  ;;  %v8793_v24 = vld [vmem:[#allocation12_spill] sm:$0xff] }
 0x357   : > { %v5313_v11 = vmax.f32 %v5281_v42, 0.0  ;;  %v4138_v8 = vadd.f32 %v7959_v16, %v3823_v15  ;;  %v8233_v38 = vpop.f32.mrf.mxu1  ;;  %v3399_v42 = vadd.f32 %v8788_v56, %v2717_v36  ;;  %v8246_v15 = vpop.f32.mrf.mxu3  ;;  %v3574_v57 = vsel %vm6591_vm11, %v3572_v14, %v3573_v59  ;;  %v8796_v14 = vld [vmem:[#allocation107_spill] sm:$0xff] }
 0x358   : > { %v3635_v49 = vunpack.c.l.b16 %v3574_v57  ;;  %v6351_v57 = vld [vmem:[#allocation2 + $0xa4] sm:$0x1] }
 0x359   : > { %v5345_v37 = vpack.c.bf16 %v5313_v11, %v5313_v11  ;;  %v4820_v1 = vadd.f32 %v7967_v17, %v4138_v8  ;;  %v3654_v17 = vpack.c.b16 %v3633_v21, %v3632_v13  ;;  %v8249_v11 = vpop.f32.mrf.mxu0  ;;  %v3571_v8 = vsel %vm6591_vm11, %v5924_v22, %v3570_v55  ;;  %v8791_v21 = vld [vmem:[#allocation114_spill] sm:$0xff] }
 0x35b   : > { %5377 = vst.msk [vmem:[%s8205_s15 + $0x4] sm:$0xf] %vm524_vm3, %v5345_v37  ;;  %v5246_v31 = vadd.f32 %v8110_v23, %v4820_v1  ;;  %v8789_v37 = vld [vmem:[#allocation14_spill] sm:$0xff] }
 0x35c   : > { %v3748_v16 = vpop.f32.mrf.mxu2  ;;  %v8790_v1 = vld [vmem:[#allocation106_spill] sm:$0xff] }
 0x35d   : > { %v5282_v32 = vadd.f32 %v8183_v54, %v5246_v31  ;;  %v3824_v25 = vadd.f32 %v3748_v16, %v3398_v51  ;;  %v8792_v31 = vld [vmem:[#allocation11_spill] sm:$0xff] }
 0x35e   : > { %v2718_v51 = vadd.f32 %v8792_v31, %v2404_v60  ;;  %v8797_v60 = vld [vmem:[#allocation13_spill] sm:$0xff] }
 0x35f   : > { %v5314_v18 = vmax.f32 %v5282_v32, 0.0  ;;  %v4139_v23 = vadd.f32 %v8784_v62, %v3824_v25  ;;  %v8259_v16 = vpop.f32.mrf.mxu1  ;;  %v8794_v62 = vld [vmem:[#allocation56_spill] sm:$0xff] }
 0x361   : > { %v5346_v3 = vpack.c.bf16 %v5314_v18, %v5314_v18  ;;  %v4821_v45 = vadd.f32 %v8786_v33, %v4139_v23  ;;  %5963 = vmatmul.msk.bf16.gmra.mxu2 %vm1639_vm15, %v3654_v17  ;;  %v3634_v17 = vunpack.c.l.b16 %v3571_v8  ;;  %v3400_v23 = vadd.f32 %v8794_v62, %v2718_v51  ;;  %v8274_v56 = vpop.f32.mrf.mxu0 }
 0x363   : > { %5378 = vst.msk [vmem:[%s8205_s15 + $0x8] sm:$0xf] %vm524_vm3, %v5346_v3  ;;  %v5247_v10 = vadd.f32 %v8117_v6, %v4821_v45  ;;  %v1954_v6 = vadd.f32 %v8790_v1, %v8789_v37  ;;  %v8268_v3 = vpop.f32.mrf.mxu3  ;;  %v3655_v33 = vpack.c.b16 %v3635_v49, %v3634_v17  ;;  %v6350_v45 = vld [vmem:[#allocation2 + $0xa0] sm:$0xf]  ;;  %v3580_v37 = vrot.slane %v6351_v57, 5  ;;  %v8801_v17 = vld [vmem:[#allocation110_spill] sm:$0xff] }
 0x364   : > { %v3751_v40 = vpop.f32.mrf.mxu2  ;;  %v3577_v22 = vrot.slane %v6350_v45, 5  ;;  %v8798_v1 = vld [vmem:[#allocation15_spill] sm:$0xff]  ;;  %v8803_v45 = vld [vmem:[#allocation18_spill] sm:$0xff] }
 0x365   : > { %v5283_v58 = vadd.f32 %v8183_v54, %v5247_v10  ;;  %v3825_v12 = vadd.f32 %v3751_v40, %v3399_v42  ;;  %v2405_v55 = vadd.f32 %v8793_v24, %v1954_v6  ;;  %v3439_v10 = vld [vmem:[#allocation2 + $0x9c] sm:$0xe] }
 0x366   : > { %v3579_v8 = vrot.slane %v3577_v22, 4 }
 0x367   : > { %v5315_v13 = vmax.f32 %v5283_v58, 0.0  ;;  %v4140_v19 = vadd.f32 %v8791_v21, %v3825_v12  ;;  %v8278_v58 = vpop.f32.mrf.mxu1  ;;  %v5925_v12 = vrot.slane %v3439_v10, 9 }
 0x369   : > { %v5347_v32 = vpack.c.bf16 %v5315_v13, %v5315_v13  ;;  %v4822_v25 = vadd.f32 %v8001_v61, %v4140_v19  ;;  %v8795_v61 = vld [vmem:[#allocation17_spill] sm:$0xff]  ;;  %v8799_v13 = vld [vmem:[#allocation60_spill] sm:$0xff]  ;;  %v3578_v51 = vsel %vm6591_vm11, %v5925_v12, %v3577_v22 }
 0x36a   : > { %v1956_v48 = vadd.f32 %v8796_v14, %v8795_v61  ;;  %v8804_v14 = vld [vmem:[#allocation64_spill] sm:$0xff] }
 0x36b   : > { %5379 = vst.msk [vmem:[%s8205_s15 + $0xc] sm:$0xf] %vm524_vm3, %v5347_v32  ;;  %v5248_v18 = vadd.f32 %v8131_v52, %v4822_v25  ;;  %v2719_v52 = vadd.f32 %v8797_v60, %v2405_v55  ;;  %v3581_v32 = vsel %vm6591_vm11, %v3579_v8, %v3580_v37  ;;  %v8800_v25 = vld [vmem:[#allocation20_spill] sm:$0xff]  ;;  %v8294_v62 = vpop.f32.mrf.mxu3  ;;  %v8807_v37 = vld [vmem:[#allocation19_spill] sm:$0xff] }
 0x36c   : > { %v3753_v5 = vpop.f32.mrf.mxu2  ;;  %v2406_v6 = vadd.f32 %v8798_v1, %v1956_v48  ;;  %v1959_v49 = vadd.f32 %v8801_v17, %v8800_v25  ;;  %v3440_v1 = vld [vmem:[#allocation2 + $0xa8] sm:$0xe]  ;;  %v8809_v25 = vld [vmem:[#allocation69_spill] sm:$0xff] }
 0x36d   : > { %v5284_v36 = vadd.f32 %v8183_v54, %v5248_v18  ;;  %v3826_v26 = vadd.f32 %v3753_v5, %v3400_v23  ;;  %v3401_v21 = vadd.f32 %v8799_v13, %v2719_v52 }
 0x36e   : > { %v2407_v22 = vadd.f32 %v8803_v45, %v1959_v49  ;;  %v8811_v45 = vld [vmem:[#allocation22_spill] sm:$0xff] }
 0x36f   : > { %v5316_v59 = vmax.f32 %v5284_v36, 0.0  ;;  %v4141_v47 = vadd.f32 %v8014_v30, %v3826_v26  ;;  %v8297_v36 = vpop.f32.mrf.mxu0  ;;  %v3636_v26 = vunpack.c.l.b16 %v3578_v51  ;;  %v8808_v51 = vld [vmem:[#allocation21_spill] sm:$0xff] }
 0x371   : > { %v5348_v42 = vpack.c.bf16 %v5316_v59, %v5316_v59  ;;  %v4823_v40 = vadd.f32 %v8017_v7, %v4141_v47  ;;  %5964 = vmatmul.msk.bf16.gmra.mxu2 %vm1639_vm15, %v3655_v33  ;;  %v3637_v33 = vunpack.c.l.b16 %v3581_v32 }
 0x373   : > { %5380 = vst.msk [vmem:[%s8205_s15 + $0x10] sm:$0xf] %vm524_vm3, %v5348_v42  ;;  %v5249_v30 = vadd.f32 %v8140_v46, %v4823_v40  ;;  %v8802_v46 = vld [vmem:[#allocation16_spill] sm:$0xff]  ;;  %v3656_v52 = vpack.c.b16 %v3637_v33, %v3636_v26  ;;  %v8805_v42 = vld [vmem:[#allocation23_spill] sm:$0xff]  ;;  %v8806_v40 = vld [vmem:[#allocation113_spill] sm:$0xff]  ;;  %v8313_v13 = vpop.f32.mrf.mxu3 }
 0x374   : > { %v3756_v19 = vpop.f32.mrf.mxu2  ;;  %v2720_v18 = vadd.f32 %v8802_v46, %v2406_v6  ;;  %v1961_v12 = vadd.f32 %v8806_v40, %v8805_v42  ;;  %v3441_v42 = vld [vmem:[#allocation2 + $0xb4] sm:$0xe] }
 0x375   : > { %v5285_v7 = vadd.f32 %v8183_v54, %v5249_v30  ;;  %v3827_v31 = vadd.f32 %v3756_v19, %v3401_v21  ;;  %v5926_v21 = vrot.slane %v3440_v1, 9  ;;  %v8814_v1 = vld [vmem:[#allocation29_spill] sm:$0xff] }
 0x376   : > { %v3402_v48 = vadd.f32 %v8804_v14, %v2720_v18  ;;  %v2408_v32 = vadd.f32 %v8808_v51, %v1961_v12  ;;  %v6355_v51 = vld [vmem:[#allocation2 + $0xbc] sm:$0x1] }
 0x377   : > { %v5317_v24 = vmax.f32 %v5285_v7, 0.0  ;;  %v4142_v55 = vadd.f32 %v8167_v34, %v3827_v31  ;;  %v8304_v34 = vpop.f32.mrf.mxu1  ;;  %v6353_v7 = vld [vmem:[#allocation2 + $0xb0] sm:$0x1]  ;;  %v8320_v49 = vpop.f32.mrf.mxu0 }
 0x378   : > { %v3587_v31 = vrot.slane %v6353_v7, 5 }
 0x379   : > { %v5349_v23 = vpack.c.bf16 %v5317_v24, %v5317_v24  ;;  %v4824_v5 = vadd.f32 %v8177_v35, %v4142_v55  ;;  %v6352_v35 = vld [vmem:[#allocation2 + $0xac] sm:$0xf] }
 0x37a   : > { %v3584_v10 = vrot.slane %v6352_v35, 5  ;;  %v8813_v35 = vld [vmem:[#allocation73_spill] sm:$0xff] }
 0x37b   : > { %5381 = vst.msk [vmem:[%s8205_s15 + $0x14] sm:$0xf] %vm524_vm3, %v5349_v23  ;;  %v5250_v61 = vadd.f32 %v8185_v53, %v4824_v5  ;;  %v2721_v53 = vadd.f32 %v8807_v37, %v2407_v22  ;;  %v8810_v5 = vld [vmem:[#allocation26_spill] sm:$0xff]  ;;  %v2722_v22 = vadd.f32 %v8811_v45, %v2408_v32  ;;  %v3594_v32 = vrot.slane %v6355_v51, 5  ;;  %v8819_v45 = vld [vmem:[#allocation31_spill] sm:$0xff] }
 0x37c   : > { %v3758_v59 = vpop.f32.mrf.mxu2  ;;  %v3586_v19 = vrot.slane %v3584_v10, 4  ;;  %v3585_v18 = vsel %vm6591_vm11, %v5926_v21, %v3584_v10  ;;  %v8815_v21 = vld [vmem:[#allocation25_spill] sm:$0xff] }
 0x37d   : > { %v5286_v47 = vadd.f32 %v8183_v54, %v5250_v61  ;;  %v3828_v60 = vadd.f32 %v3758_v59, %v3402_v48  ;;  %v3403_v17 = vadd.f32 %v8809_v25, %v2721_v53  ;;  %v3638_v48 = vunpack.c.l.b16 %v3585_v18  ;;  %v587_v18 = vld [vmem:[#allocation2 + $0xcc] sm:$0x1] }
 0x37e   : > { %v3588_v23 = vsel %vm6591_vm11, %v3586_v19, %v3587_v31  ;;  %v3404_v10 = vadd.f32 %v8813_v35, %v2722_v22  ;;  %v5927_v53 = vrot.slane %v3441_v42, 9  ;;  %v8821_v42 = vld [vmem:[#allocation30_spill] sm:$0xff] }
 0x37f   : > { %v5318_v8 = vmax.f32 %v5286_v47, 0.0  ;;  %v4143_v57 = vadd.f32 %v8198_v63, %v3828_v60  ;;  %v8323_v46 = vpop.f32.mrf.mxu1  ;;  %v3639_v59 = vunpack.c.l.b16 %v3588_v23  ;;  %v8812_v47 = vld [vmem:[#allocation24_spill] sm:$0xff] }
 0x381   : > { %v5350_v6 = vpack.c.bf16 %v5318_v8, %v5318_v8  ;;  %v4825_v30 = vadd.f32 %v8202_v0, %v4143_v57  ;;  %5965 = vmatmul.msk.bf16.gmra.mxu2 %vm1639_vm15, %v3656_v52  ;;  %v3657_v37 = vpack.c.b16 %v3639_v59, %v3638_v48  ;;  %v8820_v59 = vld [vmem:[#allocation28_spill] sm:$0xff] }
 0x383   : > { %5382 = vst.msk [vmem:[%s8205_s15 + $0x18] sm:$0xf] %vm524_vm3, %v5350_v6  ;;  %v5251_v63 = vadd.f32 %v8211_v2, %v4825_v30  ;;  %v1964_v2 = vadd.f32 %v8006_v4, %v8810_v5  ;;  %v8339_v4 = vpop.f32.mrf.mxu3  ;;  %v1966_v6 = vadd.f32 %v8022_v39, %v8814_v1 }
 0x384   : > { %v3761_v0 = vpop.f32.mrf.mxu2 }
 0x385   : > { %v5287_v24 = vadd.f32 %v8183_v54, %v5251_v63  ;;  %v3829_v55 = vadd.f32 %v3761_v0, %v3403_v17  ;;  %v2409_v60 = vadd.f32 %v8812_v47, %v1964_v2  ;;  %v8816_v17 = vld [vmem:[#allocation27_spill] sm:$0xff] }
 0x386   : > { %v2410_v0 = vadd.f32 %v8816_v17, %v1966_v6  ;;  %v8825_v17 = vld [vmem:[#allocation32_spill] sm:$0xff] }
 0x387   : > { %v5319_v26 = vmax.f32 %v5287_v24, 0.0  ;;  %v4144_v33 = vadd.f32 %v8223_v27, %v3829_v55  ;;  %v6354_v27 = vld [vmem:[#allocation2 + $0xb8] sm:$0xf]  ;;  %v2723_v19 = vadd.f32 %v8815_v21, %v2409_v60  ;;  %v8348_v7 = vpop.f32.mrf.mxu1  ;;  %v8817_v24 = vld [vmem:[#allocation77_spill] sm:$0xff] }
 0x388   : > { %v3591_v12 = vrot.slane %v6354_v27, 5  ;;  %v2724_v47 = vadd.f32 %v8820_v59, %v2410_v0  ;;  %v8828_v59 = vld [vmem:[#allocation119_spill] sm:$0xff] }
 0x389   : > { %v5351_v61 = vpack.c.bf16 %v5319_v26, %v5319_v26  ;;  %v4826_v14 = vadd.f32 %v8230_v41, %v4144_v33  ;;  %v8342_v41 = vpop.f32.mrf.mxu0 }
 0x38a   : > { %v3593_v31 = vrot.slane %v3591_v12, 4  ;;  %v3592_v55 = vsel %vm6591_vm11, %v5927_v53, %v3591_v12  ;;  %v8822_v12 = vld [vmem:[#allocation81_spill] sm:$0xff]  ;;  %v8823_v53 = vld [vmem:[#allocation34_spill] sm:$0xff] }
 0x38b   : > { %5383 = vst.msk [vmem:[%s8205_s15 + $0x1c] sm:$0xf] %vm524_vm3, %v5351_v61  ;;  %v5252_v52 = vadd.f32 %v8233_v38, %v4826_v14  ;;  %v8366_v22 = vpop.f32.mrf.mxu3  ;;  %v3640_v61 = vunpack.c.l.b16 %v3592_v55  ;;  %v1971_v1 = vadd.f32 %v8031_v20, %v8823_v53  ;;  %v6356_v20 = vld [vmem:[#allocation2 + $0xc4] sm:$0xf] }
 0x38c   : > { %v3763_v40 = vpop.f32.mrf.mxu2  ;;  %v3595_v5 = vsel %vm6591_vm11, %v3593_v31, %v3594_v32 }
 0x38d   : > { %v5288_v8 = vadd.f32 %v8183_v54, %v5252_v52  ;;  %v3830_v57 = vadd.f32 %v3763_v40, %v3404_v10  ;;  %v3641_v60 = vunpack.c.l.b16 %v3595_v5 }
 0x38f   : > { %v5320_v38 = vmax.f32 %v5288_v8, 0.0  ;;  %v4145_v30 = vadd.f32 %v8246_v15, %v3830_v57  ;;  %v3405_v15 = vadd.f32 %v8817_v24, %v2723_v19  ;;  %v8374_v27 = vpop.f32.mrf.mxu1  ;;  %v3406_v8 = vadd.f32 %v8822_v12, %v2724_v47 }
 0x390   : > { %v3658_v57 = vpack.c.b16 %v3641_v60, %v3640_v61  ;;  %v8826_v61 = vld [vmem:[#allocation33_spill] sm:$0xff] }
 0x391   : > { %v5352_v63 = vpack.c.bf16 %v5320_v38, %v5320_v38  ;;  %v4827_v25 = vadd.f32 %v8249_v11, %v4145_v30  ;;  %5966 = vmatmul.msk.bf16.gmra.mxu2 %vm1639_vm15, %v3657_v37  ;;  %v588_v11 = vsel %vm6551_vm6, 0, %v587_v18  ;;  %v8370_v52 = vpop.f32.mrf.mxu0  ;;  %v4214_v37 = vld [vmem:[#allocation2 + $0xd0] sm:$0xf] }
 0x392   : > { %589 = vst [vmem:[#allocation2 + $0xcc] sm:$0x1] %v588_v11  ;;  %v4586_v19 = vshll.u32 %v4214_v37, 16  ;;  %v4590_v31 = vshrl.u32 %v4214_v37, 16 }
 0x393   : > { %5384 = vst.msk [vmem:[%s8205_s15 + $0x20] sm:$0xf] %vm524_vm3, %v5352_v63  ;;  %v5253_v39 = vadd.f32 %v8259_v16, %v4827_v25  ;;  %v1969_v16 = vadd.f32 %v8025_v29, %v8819_v45  ;;  %v8388_v2 = vpop.f32.mrf.mxu3 }
 0x394   : > { %v3766_v23 = vpop.f32.mrf.mxu2  ;;  %v4588_v24 = vrot.slane %v4586_v19, 5 }
 0x395   : > { %v5289_v26 = vadd.f32 %v8183_v54, %v5253_v39  ;;  %v3831_v33 = vadd.f32 %v3766_v23, %v3405_v15  ;;  %v2411_v40 = vadd.f32 %v8821_v42, %v1969_v16  ;;  %v3598_v39 = vrot.slane %v6356_v20, 5 }
 0x396   : > { %v4592_v15 = vrot.slane %v4590_v31, 4  ;;  %v8831_v31 = vld [vmem:[#allocation35_spill] sm:$0xff] }
 0x397   : > { %v5321_v14 = vmax.f32 %v5289_v26, 0.0  ;;  %v4146_v48 = vadd.f32 %v8268_v3, %v3831_v33  ;;  %v643_v3 = vld [vmem:[#allocation2 + $0xd4] sm:$0x1]  ;;  %v2725_v0 = vadd.f32 %v8825_v17, %v2411_v40  ;;  %v8401_v12 = vpop.f32.mrf.mxu1 }
 0x398   : > { %v4593_v26 = vor.u32 %v4592_v15, %v4588_v24 }
 0x399   : > { %v5353_v35 = vpack.c.bf16 %v5321_v14, %v5321_v14  ;;  %v4828_v10 = vadd.f32 %v8274_v56, %v4146_v48  ;;  %v6263_v38 = vld [vmem:[#allocation2 + $0xcc] sm:$0xff]  ;;  %v644_v56 = vsel %vm6561_vm8, 0, %v643_v3  ;;  %v2412_v14 = vadd.f32 %v8826_v61, %v1971_v1  ;;  %v8395_v60 = vpop.f32.mrf.mxu0  ;;  %v6357_v3 = vld [vmem:[#allocation2 + $0xc8] sm:$0x1] }
 0x39a   : > { %v4213_v21 = vld [vmem:[#allocation2 + $0xcc] sm:$0xf]  ;;  %645 = vst [vmem:[#allocation2 + $0xd4] sm:$0x1] %v644_v56  ;;  %6072 = vmatmul.msk.bf16.gmra.mxu3 %vm1639_vm15, %v6263_v38  ;;  %v8827_v48 = vld [vmem:[#allocation37_spill] sm:$0xff]  ;;  %v3601_v53 = vrot.slane %v6357_v3, 5 }
 0x39b   : > { %5385 = vst.msk [vmem:[%s8205_s15 + $0x24] sm:$0xf] %vm524_vm3, %v5353_v35  ;;  %v5254_v29 = vadd.f32 %v8278_v58, %v4828_v10  ;;  %v3442_v58 = vld [vmem:[#allocation2 + $0xc0] sm:$0xe]  ;;  %v4577_v63 = vshrl.u32 %v4213_v21, 16  ;;  %v4580_v25 = vshll.u32 %v4213_v21, 16  ;;  %v1974_v47 = vadd.f32 %v8828_v59, %v8827_v48 }
 0x39c   : > { %v3768_v6 = vpop.f32.mrf.mxu2  ;;  %v5928_v11 = vrot.slane %v3442_v58, 9  ;;  %v8829_v10 = vld [vmem:[#allocation86_spill] sm:$0xff] }
 0x39d   : > { %v5290_v51 = vadd.f32 %v8183_v54, %v5254_v29  ;;  %v3832_v32 = vadd.f32 %v3768_v6, %v3406_v8  ;;  %v4579_v23 = vrot.slane %v4577_v63, 4  ;;  %v4582_v5 = vrot.slane %v4580_v25, 5  ;;  %v4865_v29 = vld [vmem:[#allocation2 + $0xcc] sm:$0xe] }
 0x39e   : > { %v3407_v42 = vadd.f32 %v8829_v10, %v2725_v0  ;;  %v4594_v6 = vrot.slane %v4593_v26, 4  ;;  %v6128_v38 = vrot.slane %v4865_v29, 9  ;;  %v8420_v26 = vpop.f32.mrf.mxu3  ;;  %v8835_v10 = vld [vmem:[#allocation121_spill] sm:$0xff] }
 0x39f   : > { %v5322_v55 = vmax.f32 %v5290_v51, 0.0  ;;  %v4147_v18 = vadd.f32 %v8294_v62, %v3832_v32  ;;  %v4583_v16 = vor.u32 %v4582_v5, %v4579_v23  ;;  %v3600_v62 = vrot.slane %v3598_v39, 4  ;;  %v8832_v5 = vld [vmem:[#allocation36_spill] sm:$0xff] }
 0x3a1   : > { %v5354_v33 = vpack.c.bf16 %v5322_v55, %v5322_v55  ;;  %v4829_v45 = vadd.f32 %v8297_v36, %v4147_v18  ;;  %5967 = vmatmul.msk.bf16.gmra.mxu2 %vm1639_vm15, %v3658_v57  ;;  %v4584_v40 = vrot.slane %v4583_v16, 4  ;;  %v5021_v36 = vrot.slane %v4214_v37, 5  ;;  %v4215_v1 = vld [vmem:[#allocation2 + $0xd4] sm:$0x1]  ;;  %v8833_v16 = vld [vmem:[#allocation90_spill] sm:$0xff]  ;;  %v4778_v48 = vpop.f32.mrf.mxu0 }
 0x3a2   : > { %v3599_v57 = vsel %vm6591_vm11, %v5928_v11, %v3598_v39  ;;  %v4596_v19 = vshll.u32 %v4215_v1, 16  ;;  %v2726_v37 = vadd.f32 %v8831_v31, %v2412_v14  ;;  %v5024_v58 = vrot.slane %v4215_v1, 5  ;;  %v8837_v1 = vld [vmem:[#allocation39_spill] sm:$0xff] }
 0x3a3   : > { %5386 = vst.msk [vmem:[%s8205_s15 + $0x28] sm:$0xf] %vm524_vm3, %v5354_v33  ;;  %v5255_v35 = vadd.f32 %v8304_v34, %v4829_v45  ;;  %v4589_v21 = vsel %vm6611_vm14, %v4584_v40, %v4588_v24  ;;  %v5022_v51 = vsel %vm6591_vm11, %v6128_v38, %v5021_v36  ;;  %v5023_v32 = vrot.slane %v5021_v36, 4  ;;  %v5204_v40 = vpop.f32.mrf.mxu1 }
 0x3a4   : > { %v3771_v8 = vpop.f32.mrf.mxu2  ;;  %v4598_v17 = vrot.slane %v4596_v19, 5  ;;  %v5065_v0 = vunpack.c.l.b16 %v5022_v51  ;;  %v3602_v20 = vsel %vm6591_vm11, %v3600_v62, %v3601_v53  ;;  %v4639_v39 = vunpack.c.l.b16 %v4589_v21  ;;  %v8840_v51 = vld [vmem:[#allocation123_spill] sm:$0xff] }
 0x3a5   : > { %v5291_v30 = vadd.f32 %v8183_v54, %v5255_v35  ;;  %v3833_v56 = vadd.f32 %v3771_v8, %v3407_v42  ;;  %v5025_v24 = vsel %vm6591_vm11, %v5023_v32, %v5024_v58  ;;  %v2413_v11 = vadd.f32 %v8832_v5, %v1974_v47  ;;  %v8834_v47 = vld [vmem:[#allocation40_spill] sm:$0xff]  ;;  %v8836_v8 = vld [vmem:[#allocation38_spill] sm:$0xff] }
 0x3a6   : > { %v4599_v18 = vsel %vm6611_vm14, %v4594_v6, %v4598_v17  ;;  %v5066_v23 = vunpack.c.l.b16 %v5025_v24  ;;  %v3408_v50 = vadd.f32 %v8833_v16, %v2726_v37  ;;  %v3643_v61 = vunpack.c.l.b16 %v3602_v20  ;;  %v4098_v34 = vpop.f32.mrf.mxu3  ;;  %v8839_v37 = vld [vmem:[#allocation42_spill] sm:$0xff]  ;;  %v8842_v20 = vld [vmem:[#allocation43_spill] sm:$0xff]  ;;  %v8846_v16 = vld [vmem:[#allocation44_spill] sm:$0xff] }
 0x3a7   : > { %v5323_v63 = vmax.f32 %v5291_v30, 0.0  ;;  %v4148_v25 = vadd.f32 %v8313_v13, %v3833_v56  ;;  %v3642_v13 = vunpack.c.l.b16 %v3599_v57  ;;  %v4640_v33 = vunpack.c.l.b16 %v4599_v18  ;;  %v8838_v30 = vld [vmem:[#allocation94_spill] sm:$0xff] }
 0x3a8   : > { %v5082_v14 = vpack.c.b16 %v5066_v23, %v5065_v0  ;;  %v1976_v42 = vadd.f32 %v8835_v10, %v8834_v47  ;;  %v2727_v57 = vadd.f32 %v8836_v8, %v2413_v11  ;;  %v8844_v11 = vld [vmem:[#allocation45_spill] sm:$0xff]  ;;  %v8848_v47 = vld [vmem:[#allocation100_spill] sm:$0xff] }
 0x3a9   : > { %v5355_v15 = vpack.c.bf16 %v5323_v63, %v5323_v63  ;;  %v4830_v55 = vadd.f32 %v8320_v49, %v4148_v25  ;;  %v4656_v59 = vpack.c.b16 %v4640_v33, %v4639_v39  ;;  %v3659_v36 = vpack.c.b16 %v3643_v61, %v3642_v13  ;;  %v4780_v31 = vpop.f32.mrf.mxu0  ;;  %v8841_v63 = vld [vmem:[#allocation41_spill] sm:$0xff]  ;;  %v8845_v13 = vld [vmem:[#allocation124_spill] sm:$0xff] }
 0x3aa   : > { %6168 = vmatmul.msk.bf16.gmra.mxu1 %vm1639_vm15, %v5082_v14  ;;  %v2414_v6 = vadd.f32 %v8837_v1, %v1976_v42  ;;  %v3409_v56 = vadd.f32 %v8838_v30, %v2727_v57  ;;  %v1981_v33 = vadd.f32 %v8845_v13, %v8844_v11 }
 0x3ab   : > { %5387 = vst.msk [vmem:[%s8205_s15 + $0x2c] sm:$0xf] %vm524_vm3, %v5355_v15  ;;  %v5256_v45 = vadd.f32 %v8323_v46, %v4830_v55  ;;  %6112 = vmatmul.msk.bf16.gmra.mxu0 %vm1639_vm15, %v4656_v59  ;;  %v5206_v17 = vpop.f32.mrf.mxu1  ;;  %v8843_v15 = vld [vmem:[#allocation97_spill] sm:$0xff]  ;;  %v8847_v59 = vld [vmem:[#allocation46_spill] sm:$0xff] }
 0x3ac   : > { %v3773_v49 = vpop.f32.mrf.mxu2  ;;  %v2728_v25 = vadd.f32 %v8841_v63, %v2414_v6 }
 0x3ad   : > { %v5292_v62 = vadd.f32 %v8183_v54, %v5256_v45  ;;  %v3834_v35 = vadd.f32 %v3773_v49, %v3408_v50 }
 0x3ae   : > { %v3410_v55 = vadd.f32 %v8843_v15, %v2728_v25  ;;  %v8857_v15 = vld [vmem:[#allocation52_spill] sm:$0xff] }
 0x3af   : > { %v5324_v46 = vmax.f32 %v5292_v62, 0.0  ;;  %v4149_v29 = vadd.f32 %v8339_v4, %v3834_v35  ;;  %v2416_v62 = vadd.f32 %v8847_v59, %v1981_v33 }
 0x3b1   : > { %v5356_v3 = vpack.c.bf16 %v5324_v46, %v5324_v46  ;;  %v4831_v53 = vadd.f32 %v8342_v41, %v4149_v29  ;;  %5968 = vmatmul.msk.bf16.gmra.mxu2 %vm1639_vm15, %v3659_v36  ;;  %v1979_v41 = vadd.f32 %v8840_v51, %v8839_v37  ;;  %v4783_v61 = vpop.f32.mrf.mxu0  ;;  %v8849_v29 = vld [vmem:[#allocation48_spill] sm:$0xff]  ;;  %v8850_v36 = vld [vmem:[#allocation126_spill] sm:$0xff] }
 0x3b2   : > { %v1984_v8 = vadd.f32 %v8850_v36, %v8849_v29 }
 0x3b3   : > { %5388 = vst.msk [vmem:[%s8205_s15 + $0x30] sm:$0xf] %vm524_vm3, %v5356_v3  ;;  %v5257_v38 = vadd.f32 %v8348_v7, %v4831_v53  ;;  %v2415_v39 = vadd.f32 %v8842_v20, %v1979_v41  ;;  %v8851_v3 = vld [vmem:[#allocation47_spill] sm:$0xff] }
 0x3b4   : > { %v3776_v21 = vpop.f32.mrf.mxu2  ;;  %v2730_v53 = vadd.f32 %v8851_v3, %v2416_v62 }
 0x3b5   : > { %v5293_v4 = vadd.f32 %v8183_v54, %v5257_v38  ;;  %v3835_v19 = vadd.f32 %v3776_v21, %v3409_v56  ;;  %v2729_v50 = vadd.f32 %v8846_v16, %v2415_v39  ;;  %v8852_v56 = vld [vmem:[#allocation49_spill] sm:$0xff] }
 0x3b7   : > { %v5325_v32 = vmax.f32 %v5293_v4, 0.0  ;;  %v4150_v58 = vadd.f32 %v8366_v22, %v3835_v19  ;;  %v4101_v22 = vpop.f32.mrf.mxu3  ;;  %v3411_v10 = vadd.f32 %v8848_v47, %v2729_v50  ;;  %v8853_v4 = vld [vmem:[#allocation103_spill] sm:$0xff] }
 0x3b8   : > { %v3412_v19 = vadd.f32 %v8853_v4, %v2730_v53 }
 0x3b9   : > { %v5357_v0 = vpack.c.bf16 %v5325_v32, %v5325_v32  ;;  %v4832_v7 = vadd.f32 %v8370_v52, %v4150_v58  ;;  %v4785_v30 = vpop.f32.mrf.mxu0  ;;  %v8855_v58 = vld [vmem:[#allocation128_spill] sm:$0xff] }
 0x3bb   : > { %5389 = vst.msk [vmem:[%s8205_s15 + $0x34] sm:$0xf] %vm524_vm3, %v5357_v0  ;;  %v5258_v24 = vadd.f32 %v8374_v27, %v4832_v7  ;;  %v5209_v27 = vpop.f32.mrf.mxu1 }
 0x3bc   : > { %v3778_v18 = vpop.f32.mrf.mxu2 }
 0x3bd   : > { %v5294_v23 = vadd.f32 %v8183_v54, %v5258_v24  ;;  %v3836_v5 = vadd.f32 %v3778_v18, %v3410_v55  ;;  %v8858_v18 = vld [vmem:[#allocation104_spill] sm:$0xff] }
 0x3bf   : > { %v5326_v45 = vmax.f32 %v5294_v23, 0.0  ;;  %v4151_v52 = vadd.f32 %v8388_v2, %v3836_v5  ;;  %v4103_v1 = vpop.f32.mrf.mxu3 }
 0x3c1   : > { %v5358_v14 = vpack.c.bf16 %v5326_v45, %v5326_v45  ;;  %v4833_v49 = vadd.f32 %v8395_v60, %v4151_v52  ;;  %v4788_v5 = vpop.f32.mrf.mxu0  ;;  %v8860_v52 = vld [vmem:[#allocation130_spill] sm:$0xff] }
 0x3c3   : > { %5390 = vst.msk [vmem:[%s8205_s15 + $0x38] sm:$0xf] %vm524_vm3, %v5358_v14  ;;  %v5259_v35 = vadd.f32 %v8401_v12, %v4833_v49  ;;  %v2417_v12 = vadd.f32 %v8852_v56, %v1984_v8  ;;  %v5211_v37 = vpop.f32.mrf.mxu1  ;;  %v8861_v14 = vld [vmem:[#allocation55_spill] sm:$0xff] }
 0x3c4   : > { %v3781_v42 = vpop.f32.mrf.mxu2 }
 0x3c5   : > { %v5295_v46 = vadd.f32 %v8183_v54, %v5259_v35  ;;  %v3837_v2 = vadd.f32 %v3781_v42, %v3411_v10  ;;  %v8862_v35 = vld [vmem:[#allocation58_spill] sm:$0xff]  ;;  %v8863_v10 = vld [vmem:[#allocation105_spill] sm:$0xff] }
 0x3c7   : > { %v5327_v57 = vmax.f32 %v5295_v46, 0.0  ;;  %v4152_v60 = vadd.f32 %v8420_v26, %v3837_v2  ;;  %v8854_v26 = vld [vmem:[#allocation50_spill] sm:$0xff]  ;;  %v4106_v24 = vpop.f32.mrf.mxu3 }
 0x3c8   : > { %v1986_v63 = vadd.f32 %v8855_v58, %v8854_v26 }
 0x3c9   : > { %v5359_v6 = vpack.c.bf16 %v5327_v57, %v5327_v57  ;;  %v4834_v38 = vadd.f32 %v4778_v48, %v4152_v60  ;;  %v8856_v48 = vld [vmem:[#allocation51_spill] sm:$0xff]  ;;  %v4790_v8 = vpop.f32.mrf.mxu0  ;;  %v8864_v57 = vld [vmem:[#allocation57_spill] sm:$0xff] }
 0x3ca   : > { %v2731_v7 = vadd.f32 %v8856_v48, %v2417_v12  ;;  %v2418_v55 = vadd.f32 %v8857_v15, %v1986_v63  ;;  %v8869_v63 = vld [vmem:[#allocation61_spill] sm:$0xff] }
 0x3cb   : > { %5391 = vst.msk [vmem:[%s8205_s15 + $0x3c] sm:$0xf] %vm524_vm3, %v5359_v6  ;;  %v5260_v21 = vadd.f32 %v5204_v40, %v4834_v38  ;;  %v5214_v45 = vpop.f32.mrf.mxu1 }
 0x3cc   : > { %v3783_v51 = vpop.f32.mrf.mxu2  ;;  %v3413_v23 = vadd.f32 %v8858_v18, %v2731_v7  ;;  %v2732_v49 = vadd.f32 %v8861_v14, %v2418_v55  ;;  %v8871_v7 = vld [vmem:[#allocation63_spill] sm:$0xff]  ;;  %v8876_v14 = vld [vmem:[#allocation68_spill] sm:$0xff] }
 0x3cd   : > { %v5296_v41 = vadd.f32 %v8183_v54, %v5260_v21  ;;  %v3838_v32 = vadd.f32 %v3783_v51, %v3412_v19  ;;  %v8867_v21 = vld [vmem:[#allocation62_spill] sm:$0xff]  ;;  %v8868_v19 = vld [vmem:[#allocation108_spill] sm:$0xff] }
 0x3ce   : > { %v3414_v42 = vadd.f32 %v8863_v10, %v2732_v49  ;;  %v8878_v10 = vld [vmem:[#allocation115_spill] sm:$0xff] }
 0x3cf   : > { %v5328_v25 = vmax.f32 %v5296_v41, 0.0  ;;  %v4153_v0 = vadd.f32 %v4098_v34, %v3838_v32  ;;  %v8859_v34 = vld [vmem:[#allocation54_spill] sm:$0xff]  ;;  %v4108_v46 = vpop.f32.mrf.mxu3 }
 0x3d0   : > { %v1989_v16 = vadd.f32 %v8860_v52, %v8859_v34  ;;  %v8874_v52 = vld [vmem:[#allocation65_spill] sm:$0xff] }
 0x3d1   : > { %v5360_v20 = vpack.c.bf16 %v5328_v25, %v5328_v25  ;;  %v4835_v39 = vadd.f32 %v4780_v31, %v4153_v0 }
 0x3d2   : > { %v2419_v47 = vadd.f32 %v8862_v35, %v1989_v16 }
 0x3d3   : > { %5392 = vst.msk [vmem:[%s8205_s15 + $0x40] sm:$0xf] %vm524_vm3, %v5360_v20  ;;  %v5261_v40 = vadd.f32 %v5206_v17, %v4835_v39  ;;  %v5216_v38 = vpop.f32.mrf.mxu1  ;;  %v4793_v20 = vpop.f32.mrf.mxu0 }
 0x3d4   : > { %v3786_v11 = vpop.f32.mrf.mxu2 }
 0x3d5   : > { %v5297_v13 = vadd.f32 %v8183_v54, %v5261_v40  ;;  %v3839_v33 = vadd.f32 %v3786_v11, %v3413_v23  ;;  %v8872_v40 = vld [vmem:[#allocation66_spill] sm:$0xff]  ;;  %v8873_v23 = vld [vmem:[#allocation112_spill] sm:$0xff] }
 0x3d7   : > { %v5329_v50 = vmax.f32 %v5297_v13, 0.0  ;;  %v4154_v31 = vadd.f32 %v4101_v22, %v3839_v33  ;;  %v8865_v22 = vld [vmem:[#allocation132_spill] sm:$0xff]  ;;  %v4111_v58 = vpop.f32.mrf.mxu3 }
 0x3d8   : > { %v1991_v60 = vadd.f32 %v8865_v22, %v8864_v57  ;;  %v8880_v22 = vld [vmem:[#allocation135_spill] sm:$0xff] }
 0x3d9   : > { %v5361_v59 = vpack.c.bf16 %v5329_v50, %v5329_v50  ;;  %v4836_v62 = vadd.f32 %v4783_v61, %v4154_v31  ;;  %v8866_v61 = vld [vmem:[#allocation59_spill] sm:$0xff] }
 0x3da   : > { %v2733_v6 = vadd.f32 %v8866_v61, %v2419_v47  ;;  %v8877_v47 = vld [vmem:[#allocation70_spill] sm:$0xff] }
 0x3db   : > { %5393 = vst.msk [vmem:[%s8205_s15 + $0x44] sm:$0xf] %vm524_vm3, %v5361_v59  ;;  %v5262_v17 = vadd.f32 %v5209_v27, %v4836_v62  ;;  %v2420_v27 = vadd.f32 %v8867_v21, %v1991_v60  ;;  %v5219_v55 = vpop.f32.mrf.mxu1  ;;  %v4795_v35 = vpop.f32.mrf.mxu0  ;;  %v8882_v21 = vld [vmem:[#allocation75_spill] sm:$0xff] }
 0x3dc   : > { %v3788_v2 = vpop.f32.mrf.mxu2  ;;  %v3415_v51 = vadd.f32 %v8868_v19, %v2733_v6 }
 0x3dd   : > { %v5298_v29 = vadd.f32 %v8183_v54, %v5262_v17  ;;  %v3840_v36 = vadd.f32 %v3788_v2, %v3414_v42 }
 0x3df   : > { %v5330_v3 = vmax.f32 %v5298_v29, 0.0  ;;  %v4155_v53 = vadd.f32 %v4103_v1, %v3840_v36  ;;  %v8870_v1 = vld [vmem:[#allocation133_spill] sm:$0xff]  ;;  %v4113_v49 = vpop.f32.mrf.mxu3 }
 0x3e0   : > { %v1994_v25 = vadd.f32 %v8870_v1, %v8869_v63  ;;  %v8885_v1 = vld [vmem:[#allocation136_spill] sm:$0xff] }
 0x3e1   : > { %v5362_v56 = vpack.c.bf16 %v5330_v3, %v5330_v3  ;;  %v4837_v12 = vadd.f32 %v4785_v30, %v4155_v53  ;;  %v2734_v30 = vadd.f32 %v8871_v7, %v2420_v27  ;;  %v8886_v7 = vld [vmem:[#allocation76_spill] sm:$0xff] }
 0x3e3   : > { %5394 = vst.msk [vmem:[%s8205_s15 + $0x48] sm:$0xf] %vm524_vm3, %v5362_v56  ;;  %v5263_v4 = vadd.f32 %v5211_v37, %v4837_v12  ;;  %v2421_v37 = vadd.f32 %v8872_v40, %v1994_v25  ;;  %v3416_v11 = vadd.f32 %v8873_v23, %v2734_v30  ;;  %v5221_v2 = vpop.f32.mrf.mxu1 }
 0x3e4   : > { %v3791_v41 = vpop.f32.mrf.mxu2 }
 0x3e5   : > { %v5299_v32 = vadd.f32 %v8183_v54, %v5263_v4  ;;  %v3841_v26 = vadd.f32 %v3791_v41, %v3415_v51  ;;  %v8883_v4 = vld [vmem:[#allocation116_spill] sm:$0xff]  ;;  %v4798_v51 = vpop.f32.mrf.mxu0 }
 0x3e7   : > { %v5331_v0 = vmax.f32 %v5299_v32, 0.0  ;;  %v4156_v48 = vadd.f32 %v4106_v24, %v3841_v26  ;;  %v8875_v24 = vld [vmem:[#allocation134_spill] sm:$0xff]  ;;  %v4116_v12 = vpop.f32.mrf.mxu3 }
 0x3e8   : > { %v1996_v16 = vadd.f32 %v8875_v24, %v8874_v52  ;;  %v8889_v52 = vld [vmem:[#allocation74_spill] sm:$0xff]  ;;  %v8890_v24 = vld [vmem:[#allocation137_spill] sm:$0xff] }
 0x3e9   : > { %v5363_v39 = vpack.c.bf16 %v5331_v0, %v5331_v0  ;;  %v4838_v15 = vadd.f32 %v4788_v5, %v4156_v48  ;;  %v2735_v5 = vadd.f32 %v8876_v14, %v2421_v37  ;;  %v8888_v37 = vld [vmem:[#allocation117_spill] sm:$0xff]  ;;  %v8891_v14 = vld [vmem:[#allocation80_spill] sm:$0xff] }
 0x3ea   : > { %v2422_v17 = vadd.f32 %v8877_v47, %v1996_v16  ;;  %v2004_v16 = vadd.f32 %v8890_v24, %v8889_v52  ;;  %v8904_v24 = vld [vmem:[#allocation93_spill] sm:$0xff] }
 0x3eb   : > { %5395 = vst.msk [vmem:[%s8205_s15 + $0x4c] sm:$0xf] %vm524_vm3, %v5363_v39  ;;  %v5264_v18 = vadd.f32 %v5214_v45, %v4838_v15  ;;  %v3417_v42 = vadd.f32 %v8878_v10, %v2735_v5  ;;  %v5224_v63 = vpop.f32.mrf.mxu1  ;;  %v8887_v15 = vld [vmem:[#allocation79_spill] sm:$0xff] }
 0x3ec   : > { %v3793_v13 = vpop.f32.mrf.mxu2 }
 0x3ed   : > { %v5300_v33 = vadd.f32 %v8183_v54, %v5264_v18  ;;  %v3842_v34 = vadd.f32 %v3793_v13, %v3416_v11 }
 0x3ef   : > { %v5332_v50 = vmax.f32 %v5300_v33, 0.0  ;;  %v4157_v31 = vadd.f32 %v4108_v46, %v3842_v34  ;;  %v8879_v46 = vld [vmem:[#allocation67_spill] sm:$0xff]  ;;  %v4118_v23 = vpop.f32.mrf.mxu3  ;;  %v4800_v34 = vpop.f32.mrf.mxu0 }
 0x3f0   : > { %v1999_v60 = vadd.f32 %v8880_v22, %v8879_v46  ;;  %v8895_v46 = vld [vmem:[#allocation138_spill] sm:$0xff] }
 0x3f1   : > { %v5364_v59 = vpack.c.bf16 %v5332_v50, %v5332_v50  ;;  %v4839_v62 = vadd.f32 %v4790_v8, %v4157_v31  ;;  %v8881_v8 = vld [vmem:[#allocation72_spill] sm:$0xff] }
 0x3f2   : > { %v2736_v61 = vadd.f32 %v8881_v8, %v2422_v17  ;;  %v2423_v27 = vadd.f32 %v8882_v21, %v1999_v60  ;;  %v8897_v21 = vld [vmem:[#allocation87_spill] sm:$0xff] }
 0x3f3   : > { %5396 = vst.msk [vmem:[%s8205_s15 + $0x50] sm:$0xf] %vm524_vm3, %v5364_v59  ;;  %v5265_v45 = vadd.f32 %v5216_v38, %v4839_v62 }
 0x3f4   : > { %v3796_v29 = vpop.f32.mrf.mxu2  ;;  %v3418_v19 = vadd.f32 %v8883_v4, %v2736_v61  ;;  %v2737_v30 = vadd.f32 %v8886_v7, %v2423_v27  ;;  %v8898_v4 = vld [vmem:[#allocation120_spill] sm:$0xff] }
 0x3f5   : > { %v5301_v36 = vadd.f32 %v8183_v54, %v5265_v45  ;;  %v3843_v57 = vadd.f32 %v3796_v29, %v3417_v42  ;;  %v8893_v45 = vld [vmem:[#allocation118_spill] sm:$0xff] }
 0x3f6   : > { %v3419_v18 = vadd.f32 %v8888_v37, %v2737_v30 }
 0x3f7   : > { %v5333_v3 = vmax.f32 %v5301_v36, 0.0  ;;  %v4158_v53 = vadd.f32 %v4111_v58, %v3843_v57  ;;  %v8884_v58 = vld [vmem:[#allocation71_spill] sm:$0xff]  ;;  %v4121_v36 = vpop.f32.mrf.mxu3  ;;  %v8894_v57 = vld [vmem:[#allocation78_spill] sm:$0xff]  ;;  %v4803_v61 = vpop.f32.mrf.mxu0 }
 0x3f8   : > { %v2001_v25 = vadd.f32 %v8885_v1, %v8884_v58  ;;  %v2006_v22 = vadd.f32 %v8895_v46, %v8894_v57  ;;  %v8908_v57 = vld [vmem:[#allocation96_spill] sm:$0xff] }
 0x3f9   : > { %v5365_v6 = vpack.c.bf16 %v5333_v3, %v5333_v3  ;;  %v4840_v56 = vadd.f32 %v4793_v20, %v4158_v53  ;;  %v8896_v53 = vld [vmem:[#allocation85_spill] sm:$0xff] }
 0x3fa   : > { %v2424_v40 = vadd.f32 %v8887_v15, %v2001_v25  ;;  %v2426_v27 = vadd.f32 %v8897_v21, %v2006_v22  ;;  %v8900_v25 = vld [vmem:[#allocation89_spill] sm:$0xff] }
 0x3fb   : > { %5397 = vst.msk [vmem:[%s8205_s15 + $0x54] sm:$0xf] %vm524_vm3, %v5365_v6  ;;  %v5266_v38 = vadd.f32 %v5219_v55, %v4840_v56 }
 0x3fc   : > { %v3798_v41 = vpop.f32.mrf.mxu2  ;;  %v2738_v5 = vadd.f32 %v8891_v14, %v2424_v40 }
 0x3fd   : > { %v5302_v32 = vadd.f32 %v8183_v54, %v5266_v38  ;;  %v3844_v26 = vadd.f32 %v3798_v41, %v3418_v19 }
 0x3fe   : > { %v3420_v10 = vadd.f32 %v8893_v45, %v2738_v5  ;;  %v8905_v5 = vld [vmem:[#allocation95_spill] sm:$0xff] }
 0x3ff   : > { %v5334_v0 = vmax.f32 %v5302_v32, 0.0  ;;  %v4159_v48 = vadd.f32 %v4113_v49, %v3844_v26  ;;  %v5226_v49 = vpop.f32.mrf.mxu1  ;;  %v8899_v26 = vld [vmem:[#allocation82_spill] sm:$0xff] }
 0x401   : > { %v5366_v20 = vpack.c.bf16 %v5334_v0, %v5334_v0  ;;  %v4841_v39 = vadd.f32 %v4795_v35, %v4159_v48  ;;  %v8892_v35 = vld [vmem:[#allocation83_spill] sm:$0xff]  ;;  %v2740_v0 = vadd.f32 %v8900_v25, %v2426_v27  ;;  %v4123_v48 = vpop.f32.mrf.mxu3 }
 0x402   : > { %v2425_v47 = vadd.f32 %v8892_v35, %v2004_v16 }
 0x403   : > { %5398 = vst.msk [vmem:[%s8205_s15 + $0x58] sm:$0xf] %vm524_vm3, %v5366_v20  ;;  %v5267_v55 = vadd.f32 %v5221_v2, %v4841_v39  ;;  %v4805_v20 = vpop.f32.mrf.mxu0  ;;  %v8901_v39 = vld [vmem:[#allocation92_spill] sm:$0xff] }
 0x404   : > { %v3801_v11 = vpop.f32.mrf.mxu2  ;;  %v2739_v8 = vadd.f32 %v8896_v53, %v2425_v47 }
 0x405   : > { %v5303_v13 = vadd.f32 %v8183_v54, %v5267_v55  ;;  %v3845_v33 = vadd.f32 %v3801_v11, %v3419_v18  ;;  %v8902_v55 = vld [vmem:[#allocation122_spill] sm:$0xff] }
 0x406   : > { %v3421_v19 = vadd.f32 %v8898_v4, %v2739_v8 }
 0x407   : > { %v5335_v50 = vmax.f32 %v5303_v13, 0.0  ;;  %v4160_v31 = vadd.f32 %v4116_v12, %v3845_v33  ;;  %v5229_v12 = vpop.f32.mrf.mxu1  ;;  %v8903_v13 = vld [vmem:[#allocation84_spill] sm:$0xff] }
 0x408   : > { %v2011_v33 = vadd.f32 %v8147_v9, %v8903_v13 }
 0x409   : > { %v5367_v59 = vpack.c.bf16 %v5335_v50, %v5335_v50  ;;  %v4842_v62 = vadd.f32 %v4798_v51, %v4160_v31  ;;  %v4126_v14 = vpop.f32.mrf.mxu3 }
 0x40b   : > { %5399 = vst.msk [vmem:[%s8205_s15 + $0x5c] sm:$0xf] %vm524_vm3, %v5367_v59  ;;  %v5268_v17 = vadd.f32 %v5224_v63, %v4842_v62  ;;  %v2009_v63 = vadd.f32 %v8138_v28, %v8899_v26  ;;  %v8554_v28 = vld [vmem:[%s8629_s4] ss:$0 sm:$0xff]  ;;  %v8906_v62 = vld [vmem:[#allocation125_spill] sm:$0xff]  ;;  %v4808_v47 = vpop.f32.mrf.mxu0 }
 0x40c   : > { %v3803_v42 = vpop.f32.mrf.mxu2 }
 0x40d   : > { %v5304_v2 = vadd.f32 %v8183_v54, %v5268_v17  ;;  %v3846_v29 = vadd.f32 %v3803_v42, %v3420_v10  ;;  %v2427_v15 = vadd.f32 %v8901_v39, %v2009_v63  ;;  %v8907_v42 = vld [vmem:[#allocation88_spill] sm:$0xff] }
 0x40f   : > { %v5336_v60 = vmax.f32 %v5304_v2, 0.0  ;;  %v4161_v3 = vadd.f32 %v4118_v23, %v3846_v29  ;;  %v5231_v37 = vpop.f32.mrf.mxu1  ;;  %v2741_v16 = vadd.f32 %v8904_v24, %v2427_v15  ;;  %v2014_v2 = vadd.f32 %v8150_v43, %v8907_v42 }
 0x411   : > { %v5368_v6 = vpack.c.bf16 %v5336_v60, %v5336_v60  ;;  %v4843_v56 = vadd.f32 %v4800_v34, %v4161_v3  ;;  %v3423_v35 = vadd.f32 %v8906_v62, %v2741_v16  ;;  %v8909_v3 = vld [vmem:[#allocation98_spill] sm:$0xff] }
 0x412   : > { %v2429_v53 = vadd.f32 %v8909_v3, %v2014_v2 }
 0x413   : > { %5400 = vst.msk [vmem:[%s8205_s15 + $0x60] sm:$0xf] %vm524_vm3, %v5368_v6  ;;  %v5269_v38 = vadd.f32 %v5226_v49, %v4843_v56  ;;  %v2428_v49 = vadd.f32 %v8905_v5, %v2011_v33  ;;  %v4128_v56 = vpop.f32.mrf.mxu3  ;;  %v4810_v43 = vpop.f32.mrf.mxu0  ;;  %v8916_v33 = vld [vmem:[#allocation131_spill] sm:$0xff] }
 0x414   : > { %v3806_v51 = vpop.f32.mrf.mxu2 }
 0x415   : > { %v5305_v41 = vadd.f32 %v8183_v54, %v5269_v38  ;;  %v3847_v32 = vadd.f32 %v3806_v51, %v3421_v19  ;;  %v3422_v54 = vadd.f32 %v8902_v55, %v2740_v0  ;;  %v2742_v46 = vadd.f32 %v8908_v57, %v2428_v49  ;;  %v8911_v38 = vld [vmem:[#allocation91_spill] sm:$0xff] }
 0x416   : > { %v2016_v4 = vadd.f32 %v8159_v44, %v8911_v38 }
 0x417   : > { %v5337_v58 = vmax.f32 %v5305_v41, 0.0  ;;  %v4162_v1 = vadd.f32 %v4121_v36, %v3847_v32  ;;  %v5234_v10 = vpop.f32.mrf.mxu1  ;;  %v8912_v41 = vld [vmem:[#allocation99_spill] sm:$0xff] }
 0x418   : > { %v2743_v32 = vadd.f32 %v8912_v41, %v2429_v53 }
 0x419   : > { %v5369_v7 = vpack.c.bf16 %v5337_v58, %v5337_v58  ;;  %v4844_v30 = vadd.f32 %v4803_v61, %v4162_v1  ;;  %v8910_v61 = vld [vmem:[#allocation127_spill] sm:$0xff]  ;;  %v8913_v1 = vld [vmem:[#allocation101_spill] sm:$0xff] }
 0x41a   : > { %v3424_v6 = vadd.f32 %v8910_v61, %v2742_v46  ;;  %v2430_v25 = vadd.f32 %v8913_v1, %v2016_v4 }
 0x41b   : > { %5401 = vst.msk [vmem:[%s8205_s15 + $0x64] sm:$0xf] %vm524_vm3, %v5369_v7  ;;  %v5270_v40 = vadd.f32 %v5229_v12, %v4844_v30 }
 0x41c   : > { %v3808_v18 = vpop.f32.mrf.mxu2 }
 0x41d   : > { %v5306_v23 = vadd.f32 %v8554_v28, %v5270_v40  ;;  %v3848_v11 = vadd.f32 %v3808_v18, %v3422_v54  ;;  %v4131_v30 = vpop.f32.mrf.mxu3  ;;  %v8915_v54 = vld [vmem:[#allocation102_spill] sm:$0xff] }
 0x41f   : > { %v5338_v34 = vmax.f32 %v5306_v23, 0.0  ;;  %v4163_v52 = vadd.f32 %v4123_v48, %v3848_v11  ;;  %v5236_v26 = vpop.f32.mrf.mxu1  ;;  %v8914_v48 = vld [vmem:[#allocation129_spill] sm:$0xff] }
 0x420   : > { %v3425_v7 = vadd.f32 %v8914_v48, %v2743_v32 }
 0x421   : > { %v5370_v50 = vpack.c.bf16 %v5338_v34, %v5338_v34  ;;  %v4845_v31 = vadd.f32 %v4805_v20, %v4163_v52 }
 0x423   : > { %5402 = vst.msk [vmem:[%s8205_s15 + $0x68] sm:$0xf] %vm524_vm3, %v5370_v50  ;;  %v5271_v59 = vadd.f32 %v5231_v37, %v4845_v31  ;;  %v2744_v37 = vadd.f32 %v8915_v54, %v2430_v25 }
 0x424   : > { %v3811_v17 = vpop.f32.mrf.mxu2 }
 0x425   : > { %v5307_v45 = vadd.f32 %v8554_v28, %v5271_v59  ;;  %v3849_v9 = vadd.f32 %v3811_v17, %v3423_v35  ;;  %v3426_v34 = vadd.f32 %v8916_v33, %v2744_v37  ;;  %v4133_v50 = vpop.f32.mrf.mxu3 }
 0x427   : > { %v5339_v29 = vmax.f32 %v5307_v45, 0.0  ;;  %v4164_v36 = vadd.f32 %v4126_v14, %v3849_v9  ;;  %v5239_v18 = vpop.f32.mrf.mxu1 }
 0x428   : > { %v4813_v15 = vpop.f32.mrf.mxu0 }
 0x429   : > { %v5371_v22 = vpack.c.bf16 %v5339_v29, %v5339_v29  ;;  %v4846_v60 = vadd.f32 %v4808_v47, %v4164_v36 }
 0x42b   : > { %5403 = vst.msk [vmem:[%s8205_s15 + $0x6c] sm:$0xf] %vm524_vm3, %v5371_v22  ;;  %v5272_v8 = vadd.f32 %v5234_v10, %v4846_v60 }
 0x42c   : > { %v3813_v12 = vpop.f32.mrf.mxu2 }
 0x42d   : > { %v5308_v21 = vadd.f32 %v8554_v28, %v5272_v8  ;;  %v3850_v27 = vadd.f32 %v3813_v12, %v3424_v6 }
 0x42f   : > { %v5340_v19 = vmax.f32 %v5308_v21, 0.0  ;;  %v4165_v51 = vadd.f32 %v4128_v56, %v3850_v27  ;;  %v5241_v62 = vpop.f32.mrf.mxu1 }
 0x430   : > { %v4815_v5 = vpop.f32.mrf.mxu0 }
 0x431   : > { %v5372_v63 = vpack.c.bf16 %v5340_v19, %v5340_v19  ;;  %v4847_v58 = vadd.f32 %v4810_v43, %v4165_v51 }
 0x433   : > { %5404 = vst.msk [vmem:[%s8205_s15 + $0x70] sm:$0xf] %vm524_vm3, %v5372_v63  ;;  %v5273_v0 = vadd.f32 %v5236_v26, %v4847_v58 }
 0x434   : > { %v3816_v20 = vpop.f32.mrf.mxu2 }
 0x435   : > { %v5309_v39 = vadd.f32 %v8554_v28, %v5273_v0  ;;  %v3851_v44 = vadd.f32 %v3816_v20, %v3425_v7 }
 0x437   : > { %v5341_v40 = vmax.f32 %v5309_v39, 0.0  ;;  %v4166_v55 = vadd.f32 %v4131_v30, %v3851_v44 }
 0x439   : > { %v5373_v23 = vpack.c.bf16 %v5341_v40, %v5341_v40  ;;  %v4848_v11 = vadd.f32 %v4813_v15, %v4166_v55 }
 0x43b   : > { %5405 = vst.msk [vmem:[%s8205_s15 + $0x74] sm:$0xf] %vm524_vm3, %v5373_v23  ;;  %v5274_v13 = vadd.f32 %v5239_v18, %v4848_v11 }
 0x43c   : > { %v3818_v52 = vpop.f32.mrf.mxu2 }
 0x43d   : > { %v5310_v24 = vadd.f32 %v8554_v28, %v5274_v13  ;;  %v3852_v16 = vadd.f32 %v3818_v52, %v3426_v34 }
 0x43f   : > { %v5342_v31 = vmax.f32 %v5310_v24, 0.0  ;;  %v4167_v14 = vadd.f32 %v4133_v50, %v3852_v16 }
 0x441   : > { %v5374_v49 = vpack.c.bf16 %v5342_v31, %v5342_v31  ;;  %v4849_v59 = vadd.f32 %v4815_v5, %v4167_v14 }
 0x443   : > { %5406 = vst.msk [vmem:[%s8205_s15 + $0x78] sm:$0xf] %vm524_vm3, %v5374_v49  ;;  %v5275_v35 = vadd.f32 %v5241_v62, %v4849_v59 }
 0x445   : > { %v5311_v47 = vadd.f32 %v8554_v28, %v5275_v35 }
 0x447   : > { %v5343_v17 = vmax.f32 %v5311_v47, 0.0 }
 0x449   : > { %v5375_v45 = vpack.c.bf16 %v5343_v17, %v5343_v17 }
 0x44b   : > { %5407 = vst.msk [vmem:[%s8205_s15 + $0x7c] sm:$0xf] %vm524_vm3, %v5375_v45 }
 0x44c   : > { %6386 = shalt.err (!%p6383_p3)
}
 0x44d   : > { %s6425_s12 = smov 64   ;;  %s6426_s15 = smov 4  }
 0x44e   : > { %6282 = dma.vmem_to_hbm [thread:$0]  (%p6495_p5), %s5422_s6, 2048, %s5424_s7, %s5409_s22, %s6425_s12, %s6425_s12, %s6426_s15  }
 0x44f PF: > { %p6288_p4 = scmp.ge.s32.totalorder %s6421_s21, 2  ;;  %s5438_s17 = sand.u32 1, %s6409_s18  }
 0x450   : > { %s5439_s23 = scalar_lea.sflag [#allocation4], %s5438_s17 }
 0x451   : > { %p6285_p7 = pnand %p6288_p4, %p6499_p6 }
 0x453   : > { %p6286_p8 = pneg %p6285_p7 }
 0x455   : > { %6404 = dma.done.wait (%p6286_p8), %s5439_s23, 2048  }
 0x456   : > { %6406 = vsyncadd (%p6286_p8), %s5439_s23, 4294965248  ;;  %p15_p9 = scmp.ge.s32.totalorder %s6482_s24, 6   ;;  %s8917_s18 = smov %s6413_s19 }
 0x457   : > { %s8918_s19 = smov %s6417_s20  ;;  %s8919_s20 = smov %s6493_s27 }
 0x458   : > { %s8920_s21 = smov %s6482_s24  ;;  %17 = sbr.rel (!%p15_p9) target bundleno = 3 (0x3), region = 86 }
 0x45d   :  { %5445 = vsyncpa [#allocation4], 1 }
 0x45e   :  { %5447 = vsyncpa [#allocation4 + $0x1], 1 }

</bundles_post_ra>
